<compile_context>
chip_gen: v7x
topology: tpu7x:2x2x1
jax: 0.10.0
libtpu: 0.0.40
codegen_flags: <defaults>
</compile_context>

<pallas_src>
import functools
import math

import jax
import jax.numpy as jnp
from jax.experimental import pallas as pl
from jax.experimental.pallas import tpu as pltpu

# ---------------- configuration (small synthetic shapes) ----------------
B = 2            # batch
N = 8            # N_res
C_S = 32         # single-rep channels
C_Z = 16         # pair-rep channels
C_HIDDEN = 16    # per-head hidden
NUM_HEADS = 4
NUM_QK_POINTS = 4
NUM_V_POINTS = 8
INF = 1e5
EPS = 1e-8


# ---------------- Pallas linear kernel (x @ W + b), row-tiled ----------------
def _linear_kernel(x_ref, w_ref, b_ref, o_ref):
    o_ref[...] = (
        jnp.dot(x_ref[...], w_ref[...], preferred_element_type=jnp.float32)
        + b_ref[...]
    )


def pallas_linear(x, w, b, tile_m=256):
    """x: [..., in], w: [in, out], b: [out] -> [..., out] (f32)."""
    orig_shape = x.shape
    in_dim = orig_shape[-1]
    rows = 1
    for d in orig_shape[:-1]:
        rows *= d
    x2 = x.reshape(rows, in_dim).astype(jnp.float32)
    out_dim = w.shape[1]
    tm = min(tile_m, rows)           # tm == rows (full dim) or a multiple of 8
    out = pl.pallas_call(
        _linear_kernel,
        out_shape=jax.ShapeDtypeStruct((rows, out_dim), jnp.float32),
        grid=(pl.cdiv(rows, tm),),
        in_specs=[
            pl.BlockSpec((tm, in_dim), lambda i: (i, 0)),
            pl.BlockSpec((w.shape[0], out_dim), lambda i: (0, 0)),
            pl.BlockSpec((1, out_dim), lambda i: (0, 0)),
        ],
        out_specs=pl.BlockSpec((tm, out_dim), lambda i: (i, 0)),
        compiler_params=pltpu.CompilerParams(
            dimension_semantics=("parallel",),
            vmem_limit_bytes=64 * 1024 * 1024,
        ),
    )(x2, w, b.reshape(1, -1))
    return out.reshape(orig_shape[:-1] + (out_dim,))


# ---------------- Pallas attention-core kernel (all heads per grid step) ----------------
def _ipa_attention_kernel(
    hw_ref,      # SMEM [H]        softplus(head_weights) * sqrt(1/(3*Pq*9/2))
    qkv_ref,     # [N, 3*H*C]      fused [q | kv] projection (torch head-major layout)
    qp_ref,      # [N, H*Pq*3]     globally-framed query points   (h-major, p-major, xyz)
    kp_ref,      # [N, H*Pq*3]     globally-framed key points
    vp_ref,      # [N, H*Pv*3]     globally-framed value points
    zproj_ref,   # [N, N, H+Cz4]   fused z projection: [sqrt(1/3)*bias | down_z]
    mb_ref,      # [N, N]          mask bias  INF*(m_i*m_j - 1)
    o_ref,       # [N, H*C + H*Pv*3 + H*Cz4]   lane-dense concatenated output
    *,
    num_heads,
    c_hidden,
    num_qk_points,
    num_v_points,
    qk_scale,
):
    H, C, Pq, Pv = num_heads, c_hidden, num_qk_points, num_v_points
    HC = H * C

    mb = mb_ref[...]                     # [N, N]
    zp = zproj_ref[...]                  # [N, N, H+Cz4]
    pz = zp[:, :, H:]                    # [N, N, Cz4]   down-projected pair rep

    o_parts, opt_parts, p_list = [], [], []
    for h in range(H):
        # ---- per-head operand slices (static lane slices of the fused projections) ----
        q_h = qkv_ref[:, h * C:(h + 1) * C]                                # [N, C]
        k_h = qkv_ref[:, HC + 2 * h * C: HC + 2 * h * C + C]               # [N, C]
        v_h = qkv_ref[:, HC + 2 * h * C + C: HC + 2 * (h + 1) * C]         # [N, C]
        qp_h = qp_ref[:, h * Pq * 3:(h + 1) * Pq * 3]                      # [N, Pq*3]
        kp_h = kp_ref[:, h * Pq * 3:(h + 1) * Pq * 3]                      # [N, Pq*3]
        vp_h = vp_ref[:, h * Pv * 3:(h + 1) * Pv * 3]                      # [N, Pv*3]
        hw_h = hw_ref[h]                                                   # scalar (SMEM)

        # ---- fused scalar-QK + point-cross logits: one matmul per head ----
        # a = qk_scale*q@k^T - 0.5*hw*||qp_i - kp_j||^2 + bias + mask
        #   = [qk_scale*q | hw*qp] @ [k | kp]^T  - 0.5*hw*(|qp_i|^2 + |kp_j|^2) + bias + mask
        qsq = jnp.sum(qp_h * qp_h, axis=-1, keepdims=True)                 # [N, 1]
        ksq = jnp.sum(kp_h * kp_h, axis=-1, keepdims=True)                 # [N, 1]
        qcat = jnp.concatenate([q_h * qk_scale, qp_h * hw_h], axis=-1)     # [N, C+Pq*3]
        kcat = jnp.concatenate([k_h, kp_h], axis=-1)                       # [N, C+Pq*3]
        a = jax.lax.dot_general(
            qcat, kcat, (((1,), (1,)), ((), ())),
            preferred_element_type=jnp.float32,
        )                                                                  # [N, N]
        a = a + (-0.5 * hw_h) * (qsq + ksq.reshape(1, -1))
        a = a + zp[:, :, h] + mb        # pair bias (sqrt(1/3) folded into weights) + mask

        # ---- softmax over keys (f32; EUP reciprocal) ----
        a = a - jnp.max(a, axis=-1, keepdims=True)
        e = jnp.exp(a)
        p = e * pl.reciprocal(jnp.sum(e, axis=-1, keepdims=True), approx=True)
        p_list.append(p)

        # ---- fused value + value-point aggregation: one matmul per head ----
        vcat = jnp.concatenate([v_h, vp_h], axis=-1)                       # [N, C+Pv*3]
        ov = jnp.dot(p, vcat, preferred_element_type=jnp.float32)          # [N, C+Pv*3]
        o_parts.append(ov[:, :C])
        opt_parts.append(ov[:, C:])

    # ---- pair aggregation for all heads in one batched matmul ----
    # out[i, h, c] = sum_j p[h, i, j] * pz[i, j, c]   ('bqk,bkd->bqd' with b=i, q=h, k=j)
    p_all = jnp.stack(p_list, axis=1)                                      # [N, H, N]
    opair = jax.lax.dot_general(
        p_all, pz, (((2,), (1,)), ((0,), (0,))),
        preferred_element_type=jnp.float32,
    )                                                                      # [N, H, Cz4]
    opair_flat = opair.reshape(opair.shape[0], -1)                         # [N, H*Cz4]

    # ---- single lane-dense store: [o_0..o_H | opt_0..opt_H | opair] ----
    o_ref[...] = jnp.concatenate(o_parts + opt_parts + [opair_flat], axis=-1)


def _run_attention(hw, qkv, qp, kp, vp, zproj, mask_bias, *,
                   num_heads, c_hidden, num_qk_points, num_v_points):
    Bsz, Nres, Dqkv = qkv.shape
    Czb = zproj.shape[-1]
    Cz4 = Czb - num_heads
    out_d = num_heads * (c_hidden + num_v_points * 3 + Cz4)

    kernel = functools.partial(
        _ipa_attention_kernel,
        num_heads=num_heads,
        c_hidden=c_hidden,
        num_qk_points=num_qk_points,
        num_v_points=num_v_points,
        qk_scale=math.sqrt(1.0 / (3.0 * c_hidden)),
    )

    return pl.pallas_call(
        kernel,
        out_shape=jax.ShapeDtypeStruct((Bsz, Nres, out_d), jnp.float32),
        grid=(Bsz,),
        in_specs=[
            pl.BlockSpec(memory_space=pltpu.MemorySpace.SMEM),                   # hw
            pl.BlockSpec((None, Nres, Dqkv), lambda b: (b, 0, 0)),               # qkv
            pl.BlockSpec((None, Nres, qp.shape[-1]), lambda b: (b, 0, 0)),       # q_pts
            pl.BlockSpec((None, Nres, kp.shape[-1]), lambda b: (b, 0, 0)),       # k_pts
            pl.BlockSpec((None, Nres, vp.shape[-1]), lambda b: (b, 0, 0)),       # v_pts
            pl.BlockSpec((None, Nres, Nres, Czb), lambda b: (b, 0, 0, 0)),       # zproj
            pl.BlockSpec((None, Nres, Nres), lambda b: (b, 0, 0)),               # mask bias
        ],
        out_specs=pl.BlockSpec((None, Nres, out_d), lambda b: (b, 0, 0)),
        compiler_params=pltpu.CompilerParams(
            dimension_semantics=("parallel",),
            vmem_limit_bytes=64 * 1024 * 1024,
        ),
    )(hw, qkv, qp, kp, vp, zproj, mask_bias)


# ---------------- full IPA forward ----------------
def ipa_forward(params, s, z, rots, trans, mask):
    H, C, Pq, Pv = NUM_HEADS, C_HIDDEN, NUM_QK_POINTS, NUM_V_POINTS
    Bsz, Nres, _ = s.shape
    HC = H * C
    Cz4 = C_Z // 4

    # ---- fused single-rep projections: one pass over s ----
    ws = jnp.concatenate(
        [params["wq"], params["wkv"], params["wqp"], params["wkvp"]], axis=1)
    bs = jnp.concatenate(
        [params["bq"], params["bkv"], params["bqp"], params["bkvp"]], axis=0)
    s_proj = pallas_linear(s, ws, bs)                 # [B, N, 3HC + H*Pq*3 + H*(Pq+Pv)*3]

    qkv = s_proj[..., :3 * HC]                        # [B, N, 3HC]  (q | kv, head-major)
    qp_raw = s_proj[..., 3 * HC: 3 * HC + H * Pq * 3]
    kvp_raw = s_proj[..., 3 * HC + H * Pq * 3:]

    # query points: raw layout is [x-block | y-block | z-block] (torch split + stack(-1))
    qp = qp_raw.reshape(Bsz, Nres, 3, H * Pq).transpose(0, 1, 3, 2)   # [B, N, H*Pq, 3]
    qp = jnp.einsum("bnij,bnpj->bnpi", rots, qp) + trans[:, :, None, :]
    qp_flat = qp.reshape(Bsz, Nres, H * Pq * 3)

    kvp = kvp_raw.reshape(Bsz, Nres, 3, H * (Pq + Pv)).transpose(0, 1, 3, 2)
    kvp = jnp.einsum("bnij,bnpj->bnpi", rots, kvp) + trans[:, :, None, :]
    kvp = kvp.reshape(Bsz, Nres, H, Pq + Pv, 3)
    kp_flat = kvp[:, :, :, :Pq, :].reshape(Bsz, Nres, H * Pq * 3)
    vp_flat = kvp[:, :, :, Pq:, :].reshape(Bsz, Nres, H * Pv * 3)

    # ---- fused pair-rep projection: one pass over z, sqrt(1/3) folded into the bias weights ----
    b_scale = math.sqrt(1.0 / 3.0)
    wz = jnp.concatenate([params["wb"] * b_scale, params["wdz"]], axis=1)
    bz = jnp.concatenate([params["bb"] * b_scale, params["bdz"]], axis=0)
    zproj = pallas_linear(z, wz, bz)                  # [B, N, N, H + Cz4]

    mask_bias = INF * (mask[:, :, None] * mask[:, None, :] - 1.0)        # [B, N, N]
    hw = jax.nn.softplus(params["head_weights"]) * math.sqrt(
        1.0 / (3.0 * (Pq * 9.0 / 2.0)))

    out = _run_attention(
        hw, qkv, qp_flat, kp_flat, vp_flat, zproj, mask_bias,
        num_heads=H, c_hidden=C, num_qk_points=Pq, num_v_points=Pv,
    )                                                 # [B, N, H*C + H*Pv*3 + H*Cz4]

    # ---- epilogue: split wide output, frame-invert points, norms, output projection ----
    o = out[..., :HC]                                                    # [B, N, H*C]
    o_pt_g = out[..., HC:HC + H * Pv * 3].reshape(Bsz, Nres, H * Pv, 3)  # [B, N, H*Pv, 3]
    o_pair = out[..., HC + H * Pv * 3:]                                  # [B, N, H*Cz4]

    o_pt_local = jnp.einsum(
        "bnji,bnpj->bnpi", rots, o_pt_g - trans[:, :, None, :])          # invert_apply
    o_pt_norm = jnp.sqrt(jnp.sum(o_pt_local ** 2, axis=-1) + EPS)        # [B, N, H*Pv]

    feats = jnp.concatenate(
        [
            o,
            o_pt_local[..., 0],
            o_pt_local[..., 1],
            o_pt_local[..., 2],
            o_pt_norm,
            o_pair,
        ],
        axis=-1,
    )
    return pallas_linear(feats, params["wout"], params["bout"])


# ---------------- deterministic parameter / input construction ----------------
def _init_linear(key, fan_in, fan_out):
    # deterministic LeCun-style normal init (synthetic; bias = 0 as in the module)
    w = jax.random.normal(key, (fan_in, fan_out), jnp.float32) / math.sqrt(fan_in)
    b = jnp.zeros((fan_out,), jnp.float32)
    return w, b


def make_params(key):
    H, C, Pq, Pv = NUM_HEADS, C_HIDDEN, NUM_QK_POINTS, NUM_V_POINTS
    hc = H * C
    concat_out_dim = C_Z // 4 + C + Pv * 4
    keys = jax.random.split(key, 7)
    p = {}
    p["wq"], p["bq"] = _init_linear(keys[0], C_S, hc)
    p["wkv"], p["bkv"] = _init_linear(keys[1], C_S, 2 * hc)
    p["wqp"], p["bqp"] = _init_linear(keys[2], C_S, H * Pq * 3)
    p["wkvp"], p["bkvp"] = _init_linear(keys[3], C_S, H * (Pq + Pv) * 3)
    p["wb"], p["bb"] = _init_linear(keys[4], C_Z, H)
    p["wdz"], p["bdz"] = _init_linear(keys[5], C_Z, C_Z // 4)
    # NOTE: the torch module inits linear_out to zero ('final'); we use a random
    # init so the synthetic kernel produces a non-trivial output.
    p["wout"], p["bout"] = _init_linear(keys[6], H * concat_out_dim, C_S)
    # softplus_inverse(1.0), as in ipa_point_weights_init_
    p["head_weights"] = jnp.full((H,), 0.541324854612918, jnp.float32)
    return p


def quat_to_rot(q):
    q = q / jnp.linalg.norm(q, axis=-1, keepdims=True)
    w, x, y, z = q[..., 0], q[..., 1], q[..., 2], q[..., 3]
    return jnp.stack(
        [
            jnp.stack([1 - 2 * (y * y + z * z), 2 * (x * y - w * z), 2 * (x * z + w * y)], -1),
            jnp.stack([2 * (x * y + w * z), 1 - 2 * (x * x + z * z), 2 * (y * z - w * x)], -1),
            jnp.stack([2 * (x * z - w * y), 2 * (y * z + w * x), 1 - 2 * (x * x + y * y)], -1),
        ],
        axis=-2,
    )


if __name__ == "__main__":
    key = jax.random.PRNGKey(0)
    k_par, k_s, k_z, k_q, k_t, k_m = jax.random.split(key, 6)

    params = make_params(k_par)
    s = jax.random.normal(k_s, (B, N, C_S), jnp.float32)
    z = jax.random.normal(k_z, (B, N, N, C_Z), jnp.float32)
    rots = quat_to_rot(jax.random.normal(k_q, (B, N, 4), jnp.float32))
    trans = jax.random.normal(k_t, (B, N, 3), jnp.float32)
    mask = (jax.random.uniform(k_m, (B, N)) > 0.2).astype(jnp.float32)

    fwd = jax.jit(ipa_forward)
    out = fwd(params, s, z, rots, trans, mask)
    out = jax.block_until_ready(out)
    assert out.shape == (B, N, C_S)
    assert bool(jnp.all(jnp.isfinite(out)))
    print("KERNEL_OK")
</pallas_src>

<mosaic_0001>
module attributes {stable_mosaic.version = 11 : i64} {
  func.func @_linear_kernel(%arg0: i32, %arg1: memref<16x32xf32, #tpu.memory_space<vmem>>, %arg2: memref<32x384xf32, #tpu.memory_space<vmem>>, %arg3: memref<1x384xf32, #tpu.memory_space<vmem>>, %arg4: memref<16x384xf32, #tpu.memory_space<vmem>>) attributes {dimension_semantics = [#tpu.dimension_semantics<parallel>], iteration_bounds = array<i64: 1>, scalar_prefetch = 0 : i64, scratch_operands = 0 : i64, tpu.core_type = #tpu.core_type<tc>, window_params = [{transform_indices = @transform_0, window_bounds = array<i64: 16, 32>}, {pipeline_mode = #tpu.pipeline_mode<synchronous>, transform_indices = @transform_1, window_bounds = array<i64: 32, 384>}, {pipeline_mode = #tpu.pipeline_mode<synchronous>, transform_indices = @transform_2, window_bounds = array<i64: 1, 384>}, {transform_indices = @transform_3, window_bounds = array<i64: 16, 384>}]} {
    %c0 = arith.constant 0 : index
    %c0_0 = arith.constant 0 : index
    %0 = vector.load %arg1[%c0, %c0_0] : memref<16x32xf32, #tpu.memory_space<vmem>>, vector<16x32xf32>
    %c0_1 = arith.constant 0 : index
    %c0_2 = arith.constant 0 : index
    %1 = vector.load %arg2[%c0_1, %c0_2] : memref<32x384xf32, #tpu.memory_space<vmem>>, vector<32x384xf32>
    %cst = arith.constant dense<0.000000e+00> : vector<16x384xf32>
    %2 = tpu.matmul %0, %1, %cst {dimension_numbers = #tpu.dot_dimension_numbers<[1], [0], [0], [1], [0, 0, 1, 1], [], []>} : vector<16x32xf32>, vector<32x384xf32>, vector<16x384xf32> -> vector<16x384xf32>
    %c0_3 = arith.constant 0 : index
    %c0_4 = arith.constant 0 : index
    %3 = vector.load %arg3[%c0_3, %c0_4] : memref<1x384xf32, #tpu.memory_space<vmem>>, vector<1x384xf32>
    %4 = vector.broadcast %3 : vector<1x384xf32> to vector<16x384xf32>
    %5 = arith.addf %2, %4 : vector<16x384xf32>
    %c0_5 = arith.constant 0 : index
    %c0_6 = arith.constant 0 : index
    %6 = vector.load %arg4[%c0_5, %c0_6] : memref<16x384xf32, #tpu.memory_space<vmem>>, vector<16x384xf32>
    tpu.vector_store %arg4[%c0_5, %c0_6], %5 {strides = array<i32>} : memref<16x384xf32, #tpu.memory_space<vmem>>, vector<16x384xf32>,
    return
  }
  func.func @transform_0(%arg0: i32) -> (i32, i32) {
    %c0_i32 = arith.constant 0 : i32
    %c0_i32_0 = arith.constant 0 : i32
    return %arg0, %c0_i32 : i32, i32
  }
  func.func @transform_1(%arg0: i32) -> (i32, i32) {
    %c0_i32 = arith.constant 0 : i32
    %c0_i32_0 = arith.constant 0 : i32
    %c0_i32_1 = arith.constant 0 : i32
    return %c0_i32, %c0_i32_0 : i32, i32
  }
  func.func @transform_2(%arg0: i32) -> (i32, i32) {
    %c0_i32 = arith.constant 0 : i32
    %c0_i32_0 = arith.constant 0 : i32
    %c0_i32_1 = arith.constant 0 : i32
    return %c0_i32, %c0_i32_0 : i32, i32
  }
  func.func @transform_3(%arg0: i32) -> (i32, i32) {
    %c0_i32 = arith.constant 0 : i32
    %c0_i32_0 = arith.constant 0 : i32
    return %arg0, %c0_i32 : i32, i32
  }
}

module attributes {stable_mosaic.version = 11 : i64} {
  func.func @_linear_kernel(%arg0: i32, %arg1: memref<128x16xf32, #tpu.memory_space<vmem>>, %arg2: memref<16x8xf32, #tpu.memory_space<vmem>>, %arg3: memref<1x8xf32, #tpu.memory_space<vmem>>, %arg4: memref<128x8xf32, #tpu.memory_space<vmem>>) attributes {dimension_semantics = [#tpu.dimension_semantics<parallel>], iteration_bounds = array<i64: 1>, scalar_prefetch = 0 : i64, scratch_operands = 0 : i64, tpu.core_type = #tpu.core_type<tc>, window_params = [{transform_indices = @transform_0, window_bounds = array<i64: 128, 16>}, {pipeline_mode = #tpu.pipeline_mode<synchronous>, transform_indices = @transform_1, window_bounds = array<i64: 16, 8>}, {pipeline_mode = #tpu.pipeline_mode<synchronous>, transform_indices = @transform_2, window_bounds = array<i64: 1, 8>}, {transform_indices = @transform_3, window_bounds = array<i64: 128, 8>}]} {
    %c0 = arith.constant 0 : index
    %c0_0 = arith.constant 0 : index
    %0 = vector.load %arg1[%c0, %c0_0] : memref<128x16xf32, #tpu.memory_space<vmem>>, vector<128x16xf32>
    %c0_1 = arith.constant 0 : index
    %c0_2 = arith.constant 0 : index
    %1 = vector.load %arg2[%c0_1, %c0_2] : memref<16x8xf32, #tpu.memory_space<vmem>>, vector<16x8xf32>
    %cst = arith.constant dense<0.000000e+00> : vector<128x8xf32>
    %2 = tpu.matmul %0, %1, %cst {dimension_numbers = #tpu.dot_dimension_numbers<[1], [0], [0], [1], [0, 0, 1, 1], [], []>} : vector<128x16xf32>, vector<16x8xf32>, vector<128x8xf32> -> vector<128x8xf32>
    %c0_3 = arith.constant 0 : index
    %c0_4 = arith.constant 0 : index
    %3 = vector.load %arg3[%c0_3, %c0_4] : memref<1x8xf32, #tpu.memory_space<vmem>>, vector<1x8xf32>
    %4 = vector.broadcast %3 : vector<1x8xf32> to vector<128x8xf32>
    %5 = arith.addf %2, %4 : vector<128x8xf32>
    %c0_5 = arith.constant 0 : index
    %c0_6 = arith.constant 0 : index
    %6 = vector.load %arg4[%c0_5, %c0_6] : memref<128x8xf32, #tpu.memory_space<vmem>>, vector<128x8xf32>
    tpu.vector_store %arg4[%c0_5, %c0_6], %5 {strides = array<i32>} : memref<128x8xf32, #tpu.memory_space<vmem>>, vector<128x8xf32>,
    return
  }
  func.func @transform_0(%arg0: i32) -> (i32, i32) {
    %c0_i32 = arith.constant 0 : i32
    %c0_i32_0 = arith.constant 0 : i32
    return %arg0, %c0_i32 : i32, i32
  }
  func.func @transform_1(%arg0: i32) -> (i32, i32) {
    %c0_i32 = arith.constant 0 : i32
    %c0_i32_0 = arith.constant 0 : i32
    %c0_i32_1 = arith.constant 0 : i32
    return %c0_i32, %c0_i32_0 : i32, i32
  }
  func.func @transform_2(%arg0: i32) -> (i32, i32) {
    %c0_i32 = arith.constant 0 : i32
    %c0_i32_0 = arith.constant 0 : i32
    %c0_i32_1 = arith.constant 0 : i32
    return %c0_i32, %c0_i32_0 : i32, i32
  }
  func.func @transform_3(%arg0: i32) -> (i32, i32) {
    %c0_i32 = arith.constant 0 : i32
    %c0_i32_0 = arith.constant 0 : i32
    return %arg0, %c0_i32 : i32, i32
  }
}

module attributes {stable_mosaic.version = 11 : i64} {
  func.func @_ipa_attention_kernel(%arg0: i32, %arg1: memref<4xf32, #tpu.memory_space<smem>>, %arg2: memref<1x8x192xf32, #tpu.memory_space<vmem>>, %arg3: memref<1x8x48xf32, #tpu.memory_space<vmem>>, %arg4: memref<1x8x48xf32, #tpu.memory_space<vmem>>, %arg5: memref<1x8x96xf32, #tpu.memory_space<vmem>>, %arg6: memref<1x8x8x8xf32, #tpu.memory_space<vmem>>, %arg7: memref<1x8x8xf32, #tpu.memory_space<vmem>>, %arg8: memref<1x8x176xf32, #tpu.memory_space<vmem>>) attributes {dimension_semantics = [#tpu.dimension_semantics<parallel>], iteration_bounds = array<i64: 2>, scalar_prefetch = 0 : i64, scratch_operands = 0 : i64, tpu.core_type = #tpu.core_type<tc>, window_params = [{transform_indices = @transform_0, window_bounds = array<i64: 4>}, {transform_indices = @transform_1, window_bounds = array<i64: 1, 8, 192>}, {transform_indices = @transform_2, window_bounds = array<i64: 1, 8, 48>}, {transform_indices = @transform_3, window_bounds = array<i64: 1, 8, 48>}, {transform_indices = @transform_4, window_bounds = array<i64: 1, 8, 96>}, {transform_indices = @transform_5, window_bounds = array<i64: 1, 8, 8, 8>}, {transform_indices = @transform_6, window_bounds = array<i64: 1, 8, 8>}, {transform_indices = @transform_7, window_bounds = array<i64: 1, 8, 176>}]} {
    %c0 = arith.constant 0 : index
    %c0_0 = arith.constant 0 : index
    %c0_1 = arith.constant 0 : index
    %0 = vector.load %arg7[%c0, %c0_0, %c0_1] : memref<1x8x8xf32, #tpu.memory_space<vmem>>, vector<1x8x8xf32>
    %1 = vector.shape_cast %0 : vector<1x8x8xf32> to vector<8x8xf32>
    %c0_2 = arith.constant 0 : index
    %c0_3 = arith.constant 0 : index
    %c0_4 = arith.constant 0 : index
    %c0_5 = arith.constant 0 : index
    %2 = vector.load %arg6[%c0_2, %c0_3, %c0_4, %c0_5] : memref<1x8x8x8xf32, #tpu.memory_space<vmem>>, vector<1x8x8x8xf32>
    %3 = vector.shape_cast %2 : vector<1x8x8x8xf32> to vector<8x8x8xf32>
    %4 = vector.extract_strided_slice %3 {offsets = [0, 0, 4], sizes = [8, 8, 4], strides = [1, 1, 1]} : vector<8x8x8xf32> to vector<8x8x4xf32>
    %c0_6 = arith.constant 0 : index
    %c0_7 = arith.constant 0 : index
    %c0_8 = arith.constant 0 : index
    %5 = vector.load %arg2[%c0_6, %c0_7, %c0_8] : memref<1x8x192xf32, #tpu.memory_space<vmem>>, vector<1x8x16xf32>
    %6 = vector.shape_cast %5 : vector<1x8x16xf32> to vector<8x16xf32>
    %c0_9 = arith.constant 0 : index
    %c0_10 = arith.constant 0 : index
    %c64 = arith.constant 64 : index
    %7 = vector.load %arg2[%c0_9, %c0_10, %c64] : memref<1x8x192xf32, #tpu.memory_space<vmem>>, vector<1x8x16xf32>
    %8 = vector.shape_cast %7 : vector<1x8x16xf32> to vector<8x16xf32>
    %c0_11 = arith.constant 0 : index
    %c0_12 = arith.constant 0 : index
    %c80 = arith.constant 80 : index
    %9 = vector.load %arg2[%c0_11, %c0_12, %c80] : memref<1x8x192xf32, #tpu.memory_space<vmem>>, vector<1x8x16xf32>
    %10 = vector.shape_cast %9 : vector<1x8x16xf32> to vector<8x16xf32>
    %c0_13 = arith.constant 0 : index
    %c0_14 = arith.constant 0 : index
    %c0_15 = arith.constant 0 : index
    %11 = vector.load %arg3[%c0_13, %c0_14, %c0_15] : memref<1x8x48xf32, #tpu.memory_space<vmem>>, vector<1x8x12xf32>
    %12 = vector.shape_cast %11 : vector<1x8x12xf32> to vector<8x12xf32>
    %c0_16 = arith.constant 0 : index
    %c0_17 = arith.constant 0 : index
    %c0_18 = arith.constant 0 : index
    %13 = vector.load %arg4[%c0_16, %c0_17, %c0_18] : memref<1x8x48xf32, #tpu.memory_space<vmem>>, vector<1x8x12xf32>
    %14 = vector.shape_cast %13 : vector<1x8x12xf32> to vector<8x12xf32>
    %c0_19 = arith.constant 0 : index
    %c0_20 = arith.constant 0 : index
    %c0_21 = arith.constant 0 : index
    %15 = vector.load %arg5[%c0_19, %c0_20, %c0_21] : memref<1x8x96xf32, #tpu.memory_space<vmem>>, vector<1x8x24xf32>
    %16 = vector.shape_cast %15 : vector<1x8x24xf32> to vector<8x24xf32>
    %c0_22 = arith.constant 0 : index
    %17 = memref.load %arg1[%c0_22] : memref<4xf32, #tpu.memory_space<smem>>
    %18 = arith.mulf %12, %12 : vector<8x12xf32>
    %cst = arith.constant dense<0.000000e+00> : vector<8xf32>
    %19 = vector.multi_reduction <add>, %18, %cst [1] : vector<8x12xf32> to vector<8xf32>
    %20 = vector.shape_cast %19 : vector<8xf32> to vector<8x1xf32>
    %21 = arith.mulf %14, %14 : vector<8x12xf32>
    %cst_23 = arith.constant dense<0.000000e+00> : vector<8xf32>
    %22 = vector.multi_reduction <add>, %21, %cst_23 [1] : vector<8x12xf32> to vector<8xf32>
    %23 = vector.shape_cast %22 : vector<8xf32> to vector<8x1xf32>
    %cst_24 = arith.constant 0.144337565 : f32
    %24 = vector.broadcast %cst_24 : f32 to vector<8x16xf32>
    %25 = arith.mulf %6, %24 : vector<8x16xf32>
    %26 = vector.broadcast %17 : f32 to vector<8x12xf32>
    %27 = arith.mulf %12, %26 : vector<8x12xf32>
    %28 = tpu.concatenate %25, %27 in 1 : vector<8x16xf32>, vector<8x12xf32> -> vector<8x28xf32>
    %29 = tpu.concatenate %8, %14 in 1 : vector<8x16xf32>, vector<8x12xf32> -> vector<8x28xf32>
    %cst_25 = arith.constant dense<0.000000e+00> : vector<8x8xf32>
    %30 = tpu.matmul %28, %29, %cst_25 {dimension_numbers = #tpu.dot_dimension_numbers<[1], [1], [0], [0], [0, 0, 1, 0], [], []>} : vector<8x28xf32>, vector<8x28xf32>, vector<8x8xf32> -> vector<8x8xf32>
    %cst_26 = arith.constant -5.000000e-01 : f32
    %31 = arith.mulf %cst_26, %17 : f32
    %32 = vector.shape_cast %23 : vector<8x1xf32> to vector<1x8xf32>
    %33 = vector.broadcast %20 : vector<8x1xf32> to vector<8x8xf32>
    %34 = vector.broadcast %32 : vector<1x8xf32> to vector<8x8xf32>
    %35 = arith.addf %33, %34 : vector<8x8xf32>
    %36 = vector.broadcast %31 : f32 to vector<8x8xf32>
    %37 = arith.mulf %36, %35 : vector<8x8xf32>
    %38 = arith.addf %30, %37 : vector<8x8xf32>
    %39 = vector.extract_strided_slice %3 {offsets = [0, 0, 0], sizes = [8, 8, 1], strides = [1, 1, 1]} : vector<8x8x8xf32> to vector<8x8x1xf32>
    %40 = vector.shape_cast %39 : vector<8x8x1xf32> to vector<8x8xf32>
    %41 = arith.addf %38, %40 : vector<8x8xf32>
    %42 = arith.addf %41, %1 : vector<8x8xf32>
    %cst_27 = arith.constant dense<0xFF800000> : vector<8xf32>
    %43 = vector.multi_reduction <maximumf>, %42, %cst_27 [1] : vector<8x8xf32> to vector<8xf32>
    %44 = vector.shape_cast %43 : vector<8xf32> to vector<8x1xf32>
    %45 = vector.broadcast %44 : vector<8x1xf32> to vector<8x8xf32>
    %46 = arith.subf %42, %45 : vector<8x8xf32>
    %47 = math.exp %46 : vector<8x8xf32>
    %cst_28 = arith.constant dense<0.000000e+00> : vector<8xf32>
    %48 = vector.multi_reduction <add>, %47, %cst_28 [1] : vector<8x8xf32> to vector<8xf32>
    %49 = vector.shape_cast %48 : vector<8xf32> to vector<8x1xf32>
    %50 = tpu.reciprocal %49 {approx = true} : vector<8x1xf32> -> vector<8x1xf32>
    %51 = vector.broadcast %50 : vector<8x1xf32> to vector<8x8xf32>
    %52 = arith.mulf %47, %51 : vector<8x8xf32>
    %53 = tpu.concatenate %10, %16 in 1 : vector<8x16xf32>, vector<8x24xf32> -> vector<8x40xf32>
    %cst_29 = arith.constant dense<0.000000e+00> : vector<8x40xf32>
    %54 = tpu.matmul %52, %53, %cst_29 {dimension_numbers = #tpu.dot_dimension_numbers<[1], [0], [0], [1], [0, 0, 1, 1], [], []>} : vector<8x8xf32>, vector<8x40xf32>, vector<8x40xf32> -> vector<8x40xf32>
    %55 = vector.extract_strided_slice %54 {offsets = [0, 0], sizes = [8, 16], strides = [1, 1]} : vector<8x40xf32> to vector<8x16xf32>
    %56 = vector.extract_strided_slice %54 {offsets = [0, 16], sizes = [8, 24], strides = [1, 1]} : vector<8x40xf32> to vector<8x24xf32>
    %c0_30 = arith.constant 0 : index
    %c0_31 = arith.constant 0 : index
    %c16 = arith.constant 16 : index
    %57 = vector.load %arg2[%c0_30, %c0_31, %c16] : memref<1x8x192xf32, #tpu.memory_space<vmem>>, vector<1x8x16xf32>
    %58 = vector.shape_cast %57 : vector<1x8x16xf32> to vector<8x16xf32>
    %c0_32 = arith.constant 0 : index
    %c0_33 = arith.constant 0 : index
    %c96 = arith.constant 96 : index
    %59 = vector.load %arg2[%c0_32, %c0_33, %c96] : memref<1x8x192xf32, #tpu.memory_space<vmem>>, vector<1x8x16xf32>
    %60 = vector.shape_cast %59 : vector<1x8x16xf32> to vector<8x16xf32>
    %c0_34 = arith.constant 0 : index
    %c0_35 = arith.constant 0 : index
    %c112 = arith.constant 112 : index
    %61 = vector.load %arg2[%c0_34, %c0_35, %c112] : memref<1x8x192xf32, #tpu.memory_space<vmem>>, vector<1x8x16xf32>
    %62 = vector.shape_cast %61 : vector<1x8x16xf32> to vector<8x16xf32>
    %c0_36 = arith.constant 0 : index
    %c0_37 = arith.constant 0 : index
    %c12 = arith.constant 12 : index
    %63 = vector.load %arg3[%c0_36, %c0_37, %c12] : memref<1x8x48xf32, #tpu.memory_space<vmem>>, vector<1x8x12xf32>
    %64 = vector.shape_cast %63 : vector<1x8x12xf32> to vector<8x12xf32>
    %c0_38 = arith.constant 0 : index
    %c0_39 = arith.constant 0 : index
    %c12_40 = arith.constant 12 : index
    %65 = vector.load %arg4[%c0_38, %c0_39, %c12_40] : memref<1x8x48xf32, #tpu.memory_space<vmem>>, vector<1x8x12xf32>
    %66 = vector.shape_cast %65 : vector<1x8x12xf32> to vector<8x12xf32>
    %c0_41 = arith.constant 0 : index
    %c0_42 = arith.constant 0 : index
    %c24 = arith.constant 24 : index
    %67 = vector.load %arg5[%c0_41, %c0_42, %c24] : memref<1x8x96xf32, #tpu.memory_space<vmem>>, vector<1x8x24xf32>
    %68 = vector.shape_cast %67 : vector<1x8x24xf32> to vector<8x24xf32>
    %c1 = arith.constant 1 : index
    %69 = memref.load %arg1[%c1] : memref<4xf32, #tpu.memory_space<smem>>
    %70 = arith.mulf %64, %64 : vector<8x12xf32>
    %cst_43 = arith.constant dense<0.000000e+00> : vector<8xf32>
    %71 = vector.multi_reduction <add>, %70, %cst_43 [1] : vector<8x12xf32> to vector<8xf32>
    %72 = vector.shape_cast %71 : vector<8xf32> to vector<8x1xf32>
    %73 = arith.mulf %66, %66 : vector<8x12xf32>
    %cst_44 = arith.constant dense<0.000000e+00> : vector<8xf32>
    %74 = vector.multi_reduction <add>, %73, %cst_44 [1] : vector<8x12xf32> to vector<8xf32>
    %75 = vector.shape_cast %74 : vector<8xf32> to vector<8x1xf32>
    %cst_45 = arith.constant 0.144337565 : f32
    %76 = vector.broadcast %cst_45 : f32 to vector<8x16xf32>
    %77 = arith.mulf %58, %76 : vector<8x16xf32>
    %78 = vector.broadcast %69 : f32 to vector<8x12xf32>
    %79 = arith.mulf %64, %78 : vector<8x12xf32>
    %80 = tpu.concatenate %77, %79 in 1 : vector<8x16xf32>, vector<8x12xf32> -> vector<8x28xf32>
    %81 = tpu.concatenate %60, %66 in 1 : vector<8x16xf32>, vector<8x12xf32> -> vector<8x28xf32>
    %cst_46 = arith.constant dense<0.000000e+00> : vector<8x8xf32>
    %82 = tpu.matmul %80, %81, %cst_46 {dimension_numbers = #tpu.dot_dimension_numbers<[1], [1], [0], [0], [0, 0, 1, 0], [], []>} : vector<8x28xf32>, vector<8x28xf32>, vector<8x8xf32> -> vector<8x8xf32>
    %cst_47 = arith.constant -5.000000e-01 : f32
    %83 = arith.mulf %cst_47, %69 : f32
    %84 = vector.shape_cast %75 : vector<8x1xf32> to vector<1x8xf32>
    %85 = vector.broadcast %72 : vector<8x1xf32> to vector<8x8xf32>
    %86 = vector.broadcast %84 : vector<1x8xf32> to vector<8x8xf32>
    %87 = arith.addf %85, %86 : vector<8x8xf32>
    %88 = vector.broadcast %83 : f32 to vector<8x8xf32>
    %89 = arith.mulf %88, %87 : vector<8x8xf32>
    %90 = arith.addf %82, %89 : vector<8x8xf32>
    %91 = vector.extract_strided_slice %3 {offsets = [0, 0, 1], sizes = [8, 8, 1], strides = [1, 1, 1]} : vector<8x8x8xf32> to vector<8x8x1xf32>
    %92 = vector.shape_cast %91 : vector<8x8x1xf32> to vector<8x8xf32>
    %93 = arith.addf %90, %92 : vector<8x8xf32>
    %94 = arith.addf %93, %1 : vector<8x8xf32>
    %cst_48 = arith.constant dense<0xFF800000> : vector<8xf32>
    %95 = vector.multi_reduction <maximumf>, %94, %cst_48 [1] : vector<8x8xf32> to vector<8xf32>
    %96 = vector.shape_cast %95 : vector<8xf32> to vector<8x1xf32>
    %97 = vector.broadcast %96 : vector<8x1xf32> to vector<8x8xf32>
    %98 = arith.subf %94, %97 : vector<8x8xf32>
    %99 = math.exp %98 : vector<8x8xf32>
    %cst_49 = arith.constant dense<0.000000e+00> : vector<8xf32>
    %100 = vector.multi_reduction <add>, %99, %cst_49 [1] : vector<8x8xf32> to vector<8xf32>
    %101 = vector.shape_cast %100 : vector<8xf32> to vector<8x1xf32>
    %102 = tpu.reciprocal %101 {approx = true} : vector<8x1xf32> -> vector<8x1xf32>
    %103 = vector.broadcast %102 : vector<8x1xf32> to vector<8x8xf32>
    %104 = arith.mulf %99, %103 : vector<8x8xf32>
    %105 = tpu.concatenate %62, %68 in 1 : vector<8x16xf32>, vector<8x24xf32> -> vector<8x40xf32>
    %cst_50 = arith.constant dense<0.000000e+00> : vector<8x40xf32>
    %106 = tpu.matmul %104, %105, %cst_50 {dimension_numbers = #tpu.dot_dimension_numbers<[1], [0], [0], [1], [0, 0, 1, 1], [], []>} : vector<8x8xf32>, vector<8x40xf32>, vector<8x40xf32> -> vector<8x40xf32>
    %107 = vector.extract_strided_slice %106 {offsets = [0, 0], sizes = [8, 16], strides = [1, 1]} : vector<8x40xf32> to vector<8x16xf32>
    %108 = vector.extract_strided_slice %106 {offsets = [0, 16], sizes = [8, 24], strides = [1, 1]} : vector<8x40xf32> to vector<8x24xf32>
    %c0_51 = arith.constant 0 : index
    %c0_52 = arith.constant 0 : index
    %c32 = arith.constant 32 : index
    %109 = vector.load %arg2[%c0_51, %c0_52, %c32] : memref<1x8x192xf32, #tpu.memory_space<vmem>>, vector<1x8x16xf32>
    %110 = vector.shape_cast %109 : vector<1x8x16xf32> to vector<8x16xf32>
    %c0_53 = arith.constant 0 : index
    %c0_54 = arith.constant 0 : index
    %c128 = arith.constant 128 : index
    %111 = vector.load %arg2[%c0_53, %c0_54, %c128] : memref<1x8x192xf32, #tpu.memory_space<vmem>>, vector<1x8x16xf32>
    %112 = vector.shape_cast %111 : vector<1x8x16xf32> to vector<8x16xf32>
    %c0_55 = arith.constant 0 : index
    %c0_56 = arith.constant 0 : index
    %c144 = arith.constant 144 : index
    %113 = vector.load %arg2[%c0_55, %c0_56, %c144] : memref<1x8x192xf32, #tpu.memory_space<vmem>>, vector<1x8x16xf32>
    %114 = vector.shape_cast %113 : vector<1x8x16xf32> to vector<8x16xf32>
    %c0_57 = arith.constant 0 : index
    %c0_58 = arith.constant 0 : index
    %c24_59 = arith.constant 24 : index
    %115 = vector.load %arg3[%c0_57, %c0_58, %c24_59] : memref<1x8x48xf32, #tpu.memory_space<vmem>>, vector<1x8x12xf32>
    %116 = vector.shape_cast %115 : vector<1x8x12xf32> to vector<8x12xf32>
    %c0_60 = arith.constant 0 : index
    %c0_61 = arith.constant 0 : index
    %c24_62 = arith.constant 24 : index
    %117 = vector.load %arg4[%c0_60, %c0_61, %c24_62] : memref<1x8x48xf32, #tpu.memory_space<vmem>>, vector<1x8x12xf32>
    %118 = vector.shape_cast %117 : vector<1x8x12xf32> to vector<8x12xf32>
    %c0_63 = arith.constant 0 : index
    %c0_64 = arith.constant 0 : index
    %c48 = arith.constant 48 : index
    %119 = vector.load %arg5[%c0_63, %c0_64, %c48] : memref<1x8x96xf32, #tpu.memory_space<vmem>>, vector<1x8x24xf32>
    %120 = vector.shape_cast %119 : vector<1x8x24xf32> to vector<8x24xf32>
    %c2 = arith.constant 2 : index
    %121 = memref.load %arg1[%c2] : memref<4xf32, #tpu.memory_space<smem>>
    %122 = arith.mulf %116, %116 : vector<8x12xf32>
    %cst_65 = arith.constant dense<0.000000e+00> : vector<8xf32>
    %123 = vector.multi_reduction <add>, %122, %cst_65 [1] : vector<8x12xf32> to vector<8xf32>
    %124 = vector.shape_cast %123 : vector<8xf32> to vector<8x1xf32>
    %125 = arith.mulf %118, %118 : vector<8x12xf32>
    %cst_66 = arith.constant dense<0.000000e+00> : vector<8xf32>
    %126 = vector.multi_reduction <add>, %125, %cst_66 [1] : vector<8x12xf32> to vector<8xf32>
    %127 = vector.shape_cast %126 : vector<8xf32> to vector<8x1xf32>
    %cst_67 = arith.constant 0.144337565 : f32
    %128 = vector.broadcast %cst_67 : f32 to vector<8x16xf32>
    %129 = arith.mulf %110, %128 : vector<8x16xf32>
    %130 = vector.broadcast %121 : f32 to vector<8x12xf32>
    %131 = arith.mulf %116, %130 : vector<8x12xf32>
    %132 = tpu.concatenate %129, %131 in 1 : vector<8x16xf32>, vector<8x12xf32> -> vector<8x28xf32>
    %133 = tpu.concatenate %112, %118 in 1 : vector<8x16xf32>, vector<8x12xf32> -> vector<8x28xf32>
    %cst_68 = arith.constant dense<0.000000e+00> : vector<8x8xf32>
    %134 = tpu.matmul %132, %133, %cst_68 {dimension_numbers = #tpu.dot_dimension_numbers<[1], [1], [0], [0], [0, 0, 1, 0], [], []>} : vector<8x28xf32>, vector<8x28xf32>, vector<8x8xf32> -> vector<8x8xf32>
    %cst_69 = arith.constant -5.000000e-01 : f32
    %135 = arith.mulf %cst_69, %121 : f32
    %136 = vector.shape_cast %127 : vector<8x1xf32> to vector<1x8xf32>
    %137 = vector.broadcast %124 : vector<8x1xf32> to vector<8x8xf32>
    %138 = vector.broadcast %136 : vector<1x8xf32> to vector<8x8xf32>
    %139 = arith.addf %137, %138 : vector<8x8xf32>
    %140 = vector.broadcast %135 : f32 to vector<8x8xf32>
    %141 = arith.mulf %140, %139 : vector<8x8xf32>
    %142 = arith.addf %134, %141 : vector<8x8xf32>
    %143 = vector.extract_strided_slice %3 {offsets = [0, 0, 2], sizes = [8, 8, 1], strides = [1, 1, 1]} : vector<8x8x8xf32> to vector<8x8x1xf32>
    %144 = vector.shape_cast %143 : vector<8x8x1xf32> to vector<8x8xf32>
    %145 = arith.addf %142, %144 : vector<8x8xf32>
    %146 = arith.addf %145, %1 : vector<8x8xf32>
    %cst_70 = arith.constant dense<0xFF800000> : vector<8xf32>
    %147 = vector.multi_reduction <maximumf>, %146, %cst_70 [1] : vector<8x8xf32> to vector<8xf32>
    %148 = vector.shape_cast %147 : vector<8xf32> to vector<8x1xf32>
    %149 = vector.broadcast %148 : vector<8x1xf32> to vector<8x8xf32>
    %150 = arith.subf %146, %149 : vector<8x8xf32>
    %151 = math.exp %150 : vector<8x8xf32>
    %cst_71 = arith.constant dense<0.000000e+00> : vector<8xf32>
    %152 = vector.multi_reduction <add>, %151, %cst_71 [1] : vector<8x8xf32> to vector<8xf32>
    %153 = vector.shape_cast %152 : vector<8xf32> to vector<8x1xf32>
    %154 = tpu.reciprocal %153 {approx = true} : vector<8x1xf32> -> vector<8x1xf32>
    %155 = vector.broadcast %154 : vector<8x1xf32> to vector<8x8xf32>
    %156 = arith.mulf %151, %155 : vector<8x8xf32>
    %157 = tpu.concatenate %114, %120 in 1 : vector<8x16xf32>, vector<8x24xf32> -> vector<8x40xf32>
    %cst_72 = arith.constant dense<0.000000e+00> : vector<8x40xf32>
    %158 = tpu.matmul %156, %157, %cst_72 {dimension_numbers = #tpu.dot_dimension_numbers<[1], [0], [0], [1], [0, 0, 1, 1], [], []>} : vector<8x8xf32>, vector<8x40xf32>, vector<8x40xf32> -> vector<8x40xf32>
    %159 = vector.extract_strided_slice %158 {offsets = [0, 0], sizes = [8, 16], strides = [1, 1]} : vector<8x40xf32> to vector<8x16xf32>
    %160 = vector.extract_strided_slice %158 {offsets = [0, 16], sizes = [8, 24], strides = [1, 1]} : vector<8x40xf32> to vector<8x24xf32>
    %c0_73 = arith.constant 0 : index
    %c0_74 = arith.constant 0 : index
    %c48_75 = arith.constant 48 : index
    %161 = vector.load %arg2[%c0_73, %c0_74, %c48_75] : memref<1x8x192xf32, #tpu.memory_space<vmem>>, vector<1x8x16xf32>
    %162 = vector.shape_cast %161 : vector<1x8x16xf32> to vector<8x16xf32>
    %c0_76 = arith.constant 0 : index
    %c0_77 = arith.constant 0 : index
    %c160 = arith.constant 160 : index
    %163 = vector.load %arg2[%c0_76, %c0_77, %c160] : memref<1x8x192xf32, #tpu.memory_space<vmem>>, vector<1x8x16xf32>
    %164 = vector.shape_cast %163 : vector<1x8x16xf32> to vector<8x16xf32>
    %c0_78 = arith.constant 0 : index
    %c0_79 = arith.constant 0 : index
    %c176 = arith.constant 176 : index
    %165 = vector.load %arg2[%c0_78, %c0_79, %c176] : memref<1x8x192xf32, #tpu.memory_space<vmem>>, vector<1x8x16xf32>
    %166 = vector.shape_cast %165 : vector<1x8x16xf32> to vector<8x16xf32>
    %c0_80 = arith.constant 0 : index
    %c0_81 = arith.constant 0 : index
    %c36 = arith.constant 36 : index
    %167 = vector.load %arg3[%c0_80, %c0_81, %c36] : memref<1x8x48xf32, #tpu.memory_space<vmem>>, vector<1x8x12xf32>
    %168 = vector.shape_cast %167 : vector<1x8x12xf32> to vector<8x12xf32>
    %c0_82 = arith.constant 0 : index
    %c0_83 = arith.constant 0 : index
    %c36_84 = arith.constant 36 : index
    %169 = vector.load %arg4[%c0_82, %c0_83, %c36_84] : memref<1x8x48xf32, #tpu.memory_space<vmem>>, vector<1x8x12xf32>
    %170 = vector.shape_cast %169 : vector<1x8x12xf32> to vector<8x12xf32>
    %c0_85 = arith.constant 0 : index
    %c0_86 = arith.constant 0 : index
    %c72 = arith.constant 72 : index
    %171 = vector.load %arg5[%c0_85, %c0_86, %c72] : memref<1x8x96xf32, #tpu.memory_space<vmem>>, vector<1x8x24xf32>
    %172 = vector.shape_cast %171 : vector<1x8x24xf32> to vector<8x24xf32>
    %c3 = arith.constant 3 : index
    %173 = memref.load %arg1[%c3] : memref<4xf32, #tpu.memory_space<smem>>
    %174 = arith.mulf %168, %168 : vector<8x12xf32>
    %cst_87 = arith.constant dense<0.000000e+00> : vector<8xf32>
    %175 = vector.multi_reduction <add>, %174, %cst_87 [1] : vector<8x12xf32> to vector<8xf32>
    %176 = vector.shape_cast %175 : vector<8xf32> to vector<8x1xf32>
    %177 = arith.mulf %170, %170 : vector<8x12xf32>
    %cst_88 = arith.constant dense<0.000000e+00> : vector<8xf32>
    %178 = vector.multi_reduction <add>, %177, %cst_88 [1] : vector<8x12xf32> to vector<8xf32>
    %179 = vector.shape_cast %178 : vector<8xf32> to vector<8x1xf32>
    %cst_89 = arith.constant 0.144337565 : f32
    %180 = vector.broadcast %cst_89 : f32 to vector<8x16xf32>
    %181 = arith.mulf %162, %180 : vector<8x16xf32>
    %182 = vector.broadcast %173 : f32 to vector<8x12xf32>
    %183 = arith.mulf %168, %182 : vector<8x12xf32>
    %184 = tpu.concatenate %181, %183 in 1 : vector<8x16xf32>, vector<8x12xf32> -> vector<8x28xf32>
    %185 = tpu.concatenate %164, %170 in 1 : vector<8x16xf32>, vector<8x12xf32> -> vector<8x28xf32>
    %cst_90 = arith.constant dense<0.000000e+00> : vector<8x8xf32>
    %186 = tpu.matmul %184, %185, %cst_90 {dimension_numbers = #tpu.dot_dimension_numbers<[1], [1], [0], [0], [0, 0, 1, 0], [], []>} : vector<8x28xf32>, vector<8x28xf32>, vector<8x8xf32> -> vector<8x8xf32>
    %cst_91 = arith.constant -5.000000e-01 : f32
    %187 = arith.mulf %cst_91, %173 : f32
    %188 = vector.shape_cast %179 : vector<8x1xf32> to vector<1x8xf32>
    %189 = vector.broadcast %176 : vector<8x1xf32> to vector<8x8xf32>
    %190 = vector.broadcast %188 : vector<1x8xf32> to vector<8x8xf32>
    %191 = arith.addf %189, %190 : vector<8x8xf32>
    %192 = vector.broadcast %187 : f32 to vector<8x8xf32>
    %193 = arith.mulf %192, %191 : vector<8x8xf32>
    %194 = arith.addf %186, %193 : vector<8x8xf32>
    %195 = vector.extract_strided_slice %3 {offsets = [0, 0, 3], sizes = [8, 8, 1], strides = [1, 1, 1]} : vector<8x8x8xf32> to vector<8x8x1xf32>
    %196 = vector.shape_cast %195 : vector<8x8x1xf32> to vector<8x8xf32>
    %197 = arith.addf %194, %196 : vector<8x8xf32>
    %198 = arith.addf %197, %1 : vector<8x8xf32>
    %cst_92 = arith.constant dense<0xFF800000> : vector<8xf32>
    %199 = vector.multi_reduction <maximumf>, %198, %cst_92 [1] : vector<8x8xf32> to vector<8xf32>
    %200 = vector.shape_cast %199 : vector<8xf32> to vector<8x1xf32>
    %201 = vector.broadcast %200 : vector<8x1xf32> to vector<8x8xf32>
    %202 = arith.subf %198, %201 : vector<8x8xf32>
    %203 = math.exp %202 : vector<8x8xf32>
    %cst_93 = arith.constant dense<0.000000e+00> : vector<8xf32>
    %204 = vector.multi_reduction <add>, %203, %cst_93 [1] : vector<8x8xf32> to vector<8xf32>
    %205 = vector.shape_cast %204 : vector<8xf32> to vector<8x1xf32>
    %206 = tpu.reciprocal %205 {approx = true} : vector<8x1xf32> -> vector<8x1xf32>
    %207 = vector.broadcast %206 : vector<8x1xf32> to vector<8x8xf32>
    %208 = arith.mulf %203, %207 : vector<8x8xf32>
    %209 = tpu.concatenate %166, %172 in 1 : vector<8x16xf32>, vector<8x24xf32> -> vector<8x40xf32>
    %cst_94 = arith.constant dense<0.000000e+00> : vector<8x40xf32>
    %210 = tpu.matmul %208, %209, %cst_94 {dimension_numbers = #tpu.dot_dimension_numbers<[1], [0], [0], [1], [0, 0, 1, 1], [], []>} : vector<8x8xf32>, vector<8x40xf32>, vector<8x40xf32> -> vector<8x40xf32>
    %211 = vector.extract_strided_slice %210 {offsets = [0, 0], sizes = [8, 16], strides = [1, 1]} : vector<8x40xf32> to vector<8x16xf32>
    %212 = vector.extract_strided_slice %210 {offsets = [0, 16], sizes = [8, 24], strides = [1, 1]} : vector<8x40xf32> to vector<8x24xf32>
    %213 = vector.shape_cast %52 : vector<8x8xf32> to vector<8x1x8xf32>
    %214 = vector.shape_cast %104 : vector<8x8xf32> to vector<8x1x8xf32>
    %215 = vector.shape_cast %156 : vector<8x8xf32> to vector<8x1x8xf32>
    %216 = vector.shape_cast %208 : vector<8x8xf32> to vector<8x1x8xf32>
    %217 = tpu.concatenate %213, %214, %215, %216 in 1 : vector<8x1x8xf32>, vector<8x1x8xf32>, vector<8x1x8xf32>, vector<8x1x8xf32> -> vector<8x4x8xf32>
    %cst_95 = arith.constant dense<0.000000e+00> : vector<8x4x4xf32>
    %218 = tpu.matmul %217, %4, %cst_95 {dimension_numbers = #tpu.dot_dimension_numbers<[2], [1], [1], [2], [0, 0, 0, 1, 1, 2], [0], [0]>} : vector<8x4x8xf32>, vector<8x8x4xf32>, vector<8x4x4xf32> -> vector<8x4x4xf32>
    %219 = vector.shape_cast %218 : vector<8x4x4xf32> to vector<8x16xf32>
    %220 = tpu.concatenate %55, %107, %159, %211, %56, %108, %160, %212, %219 in 1 : vector<8x16xf32>, vector<8x16xf32>, vector<8x16xf32>, vector<8x16xf32>, vector<8x24xf32>, vector<8x24xf32>, vector<8x24xf32>, vector<8x24xf32>, vector<8x16xf32> -> vector<8x176xf32>
    %c0_96 = arith.constant 0 : index
    %c0_97 = arith.constant 0 : index
    %c0_98 = arith.constant 0 : index
    %221 = vector.load %arg8[%c0_96, %c0_97, %c0_98] : memref<1x8x176xf32, #tpu.memory_space<vmem>>, vector<1x8x176xf32>
    %222 = vector.shape_cast %221 : vector<1x8x176xf32> to vector<8x176xf32>
    %223 = vector.shape_cast %220 : vector<8x176xf32> to vector<1x8x176xf32>
    tpu.vector_store %arg8[%c0_96, %c0_97, %c0_98], %223 {strides = array<i32>} : memref<1x8x176xf32, #tpu.memory_space<vmem>>, vector<1x8x176xf32>,
    return
  }
  func.func @transform_0(%arg0: i32) -> i32 {
    %c0_i32 = arith.constant 0 : i32
    %c0_i32_0 = arith.constant 0 : i32
    return %c0_i32 : i32
  }
  func.func @transform_1(%arg0: i32) -> (i32, i32, i32) {
    %c0_i32 = arith.constant 0 : i32
    %c0_i32_0 = arith.constant 0 : i32
    %c0_i32_1 = arith.constant 0 : i32
    return %arg0, %c0_i32, %c0_i32_0 : i32, i32, i32
  }
  func.func @transform_2(%arg0: i32) -> (i32, i32, i32) {
    %c0_i32 = arith.constant 0 : i32
    %c0_i32_0 = arith.constant 0 : i32
    %c0_i32_1 = arith.constant 0 : i32
    return %arg0, %c0_i32, %c0_i32_0 : i32, i32, i32
  }
  func.func @transform_3(%arg0: i32) -> (i32, i32, i32) {
    %c0_i32 = arith.constant 0 : i32
    %c0_i32_0 = arith.constant 0 : i32
    %c0_i32_1 = arith.constant 0 : i32
    return %arg0, %c0_i32, %c0_i32_0 : i32, i32, i32
  }
  func.func @transform_4(%arg0: i32) -> (i32, i32, i32) {
    %c0_i32 = arith.constant 0 : i32
    %c0_i32_0 = arith.constant 0 : i32
    %c0_i32_1 = arith.constant 0 : i32
    return %arg0, %c0_i32, %c0_i32_0 : i32, i32, i32
  }
  func.func @transform_5(%arg0: i32) -> (i32, i32, i32, i32) {
    %c0_i32 = arith.constant 0 : i32
    %c0_i32_0 = arith.constant 0 : i32
    %c0_i32_1 = arith.constant 0 : i32
    %c0_i32_2 = arith.constant 0 : i32
    return %arg0, %c0_i32, %c0_i32_0, %c0_i32_1 : i32, i32, i32, i32
  }
  func.func @transform_6(%arg0: i32) -> (i32, i32, i32) {
    %c0_i32 = arith.constant 0 : i32
    %c0_i32_0 = arith.constant 0 : i32
    %c0_i32_1 = arith.constant 0 : i32
    return %arg0, %c0_i32, %c0_i32_0 : i32, i32, i32
  }
  func.func @transform_7(%arg0: i32) -> (i32, i32, i32) {
    %c0_i32 = arith.constant 0 : i32
    %c0_i32_0 = arith.constant 0 : i32
    %c0_i32_1 = arith.constant 0 : i32
    return %arg0, %c0_i32, %c0_i32_0 : i32, i32, i32
  }
}

module attributes {stable_mosaic.version = 11 : i64} {
  func.func @_linear_kernel(%arg0: i32, %arg1: memref<16x208xf32, #tpu.memory_space<vmem>>, %arg2: memref<208x32xf32, #tpu.memory_space<vmem>>, %arg3: memref<1x32xf32, #tpu.memory_space<vmem>>, %arg4: memref<16x32xf32, #tpu.memory_space<vmem>>) attributes {dimension_semantics = [#tpu.dimension_semantics<parallel>], iteration_bounds = array<i64: 1>, scalar_prefetch = 0 : i64, scratch_operands = 0 : i64, tpu.core_type = #tpu.core_type<tc>, window_params = [{transform_indices = @transform_0, window_bounds = array<i64: 16, 208>}, {pipeline_mode = #tpu.pipeline_mode<synchronous>, transform_indices = @transform_1, window_bounds = array<i64: 208, 32>}, {pipeline_mode = #tpu.pipeline_mode<synchronous>, transform_indices = @transform_2, window_bounds = array<i64: 1, 32>}, {transform_indices = @transform_3, window_bounds = array<i64: 16, 32>}]} {
    %c0 = arith.constant 0 : index
    %c0_0 = arith.constant 0 : index
    %0 = vector.load %arg1[%c0, %c0_0] : memref<16x208xf32, #tpu.memory_space<vmem>>, vector<16x208xf32>
    %c0_1 = arith.constant 0 : index
    %c0_2 = arith.constant 0 : index
    %1 = vector.load %arg2[%c0_1, %c0_2] : memref<208x32xf32, #tpu.memory_space<vmem>>, vector<208x32xf32>
    %cst = arith.constant dense<0.000000e+00> : vector<16x32xf32>
    %2 = tpu.matmul %0, %1, %cst {dimension_numbers = #tpu.dot_dimension_numbers<[1], [0], [0], [1], [0, 0, 1, 1], [], []>} : vector<16x208xf32>, vector<208x32xf32>, vector<16x32xf32> -> vector<16x32xf32>
    %c0_3 = arith.constant 0 : index
    %c0_4 = arith.constant 0 : index
    %3 = vector.load %arg3[%c0_3, %c0_4] : memref<1x32xf32, #tpu.memory_space<vmem>>, vector<1x32xf32>
    %4 = vector.broadcast %3 : vector<1x32xf32> to vector<16x32xf32>
    %5 = arith.addf %2, %4 : vector<16x32xf32>
    %c0_5 = arith.constant 0 : index
    %c0_6 = arith.constant 0 : index
    %6 = vector.load %arg4[%c0_5, %c0_6] : memref<16x32xf32, #tpu.memory_space<vmem>>, vector<16x32xf32>
    tpu.vector_store %arg4[%c0_5, %c0_6], %5 {strides = array<i32>} : memref<16x32xf32, #tpu.memory_space<vmem>>, vector<16x32xf32>,
    return
  }
  func.func @transform_0(%arg0: i32) -> (i32, i32) {
    %c0_i32 = arith.constant 0 : i32
    %c0_i32_0 = arith.constant 0 : i32
    return %arg0, %c0_i32 : i32, i32
  }
  func.func @transform_1(%arg0: i32) -> (i32, i32) {
    %c0_i32 = arith.constant 0 : i32
    %c0_i32_0 = arith.constant 0 : i32
    %c0_i32_1 = arith.constant 0 : i32
    return %c0_i32, %c0_i32_0 : i32, i32
  }
  func.func @transform_2(%arg0: i32) -> (i32, i32) {
    %c0_i32 = arith.constant 0 : i32
    %c0_i32_0 = arith.constant 0 : i32
    %c0_i32_1 = arith.constant 0 : i32
    return %c0_i32, %c0_i32_0 : i32, i32
  }
  func.func @transform_3(%arg0: i32) -> (i32, i32) {
    %c0_i32 = arith.constant 0 : i32
    %c0_i32_0 = arith.constant 0 : i32
    return %arg0, %c0_i32 : i32, i32
  }
}

</mosaic_0001>

<bundles_post_ra>
// kernel: ipa_forward.5
= control target key start
LH: loop header
LB: loop body
LE: loop exit
PB: predicated region body
PF: predicated region fallthrough
CT: control target
= control target key end

     0   :  { %8 = vsyncpa [#allocation3], 0  ;;  %s599_s0 = inlined_call_operand.hbm [shape: f32[128,16], index: 0, kind: input, shape index: {}]   ;;  %s600_s1 = inlined_call_operand.hbm [shape: f32[16,8], index: 1, kind: input, shape index: {}]   ;;  %s601_s2 = inlined_call_operand.hbm [shape: f32[1,8], index: 2, kind: input, shape index: {}]   ;;  %s602_s3 = inlined_call_operand.hbm [shape: f32[128,8], index: 3, kind: output, shape index: {}]  }
   0x1   :  { %9 = vsyncpa [#allocation6], 0 }
   0x2   :  { %10 = vsyncpa [#allocation4], 0  ;;  %s477_s12 = smov [#allocation5]   ;;  %s478_s14 = smov [#allocation2]  }
   0x3   :  { %s28_s13 = sshll.u32 %s477_s12, 4  ;;  %s16_s15 = sshll.u32 %s478_s14, 4  ;;  %s29_s13 = int_to_ptr.vmem [resolvable:$true] %s28_s13  ;;  %s503_s15 = int_to_ptr.vmem [resolvable:$true] %s16_s15 }
   0x4   :  { %s383_s18 = scalar_lea.hbm %s600_s1, 256 }
   0x5   :  { %p384_p0 = scmp.ne.s32.totalorder %s600_s1, %s383_s18  ;;  %p387_p1 = scmp.lt.u32.totalorder %s383_s18, %s600_s1 }
   0x7   :  { %p389_p2 = pnand %p387_p1, %p384_p0 }
   0x9   :  { %392 = shalt.err (!%p389_p2)
}
   0xa   :  { %s393_s23 = scalar_lea.vmem %s29_s13, 256  ;;  %p398_p4 = scmp.lt.s32.totalorder %s29_s13, %s29_s13 }
   0xb   :  { %p394_p3 = scmp.ne.s32.totalorder %s29_s13, %s393_s23  ;;  %p399_p5 = scmp.lt.s32.totalorder %s393_s23, %s393_s23 }
   0xd   :  { %p400_p6 = por %p399_p5, %p398_p4 }
   0xf   :  { %p401_p7 = pnand %p400_p6, %p394_p3 }
  0x11   :  { %404 = shalt.err (!%p401_p7)
}
  0x12   :  { %s479_s24 = smov 128   ;;  %s480_s25 = smov 8  }
  0x13   :  { %34 = dma.hbm_to_vmem [thread:$0]  %s600_s1, 256, %s29_s13, [#allocation6], %s479_s24, %s479_s24, %s480_s25  }
  0x14   :  { %s405_s30 = scalar_lea.hbm %s599_s0, 2048 }
  0x15   :  { %p406_p8 = scmp.ne.s32.totalorder %s599_s0, %s405_s30  ;;  %p409_p9 = scmp.lt.u32.totalorder %s405_s30, %s599_s0 }
  0x17   :  { %p411_p10 = pnand %p409_p9, %p406_p8 }
  0x19   :  { %414 = shalt.err (!%p411_p10)
}
  0x1a   :  { %s415_s8 = scalar_lea.vmem %s503_s15, 2048  ;;  %p420_p12 = scmp.lt.s32.totalorder %s503_s15, %s503_s15 }
  0x1b   :  { %p416_p11 = scmp.ne.s32.totalorder %s503_s15, %s415_s8  ;;  %p421_p13 = scmp.lt.s32.totalorder %s415_s8, %s415_s8 }
  0x1d   :  { %p422_p0 = por %p421_p13, %p420_p12 }
  0x1f   :  { %p423_p1 = pnand %p422_p0, %p416_p11 }
  0x21   :  { %426 = shalt.err (!%p423_p1)
}
  0x22   :  { %22 = dma.hbm_to_vmem [thread:$0]  %s599_s0, 2048, %s503_s15, [#allocation3], %s479_s24, %s479_s24, %s480_s25  }
  0x23   :  { %s481_s10 = smov [#allocation7]   ;;  %s427_s14 = scalar_lea.hbm %s601_s2, 16 }
  0x24   :  { %s41_s11 = sshll.u32 %s481_s10, 4  ;;  %p428_p2 = scmp.ne.s32.totalorder %s601_s2, %s427_s14  ;;  %s42_s11 = int_to_ptr.vmem [resolvable:$true] %s41_s11 }
  0x25   :  { %p431_p3 = scmp.lt.u32.totalorder %s427_s14, %s601_s2 }
  0x27   :  { %p433_p4 = pnand %p431_p3, %p428_p2 }
  0x29   :  { %436 = shalt.err (!%p433_p4)
}
  0x2a   :  { %s437_s20 = scalar_lea.vmem %s42_s11, 16  ;;  %s441_s0 = scalar_lea.vmem %s42_s11, 32 }
  0x2b   :  { %p438_p5 = scmp.ne.s32.totalorder %s42_s11, %s437_s20  ;;  %p442_p6 = scmp.lt.s32.totalorder %s42_s11, %s42_s11 }
  0x2c   :  { %p443_p7 = scmp.lt.s32.totalorder %s441_s0, %s437_s20 }
  0x2e   :  { %p444_p8 = por %p443_p7, %p442_p6 }
  0x30   :  { %p445_p9 = pnand %p444_p8, %p438_p5 }
  0x32   :  { %448 = shalt.err (!%p445_p9)
}
  0x33   :  { %44 = dma.hbm_to_vmem [thread:$0]  %s601_s2, 16, %s42_s11, [#allocation6]  }
  0x34   :  { %471 = dma.done.wait [#allocation3], 2048  }
  0x35   :  { %472 = vsyncadd [#allocation3], 4294965248 }
  0x36   :  { %473 = dma.done.wait [#allocation6], 272  }
  0x37   :  { %474 = vsyncadd [#allocation6], 4294967024  ;;  %vm79_vm0 = vcmask 130048   ;;  %v70_v0 = vld [vmem:[#allocation5] sm:$0xff]  ;;  %v71_v1 = vld [vmem:[#allocation5 + $0x8] sm:$0xff]  ;;  %vm273_vm1 = vcmask 64512  }
  0x38   :  { %v54_v2 = vld [vmem:[#allocation2] sm:$0xff]  ;;  %v371_v3 = vpack.c.bf16 %v71_v1, %v70_v0  ;;  %v55_v5 = vld [vmem:[#allocation2 + $0x8] sm:$0xff]  ;;  %v56_v7 = vld [vmem:[#allocation2 + $0x10] sm:$0xff]  ;;  %s482_s2 = smov [#allocation8]  }
  0x39   :  { %347 = vmatprep.mubr.msk.f32.mxu0 %vm79_vm0, %v54_v2  ;;  %v62_v4 = vld [vmem:[#allocation2 + $0x40] sm:$0xff]  ;;  %v63_v6 = vld [vmem:[#allocation2 + $0x48] sm:$0xff]  ;;  %v64_v8 = vld [vmem:[#allocation2 + $0x50] sm:$0xff]  ;;  %s295_s22 = sshll.u32 %s482_s2, 4  ;;  %s296_s22 = int_to_ptr.vmem [resolvable:$true] %s295_s22 }
  0x3a   :  { %359 = vmatprep.mubr.msk.f32.mxu1 %vm79_vm0, %v62_v4  ;;  %372 = vmatprep.subr.bf16.mxu0 %v371_v3  ;;  %v57_v9 = vld [vmem:[#allocation2 + $0x18] sm:$0xff]  ;;  %v58_v11 = vld [vmem:[#allocation2 + $0x20] sm:$0xff]  ;;  %v59_v13 = vld [vmem:[#allocation2 + $0x28] sm:$0xff]  ;;  %s449_s23 = scalar_lea.vmem %s296_s22, 2048  ;;  %p454_p11 = scmp.lt.s32.totalorder %s296_s22, %s296_s22 }
  0x3b   :  { %375 = vmatprep.subr.bf16.mxu1 %v371_v3  ;;  %374 = vmatpush3.bf16.msra.mxu0 %v371_v3  ;;  %v65_v10 = vld [vmem:[#allocation2 + $0x58] sm:$0xff]  ;;  %v66_v12 = vld [vmem:[#allocation2 + $0x60] sm:$0xff]  ;;  %v67_v14 = vld [vmem:[#allocation2 + $0x68] sm:$0xff]  ;;  %p450_p10 = scmp.ne.s32.totalorder %s296_s22, %s449_s23  ;;  %p455_p12 = scmp.lt.s32.totalorder %s449_s23, %s449_s23 }
  0x3c   :  { %376 = vmatpush3.bf16.msra.mxu1 %v371_v3  ;;  %v60_v15 = vld [vmem:[#allocation2 + $0x30] sm:$0xff]  ;;  %v61_v17 = vld [vmem:[#allocation2 + $0x38] sm:$0xff] }
  0x3d   :  { %v68_v16 = vld [vmem:[#allocation2 + $0x70] sm:$0xff]  ;;  %v69_v18 = vld [vmem:[#allocation2 + $0x78] sm:$0xff]  ;;  %p456_p13 = por %p455_p12, %p454_p11 }
  0x3e   :  { %348 = vmatmul.mubr.msk.f32.vlgmr.msra.gmra.mrb[0].mxu0 %vm79_vm0, %v55_v5  ;;  %v308_v19 = vld [vmem:[#allocation7] ss:$0 sm:$0xff] }
  0x3f   :  { %360 = vmatmul.mubr.msk.f32.vlgmr.msra.gmra.mrb[0].mxu1 %vm79_vm0, %v63_v6  ;;  %350 = vmatprep.mubr.msk.f32.mxu0 %vm79_vm0, %v56_v7  ;;  %p457_p0 = pnand %p456_p13, %p450_p10 }
  0x40   :  { %362 = vmatprep.mubr.msk.f32.mxu1 %vm79_vm0, %v64_v8 }
  0x42   :  { %351 = vmatmul.mubr.msk.f32.gmra.mrb[2].mxu0 %vm79_vm0, %v57_v9 }
  0x43   :  { %363 = vmatmul.mubr.msk.f32.gmra.mrb[2].mxu1 %vm79_vm0, %v65_v10  ;;  %353 = vmatprep.mubr.msk.f32.mxu0 %vm79_vm0, %v58_v11 }
  0x44   :  { %365 = vmatprep.mubr.msk.f32.mxu1 %vm79_vm0, %v66_v12 }
  0x46   :  { %354 = vmatmul.mubr.msk.f32.gmra.mrb[4].mxu0 %vm79_vm0, %v59_v13 }
  0x47   :  { %366 = vmatmul.mubr.msk.f32.gmra.mrb[4].mxu1 %vm79_vm0, %v67_v14  ;;  %356 = vmatprep.mubr.msk.f32.mxu0 %vm79_vm0, %v60_v15 }
  0x48   :  { %368 = vmatprep.mubr.msk.f32.mxu1 %vm79_vm0, %v68_v16 }
  0x4a   :  { %357 = vmatmul.mubr.msk.f32.gmra.mrb[6].mxu0 %vm79_vm0, %v61_v17 }
  0x4b   :  { %369 = vmatmul.mubr.msk.f32.gmra.mrb[6].mxu1 %vm79_vm0, %v69_v18 }
 0x111   :  { %v349_v20 = vpop.f32.mrb[0].mxu0 }
 0x112   :  { %v361_v21 = vpop.f32.mrb[0].mxu1  ;;  %v200_v22 = vadd.f32 %v349_v20, %v308_v19  ;;  %v194_v24 = vpop.f32.mrb[1].mxu0 }
 0x113   :  { %v240_v23 = vadd.f32 %v361_v21, %v308_v19  ;;  %v234_v25 = vpop.f32.mrb[1].mxu1  ;;  %v195_v26 = vadd.f32 %v308_v19, %v194_v24 }
 0x114   :  { %v235_v27 = vadd.f32 %v308_v19, %v234_v25  ;;  %275 = vst.msk [vmem:[#allocation8 + $0x8] sm:$0xff] %vm273_vm1, %v200_v22 }
 0x115   :  { %283 = vst.msk [vmem:[#allocation8 + $0x48] sm:$0xff] %vm273_vm1, %v240_v23  ;;  %274 = vst.msk [vmem:[#allocation8] sm:$0xff] %vm273_vm1, %v195_v26  ;;  %v352_v28 = vpop.f32.mrb[2].mxu0 }
 0x116   :  { %282 = vst.msk [vmem:[#allocation8 + $0x40] sm:$0xff] %vm273_vm1, %v235_v27  ;;  %v364_v29 = vpop.f32.mrb[2].mxu1  ;;  %v210_v30 = vadd.f32 %v352_v28, %v308_v19  ;;  %v204_v32 = vpop.f32.mrb[3].mxu0 }
 0x117   :  { %v250_v31 = vadd.f32 %v364_v29, %v308_v19  ;;  %v244_v33 = vpop.f32.mrb[3].mxu1  ;;  %v205_v34 = vadd.f32 %v308_v19, %v204_v32 }
 0x118   :  { %v245_v35 = vadd.f32 %v308_v19, %v244_v33  ;;  %277 = vst.msk [vmem:[#allocation8 + $0x18] sm:$0xff] %vm273_vm1, %v210_v30 }
 0x119   :  { %285 = vst.msk [vmem:[#allocation8 + $0x58] sm:$0xff] %vm273_vm1, %v250_v31  ;;  %276 = vst.msk [vmem:[#allocation8 + $0x10] sm:$0xff] %vm273_vm1, %v205_v34  ;;  %v355_v36 = vpop.f32.mrb[4].mxu0 }
 0x11a   :  { %284 = vst.msk [vmem:[#allocation8 + $0x50] sm:$0xff] %vm273_vm1, %v245_v35  ;;  %v367_v37 = vpop.f32.mrb[4].mxu1  ;;  %v220_v38 = vadd.f32 %v355_v36, %v308_v19  ;;  %v214_v40 = vpop.f32.mrb[5].mxu0 }
 0x11b   :  { %v260_v39 = vadd.f32 %v367_v37, %v308_v19  ;;  %v254_v41 = vpop.f32.mrb[5].mxu1  ;;  %v215_v42 = vadd.f32 %v308_v19, %v214_v40 }
 0x11c   :  { %v255_v43 = vadd.f32 %v308_v19, %v254_v41  ;;  %279 = vst.msk [vmem:[#allocation8 + $0x28] sm:$0xff] %vm273_vm1, %v220_v38 }
 0x11d   :  { %287 = vst.msk [vmem:[#allocation8 + $0x68] sm:$0xff] %vm273_vm1, %v260_v39  ;;  %278 = vst.msk [vmem:[#allocation8 + $0x20] sm:$0xff] %vm273_vm1, %v215_v42  ;;  %v358_v44 = vpop.f32.mrb[6].mxu0 }
 0x11e   :  { %286 = vst.msk [vmem:[#allocation8 + $0x60] sm:$0xff] %vm273_vm1, %v255_v43  ;;  %v370_v45 = vpop.f32.mrb[6].mxu1  ;;  %v230_v46 = vadd.f32 %v358_v44, %v308_v19  ;;  %v224_v48 = vpop.f32.mrb[7].mxu0 }
 0x11f   :  { %v270_v47 = vadd.f32 %v370_v45, %v308_v19  ;;  %v264_v49 = vpop.f32.mrb[7].mxu1  ;;  %v225_v50 = vadd.f32 %v308_v19, %v224_v48 }
 0x120   :  { %v265_v51 = vadd.f32 %v308_v19, %v264_v49  ;;  %281 = vst.msk [vmem:[#allocation8 + $0x38] sm:$0xff] %vm273_vm1, %v230_v46 }
 0x121   :  { %289 = vst.msk [vmem:[#allocation8 + $0x78] sm:$0xff] %vm273_vm1, %v270_v47  ;;  %280 = vst.msk [vmem:[#allocation8 + $0x30] sm:$0xff] %vm273_vm1, %v225_v50 }
 0x122   :  { %288 = vst.msk [vmem:[#allocation8 + $0x70] sm:$0xff] %vm273_vm1, %v265_v51 }
 0x123   :  { %460 = shalt.err (!%p457_p0)
}
 0x124   :  { %s461_s28 = scalar_lea.hbm %s602_s3, 2048 }
 0x125   :  { %p462_p1 = scmp.ne.s32.totalorder %s602_s3, %s461_s28  ;;  %p465_p2 = scmp.lt.u32.totalorder %s461_s28, %s602_s3 }
 0x127   :  { %p467_p3 = pnand %p465_p2, %p462_p1 }
 0x129   :  { %470 = shalt.err (!%p467_p3)
}
 0x12a   :  { %301 = dma.vmem_to_hbm [thread:$0]  %s296_s22, 2048, %s602_s3, [#allocation4], %s479_s24, %s479_s24, %s480_s25  }
 0x12b   :  { %475 = dma.done.wait [#allocation4], 2048  }
 0x12c   :  { %476 = vsyncadd [#allocation4], 4294965248 }
 0x12d   :  { %305 = vsyncpa [#allocation3], 1 }
 0x12e   :  { %306 = vsyncpa [#allocation6], 1 }
 0x12f   :  { %307 = vsyncpa [#allocation4], 1 }

// kernel: ipa_forward.4
= control target key start
LH: loop header
LB: loop body
LE: loop exit
PB: predicated region body
PF: predicated region fallthrough
CT: control target
= control target key end

     0   :  { %8 = vsyncpa [#allocation3], 0  ;;  %s491_s0 = inlined_call_operand.hbm [shape: f32[16,32], index: 0, kind: input, shape index: {}]   ;;  %s492_s1 = inlined_call_operand.hbm [shape: f32[32,384], index: 1, kind: input, shape index: {}]   ;;  %s493_s2 = inlined_call_operand.hbm [shape: f32[1,384], index: 2, kind: input, shape index: {}]   ;;  %s494_s3 = inlined_call_operand.hbm [shape: f32[16,384], index: 3, kind: output, shape index: {}]  }
   0x1   :  { %9 = vsyncpa [#allocation6], 0 }
   0x2   :  { %10 = vsyncpa [#allocation4], 0  ;;  %s408_s12 = smov [#allocation5]   ;;  %s314_s16 = scalar_lea.hbm %s492_s1, 1536 }
   0x3   :  { %s28_s13 = sshll.u32 %s408_s12, 4  ;;  %p315_p0 = scmp.ne.s32.totalorder %s492_s1, %s314_s16  ;;  %s29_s13 = int_to_ptr.vmem [resolvable:$true] %s28_s13 }
   0x4   :  { %p318_p1 = scmp.lt.u32.totalorder %s314_s16, %s492_s1 }
   0x6   :  { %p320_p2 = pnand %p318_p1, %p315_p0 }
   0x8   :  { %323 = shalt.err (!%p320_p2)
}
   0x9   :  { %s324_s21 = scalar_lea.vmem %s29_s13, 1536  ;;  %p329_p4 = scmp.lt.s32.totalorder %s29_s13, %s29_s13 }
   0xa   :  { %p325_p3 = scmp.ne.s32.totalorder %s29_s13, %s324_s21  ;;  %p330_p5 = scmp.lt.s32.totalorder %s324_s21, %s324_s21 }
   0xc   :  { %p331_p6 = por %p330_p5, %p329_p4 }
   0xe   :  { %p332_p7 = pnand %p331_p6, %p325_p3 }
  0x10   :  { %335 = shalt.err (!%p332_p7)
}
  0x11   :  { %s409_s22 = smov 384   ;;  %s410_s23 = smov 24  }
  0x12   :  { %34 = dma.hbm_to_vmem [thread:$0]  %s492_s1, 1536, %s29_s13, [#allocation6], %s409_s22, %s409_s22, %s410_s23  }
  0x13   :  { %s411_s26 = smov [#allocation2]   ;;  %s336_s30 = scalar_lea.hbm %s491_s0, 256 }
  0x14   :  { %s16_s27 = sshll.u32 %s411_s26, 4  ;;  %p337_p8 = scmp.ne.s32.totalorder %s491_s0, %s336_s30  ;;  %s17_s27 = int_to_ptr.vmem [resolvable:$true] %s16_s27 }
  0x15   :  { %p340_p9 = scmp.lt.u32.totalorder %s336_s30, %s491_s0 }
  0x17   :  { %p342_p10 = pnand %p340_p9, %p337_p8 }
  0x19   :  { %345 = shalt.err (!%p342_p10)
}
  0x1a   :  { %s346_s8 = scalar_lea.vmem %s17_s27, 256  ;;  %p351_p12 = scmp.lt.s32.totalorder %s17_s27, %s17_s27 }
  0x1b   :  { %p347_p11 = scmp.ne.s32.totalorder %s17_s27, %s346_s8  ;;  %p352_p13 = scmp.lt.s32.totalorder %s346_s8, %s346_s8 }
  0x1d   :  { %p353_p0 = por %p352_p13, %p351_p12 }
  0x1f   :  { %p354_p1 = pnand %p353_p0, %p347_p11 }
  0x21   :  { %357 = shalt.err (!%p354_p1)
}
  0x22   :  { %s412_s1 = smov 128   ;;  %s413_s9 = smov 8  }
  0x23   :  { %22 = dma.hbm_to_vmem [thread:$0]  %s491_s0, 256, %s17_s27, [#allocation3], %s412_s1, %s412_s1, %s413_s9  }
  0x24   :  { %s414_s12 = smov [#allocation7]   ;;  %s358_s16 = scalar_lea.hbm %s493_s2, 48 }
  0x25   :  { %s41_s13 = sshll.u32 %s414_s12, 4  ;;  %p359_p2 = scmp.ne.s32.totalorder %s493_s2, %s358_s16  ;;  %s42_s13 = int_to_ptr.vmem [resolvable:$true] %s41_s13 }
  0x26   :  { %p362_p3 = scmp.lt.u32.totalorder %s358_s16, %s493_s2 }
  0x28   :  { %p364_p4 = pnand %p362_p3, %p359_p2 }
  0x2a   :  { %367 = shalt.err (!%p364_p4)
}
  0x2b   :  { %s368_s21 = scalar_lea.vmem %s42_s13, 48  ;;  %s372_s0 = scalar_lea.vmem %s42_s13, 64 }
  0x2c   :  { %p369_p5 = scmp.ne.s32.totalorder %s42_s13, %s368_s21  ;;  %p373_p6 = scmp.lt.s32.totalorder %s42_s13, %s42_s13 }
  0x2d   :  { %p374_p7 = scmp.lt.s32.totalorder %s372_s0, %s368_s21 }
  0x2f   :  { %p375_p8 = por %p374_p7, %p373_p6 }
  0x31   :  { %p376_p9 = pnand %p375_p8, %p369_p5 }
  0x33   :  { %379 = shalt.err (!%p376_p9)
}
  0x34   :  { %44 = dma.hbm_to_vmem [thread:$0]  %s493_s2, 48, %s42_s13, [#allocation6]  }
  0x35   :  { %402 = dma.done.wait [#allocation3], 256  }
  0x36   :  { %403 = vsyncadd [#allocation3], 4294967040 }
  0x37   :  { %404 = dma.done.wait [#allocation6], 1584  }
  0x38   :  { %405 = vsyncadd [#allocation6], 4294965712  ;;  %v415_v0 = vmov 0.0   ;;  %v57_v1 = vld [vmem:[#allocation5 + $0x8] sm:$0xff]  ;;  %v60_v2 = vld [vmem:[#allocation5 + $0x20] sm:$0xff]  ;;  %vm85_vm0 = vcmask 261120   ;;  %v70_v21 = vlaneseq }
  0x39   :  { %156 = vmatprep.mubr.f32.mxu0 %v415_v0  ;;  %v56_v3 = vld [vmem:[#allocation5] sm:$0xff]  ;;  %v289_v4 = vpack.c.bf16 %v60_v2, %v57_v1  ;;  %v59_v5 = vld [vmem:[#allocation5 + $0x18] sm:$0xff]  ;;  %v58_v6 = vld [vmem:[#allocation5 + $0x10] sm:$0xff]  ;;  %s416_s2 = smov [#allocation8]  }
  0x3a   :  { %v61_v7 = vld [vmem:[#allocation5 + $0x28] sm:$0xff]  ;;  %v291_v8 = vpack.c.bf16 %v59_v5, %v56_v3  ;;  %v63_v10 = vld [vmem:[#allocation5 + $0x38] sm:$0xff]  ;;  %v66_v11 = vld [vmem:[#allocation5 + $0x50] sm:$0xff]  ;;  %v71_v22 = vshrl.u32 %v70_v21, 7  ;;  %s255_s26 = sshll.u32 %s416_s2, 4  ;;  %s256_s26 = int_to_ptr.vmem [resolvable:$true] %s255_s26 }
  0x3b   :  { %v297_v9 = vpack.c.bf16 %v61_v7, %v58_v6  ;;  %v62_v12 = vld [vmem:[#allocation5 + $0x30] sm:$0xff]  ;;  %290 = vmatprep.subr.bf16.mxu0 %v289_v4  ;;  %v293_v13 = vpack.c.bf16 %v66_v11, %v63_v10  ;;  %v65_v14 = vld [vmem:[#allocation5 + $0x48] sm:$0xff]  ;;  %v64_v15 = vld [vmem:[#allocation5 + $0x40] sm:$0xff]  ;;  %s380_s27 = scalar_lea.vmem %s256_s26, 768  ;;  %p385_p11 = scmp.lt.s32.totalorder %s256_s26, %s256_s26 }
  0x3c   :  { %v67_v16 = vld [vmem:[#allocation5 + $0x58] sm:$0xff]  ;;  %292 = vmatpush1.bf16.msra.mxu0 %v291_v8  ;;  %v295_v17 = vpack.c.bf16 %v65_v14, %v62_v12  ;;  %v54_v19 = vld [vmem:[#allocation2] sm:$0xff]  ;;  %v72_v23 = vsub.s32 0, %v71_v22  ;;  %v68_v24 = vld [vmem:[#allocation7] sm:$0x7]  ;;  %v76_v25 = vsub.s32 1, %v71_v22  ;;  %p381_p10 = scmp.ne.s32.totalorder %s256_s26, %s380_s27  ;;  %p386_p12 = scmp.lt.s32.totalorder %s380_s27, %s380_s27 }
  0x3d   :  { %298 = vmatprep.subr.bf16.mxu1 %v297_v9  ;;  %v301_v18 = vpack.c.bf16 %v67_v16, %v64_v15  ;;  %294 = vmatprep.subr.bf16.mxu0 %v293_v13  ;;  %v55_v20 = vld [vmem:[#allocation2 + $0x8] sm:$0xff]  ;;  %v80_v26 = vsub.s32 2, %v71_v22 }
  0x3e   :  { %300 = vmatpush3.bf16.msra.mxu1 %v297_v9  ;;  %286 = vmatprep.mubr.msk.f32.mxu1 %vm85_vm0, %v54_v19  ;;  %v73_v27 = vrot.slane %v68_v24, %v72_v23  ;;  %v77_v28 = vrot.slane %v68_v24, %v76_v25  ;;  %p387_p13 = por %p386_p12, %p385_p11 }
  0x3f   :  { %302 = vmatprep.subr.bf16.mxu1 %v301_v18  ;;  %v81_v29 = vrot.slane %v68_v24, %v80_v26 }
  0x40   :  { %296 = vmatpush1.bf16.msra.mxu0 %v295_v17  ;;  %p388_p0 = pnand %p387_p13, %p381_p10 }
  0x42   :  { %304 = vmatpush3.bf16.msra.mxu1 %v301_v18 }
  0x43   :  { %268 = vmatmul.mubr.msk.f32.vlgmr.msra.gmra.mrb[0].mxu0 %vm85_vm0, %v54_v19 }
  0x44   :  { %162 = vmatprep.mubr.f32.mxu0 %v415_v0 }
  0x45   :  { %287 = vmatmul.mubr.msk.f32.vlgmr.msra.gmra.mrb[0].mxu1 %vm85_vm0, %v55_v20 }
  0x47   :  { %269 = vmatmul.mubr.msk.f32.gmra.mrb[2].mxu0 %vm85_vm0, %v55_v20 }
 0x116   :  { %v158_v30 = vpop.f32.mrb[0].mxu0 }
 0x117   :  { %v159_v31 = vadd.f32 %v158_v30, %v73_v27  ;;  %v160_v32 = vpop.f32.mrb[1].mxu0 }
 0x118   :  { %v288_v33 = vpop.f32.mrb[0].mxu1  ;;  %v161_v34 = vadd.f32 %v160_v32, %v77_v28 }
 0x119   :  { %v241_v35 = vadd.f32 %v288_v33, %v81_v29  ;;  %v235_v36 = vpop.f32.mrb[1].mxu1  ;;  %244 = vst [vmem:[#allocation8] sm:$0xff] %v159_v31 }
 0x11a   :  { %v236_v37 = vadd.f32 %v235_v36, %v81_v29  ;;  %245 = vst [vmem:[#allocation8 + $0x8] sm:$0xff] %v161_v34  ;;  %v164_v38 = vpop.f32.mrb[2].mxu0 }
 0x11b   :  { %249 = vst [vmem:[#allocation8 + $0x28] sm:$0xff] %v241_v35  ;;  %v165_v39 = vadd.f32 %v164_v38, %v73_v27  ;;  %v166_v40 = vpop.f32.mrb[3].mxu0 }
 0x11c   :  { %246 = vst [vmem:[#allocation8 + $0x10] sm:$0xff] %v236_v37  ;;  %v167_v41 = vadd.f32 %v166_v40, %v77_v28 }
 0x11d   :  { %247 = vst [vmem:[#allocation8 + $0x18] sm:$0xff] %v165_v39 }
 0x11e   :  { %248 = vst [vmem:[#allocation8 + $0x20] sm:$0xff] %v167_v41 }
 0x11f   :  { %391 = shalt.err (!%p388_p0)
}
 0x120   :  { %s392_s30 = scalar_lea.hbm %s494_s3, 768 }
 0x121   :  { %p393_p1 = scmp.ne.s32.totalorder %s494_s3, %s392_s30  ;;  %p396_p2 = scmp.lt.u32.totalorder %s392_s30, %s494_s3 }
 0x123   :  { %p398_p3 = pnand %p396_p2, %p393_p1 }
 0x125   :  { %401 = shalt.err (!%p398_p3)
}
 0x126   :  { %261 = dma.vmem_to_hbm [thread:$0]  %s256_s26, 768, %s494_s3, [#allocation4], %s409_s22, %s409_s22, %s410_s23  }
 0x127   :  { %406 = dma.done.wait [#allocation4], 768  }
 0x128   :  { %407 = vsyncadd [#allocation4], 4294966528 }
 0x129   :  { %265 = vsyncpa [#allocation3], 1 }
 0x12a   :  { %266 = vsyncpa [#allocation6], 1 }
 0x12b   :  { %267 = vsyncpa [#allocation4], 1 }

// kernel: ipa_forward.7
= control target key start
LH: loop header
LB: loop body
LE: loop exit
PB: predicated region body
PF: predicated region fallthrough
CT: control target
= control target key end

     0   :  { %8 = vsyncpa [#allocation3], 0  ;;  %s474_s0 = inlined_call_operand.hbm [shape: f32[16,208], index: 0, kind: input, shape index: {}]   ;;  %s475_s1 = inlined_call_operand.hbm [shape: f32[208,32], index: 1, kind: input, shape index: {}]   ;;  %s476_s2 = inlined_call_operand.hbm [shape: f32[1,32], index: 2, kind: input, shape index: {}]   ;;  %s477_s3 = inlined_call_operand.hbm [shape: f32[16,32], index: 3, kind: output, shape index: {}]  }
   0x1   :  { %9 = vsyncpa [#allocation6], 0 }
   0x2   :  { %10 = vsyncpa [#allocation4], 0  ;;  %s365_s12 = smov [#allocation5]   ;;  %s271_s16 = scalar_lea.hbm %s475_s1, 3328 }
   0x3   :  { %s28_s13 = sshll.u32 %s365_s12, 4  ;;  %p272_p0 = scmp.ne.s32.totalorder %s475_s1, %s271_s16  ;;  %s29_s13 = int_to_ptr.vmem [resolvable:$true] %s28_s13 }
   0x4   :  { %p275_p1 = scmp.lt.u32.totalorder %s271_s16, %s475_s1 }
   0x6   :  { %p277_p2 = pnand %p275_p1, %p272_p0 }
   0x8   :  { %280 = shalt.err (!%p277_p2)
}
   0x9   :  { %s281_s21 = scalar_lea.vmem %s29_s13, 3328  ;;  %p286_p4 = scmp.lt.s32.totalorder %s29_s13, %s29_s13 }
   0xa   :  { %p282_p3 = scmp.ne.s32.totalorder %s29_s13, %s281_s21  ;;  %p287_p5 = scmp.lt.s32.totalorder %s281_s21, %s281_s21 }
   0xc   :  { %p288_p6 = por %p287_p5, %p286_p4 }
   0xe   :  { %p289_p7 = pnand %p288_p6, %p282_p3 }
  0x10   :  { %292 = shalt.err (!%p289_p7)
}
  0x11   :  { %s366_s22 = smov 128   ;;  %s367_s23 = smov 8  }
  0x12   :  { %34 = dma.hbm_to_vmem [thread:$0]  %s475_s1, 3328, %s29_s13, [#allocation6], %s366_s22, %s366_s22, %s367_s23  }
  0x13   :  { %s368_s26 = smov [#allocation2]   ;;  %s293_s30 = scalar_lea.hbm %s474_s0, 512 }
  0x14   :  { %s16_s27 = sshll.u32 %s368_s26, 4  ;;  %p294_p8 = scmp.ne.s32.totalorder %s474_s0, %s293_s30  ;;  %s17_s27 = int_to_ptr.vmem [resolvable:$true] %s16_s27 }
  0x15   :  { %p297_p9 = scmp.lt.u32.totalorder %s293_s30, %s474_s0 }
  0x17   :  { %p299_p10 = pnand %p297_p9, %p294_p8 }
  0x19   :  { %302 = shalt.err (!%p299_p10)
}
  0x1a   :  { %s303_s8 = scalar_lea.vmem %s17_s27, 512  ;;  %p308_p12 = scmp.lt.s32.totalorder %s17_s27, %s17_s27 }
  0x1b   :  { %p304_p11 = scmp.ne.s32.totalorder %s17_s27, %s303_s8  ;;  %p309_p13 = scmp.lt.s32.totalorder %s303_s8, %s303_s8 }
  0x1d   :  { %p310_p0 = por %p309_p13, %p308_p12 }
  0x1f   :  { %p311_p1 = pnand %p310_p0, %p304_p11 }
  0x21   :  { %314 = shalt.err (!%p311_p1)
}
  0x22   :  { %s369_s1 = smov 256   ;;  %s370_s9 = smov 16  }
  0x23   :  { %22 = dma.hbm_to_vmem [thread:$0]  %s474_s0, 512, %s17_s27, [#allocation3], %s369_s1, %s369_s1, %s370_s9  }
  0x24   :  { %s371_s12 = smov [#allocation7]   ;;  %s315_s16 = scalar_lea.hbm %s476_s2, 16 }
  0x25   :  { %s41_s13 = sshll.u32 %s371_s12, 4  ;;  %p316_p2 = scmp.ne.s32.totalorder %s476_s2, %s315_s16  ;;  %s42_s13 = int_to_ptr.vmem [resolvable:$true] %s41_s13 }
  0x26   :  { %p319_p3 = scmp.lt.u32.totalorder %s315_s16, %s476_s2 }
  0x28   :  { %p321_p4 = pnand %p319_p3, %p316_p2 }
  0x2a   :  { %324 = shalt.err (!%p321_p4)
}
  0x2b   :  { %s325_s21 = scalar_lea.vmem %s42_s13, 16  ;;  %s329_s0 = scalar_lea.vmem %s42_s13, 32 }
  0x2c   :  { %p326_p5 = scmp.ne.s32.totalorder %s42_s13, %s325_s21  ;;  %p330_p6 = scmp.lt.s32.totalorder %s42_s13, %s42_s13 }
  0x2d   :  { %p331_p7 = scmp.lt.s32.totalorder %s329_s0, %s325_s21 }
  0x2f   :  { %p332_p8 = por %p331_p7, %p330_p6 }
  0x31   :  { %p333_p9 = pnand %p332_p8, %p326_p5 }
  0x33   :  { %336 = shalt.err (!%p333_p9)
}
  0x34   :  { %44 = dma.hbm_to_vmem [thread:$0]  %s476_s2, 16, %s42_s13, [#allocation6]  }
  0x35   :  { %359 = dma.done.wait [#allocation3], 512  }
  0x36   :  { %360 = vsyncadd [#allocation3], 4294966784 }
  0x37   :  { %361 = dma.done.wait [#allocation6], 3344  }
  0x38   :  { %362 = vsyncadd [#allocation6], 4294963952  ;;  %v372_v0 = vmov 0.0|0.0   ;;  %v58_v1 = vld [vmem:[#allocation5] sm:$0xff]  ;;  %v59_v2 = vld [vmem:[#allocation5 + $0x8] sm:$0xff]  ;;  %vm91_vm0 = vcmask 654336  }
  0x39   :  { %197 = vmatprep.subr.bf16.mxu0 %v372_v0  ;;  %236 = vmatprep.subr.bf16.mxu1 %v372_v0  ;;  %v60_v3 = vld [vmem:[#allocation5 + $0x10] sm:$0xff]  ;;  %v198_v4 = vpack.c.bf16 %v59_v2, %v58_v1  ;;  %v61_v5 = vld [vmem:[#allocation5 + $0x18] sm:$0xff]  ;;  %v62_v7 = vld [vmem:[#allocation5 + $0x20] sm:$0xff]  ;;  %s373_s2 = smov [#allocation8]   ;;  %vm173_vm1 = vcmask 261120  }
  0x3a   :  { %v201_v6 = vpack.c.bf16 %v61_v5, %v60_v3  ;;  %v63_v8 = vld [vmem:[#allocation5 + $0x28] sm:$0xff]  ;;  %v64_v10 = vld [vmem:[#allocation5 + $0x30] sm:$0xff]  ;;  %v65_v11 = vld [vmem:[#allocation5 + $0x38] sm:$0xff]  ;;  %s181_s26 = sshll.u32 %s373_s2, 4  ;;  %s182_s26 = int_to_ptr.vmem [resolvable:$true] %s181_s26 }
  0x3b   :  { %199 = vmatpush1.bf16.msra.mxu0 %v198_v4  ;;  %249 = vmatpush1.bf16.msra.mxu1 %v198_v4  ;;  %v204_v9 = vpack.c.bf16 %v63_v8, %v62_v7  ;;  %v55_v12 = vld [vmem:[#allocation2 + $0x8] sm:$0xff]  ;;  %v57_v13 = vld [vmem:[#allocation2 + $0x18] sm:$0xff]  ;;  %v207_v14 = vpack.c.bf16 %v65_v11, %v64_v10  ;;  %v66_v15 = vld [vmem:[#allocation5 + $0x40] sm:$0xff]  ;;  %s337_s27 = scalar_lea.vmem %s182_s26, 256  ;;  %p342_p11 = scmp.lt.s32.totalorder %s182_s26, %s182_s26 }
  0x3c   :  { %200 = vmatprep.subr.bf16.mxu0 %v372_v0  ;;  %237 = vmatprep.subr.bf16.mxu1 %v372_v0  ;;  %v67_v16 = vld [vmem:[#allocation5 + $0x48] sm:$0xff]  ;;  %v68_v18 = vld [vmem:[#allocation5 + $0x50] sm:$0xff]  ;;  %v69_v19 = vld [vmem:[#allocation5 + $0x58] sm:$0xff]  ;;  %p338_p10 = scmp.ne.s32.totalorder %s182_s26, %s337_s27  ;;  %p343_p12 = scmp.lt.s32.totalorder %s337_s27, %s337_s27 }
  0x3d   :  { %195 = vmatprep.mubr.msk.f32.mxu0 %vm91_vm0, %v55_v12  ;;  %196 = vmatprep.mubr.msk.f32.mxu1 %vm91_vm0, %v57_v13  ;;  %v210_v17 = vpack.c.bf16 %v67_v16, %v66_v15  ;;  %v213_v20 = vpack.c.bf16 %v69_v19, %v68_v18  ;;  %v70_v21 = vld [vmem:[#allocation5 + $0x60] sm:$0xff]  ;;  %v71_v22 = vld [vmem:[#allocation5 + $0x68] sm:$0xff]  ;;  %v72_v24 = vld [vmem:[#allocation5 + $0x70] sm:$0xff] }
  0x3e   :  { %v216_v23 = vpack.c.bf16 %v71_v22, %v70_v21  ;;  %v73_v25 = vld [vmem:[#allocation5 + $0x78] sm:$0xff]  ;;  %v74_v27 = vld [vmem:[#allocation5 + $0x80] sm:$0xff]  ;;  %v75_v28 = vld [vmem:[#allocation5 + $0x88] sm:$0xff]  ;;  %p344_p13 = por %p343_p12, %p342_p11 }
  0x3f   :  { %202 = vmatpush1.bf16.msra.mxu0 %v201_v6  ;;  %250 = vmatpush1.bf16.msra.mxu1 %v201_v6  ;;  %v219_v26 = vpack.c.bf16 %v73_v25, %v72_v24  ;;  %v222_v29 = vpack.c.bf16 %v75_v28, %v74_v27  ;;  %v76_v30 = vld [vmem:[#allocation5 + $0x90] sm:$0xff]  ;;  %v77_v31 = vld [vmem:[#allocation5 + $0x98] sm:$0xff]  ;;  %v78_v33 = vld [vmem:[#allocation5 + $0xa0] sm:$0xff] }
  0x40   :  { %203 = vmatprep.subr.bf16.mxu0 %v372_v0  ;;  %238 = vmatprep.subr.bf16.mxu1 %v372_v0  ;;  %v225_v32 = vpack.c.bf16 %v77_v31, %v76_v30  ;;  %v79_v34 = vld [vmem:[#allocation5 + $0xa8] sm:$0xff]  ;;  %v80_v36 = vld [vmem:[#allocation5 + $0xb0] sm:$0xff]  ;;  %v81_v37 = vld [vmem:[#allocation5 + $0xb8] sm:$0xff]  ;;  %p345_p0 = pnand %p344_p13, %p338_p10 }
  0x41   :  { %v228_v35 = vpack.c.bf16 %v79_v34, %v78_v33  ;;  %v231_v38 = vpack.c.bf16 %v81_v37, %v80_v36  ;;  %v82_v39 = vld [vmem:[#allocation5 + $0xc0] sm:$0xff]  ;;  %v83_v40 = vld [vmem:[#allocation5 + $0xc8] sm:$0xff]  ;;  %v56_v43 = vld [vmem:[#allocation2 + $0x10] sm:$0xff] }
  0x42   :  { %v234_v41 = vpack.c.bf16 %v83_v40, %v82_v39  ;;  %v54_v42 = vld [vmem:[#allocation2] sm:$0xff]  ;;  %v194_v44 = vld [vmem:[#allocation7] ss:$0 sm:$0xff] }
  0x43   :  { %205 = vmatpush1.bf16.msra.mxu0 %v204_v9  ;;  %251 = vmatpush1.bf16.msra.mxu1 %v204_v9 }
  0x44   :  { %206 = vmatprep.subr.bf16.mxu0 %v372_v0  ;;  %239 = vmatprep.subr.bf16.mxu1 %v372_v0 }
  0x47   :  { %208 = vmatpush1.bf16.msra.mxu0 %v207_v14  ;;  %252 = vmatpush1.bf16.msra.mxu1 %v207_v14 }
  0x48   :  { %209 = vmatprep.subr.bf16.mxu0 %v372_v0  ;;  %240 = vmatprep.subr.bf16.mxu1 %v372_v0 }
  0x4b   :  { %211 = vmatpush1.bf16.msra.mxu0 %v210_v17  ;;  %253 = vmatpush1.bf16.msra.mxu1 %v210_v17 }
  0x4c   :  { %212 = vmatprep.subr.bf16.mxu0 %v372_v0  ;;  %241 = vmatprep.subr.bf16.mxu1 %v372_v0 }
  0x4f   :  { %214 = vmatpush1.bf16.msra.mxu0 %v213_v20  ;;  %254 = vmatpush1.bf16.msra.mxu1 %v213_v20 }
  0x50   :  { %215 = vmatprep.subr.bf16.mxu0 %v372_v0  ;;  %242 = vmatprep.subr.bf16.mxu1 %v372_v0 }
  0x53   :  { %217 = vmatpush1.bf16.msra.mxu0 %v216_v23  ;;  %255 = vmatpush1.bf16.msra.mxu1 %v216_v23 }
  0x54   :  { %218 = vmatprep.subr.bf16.mxu0 %v372_v0  ;;  %243 = vmatprep.subr.bf16.mxu1 %v372_v0 }
  0x57   :  { %220 = vmatpush1.bf16.msra.mxu0 %v219_v26  ;;  %256 = vmatpush1.bf16.msra.mxu1 %v219_v26 }
  0x58   :  { %221 = vmatprep.subr.bf16.mxu0 %v372_v0  ;;  %244 = vmatprep.subr.bf16.mxu1 %v372_v0 }
  0x5b   :  { %223 = vmatpush1.bf16.msra.mxu0 %v222_v29  ;;  %257 = vmatpush1.bf16.msra.mxu1 %v222_v29 }
  0x5c   :  { %224 = vmatprep.subr.bf16.mxu0 %v372_v0  ;;  %245 = vmatprep.subr.bf16.mxu1 %v372_v0 }
  0x5f   :  { %226 = vmatpush1.bf16.msra.mxu0 %v225_v32  ;;  %258 = vmatpush1.bf16.msra.mxu1 %v225_v32 }
  0x60   :  { %227 = vmatprep.subr.bf16.mxu0 %v372_v0  ;;  %246 = vmatprep.subr.bf16.mxu1 %v372_v0 }
  0x63   :  { %229 = vmatpush1.bf16.msra.mxu0 %v228_v35  ;;  %259 = vmatpush1.bf16.msra.mxu1 %v228_v35 }
  0x64   :  { %230 = vmatprep.subr.bf16.mxu0 %v372_v0  ;;  %247 = vmatprep.subr.bf16.mxu1 %v372_v0 }
  0x67   :  { %232 = vmatpush1.bf16.msra.mxu0 %v231_v38  ;;  %260 = vmatpush1.bf16.msra.mxu1 %v231_v38 }
  0x68   :  { %233 = vmatprep.subr.bf16.mxu0 %v372_v0  ;;  %248 = vmatprep.subr.bf16.mxu1 %v372_v0 }
  0x6b   :  { %235 = vmatpush1.bf16.msra.mxu0 %v234_v41  ;;  %261 = vmatpush1.bf16.msra.mxu1 %v234_v41 }
  0x6e   :  { %163 = vmatmul.mubr.f32.vlgmr.msra.gmra.mrb[0].mxu0 %v54_v42  ;;  %168 = vmatmul.mubr.f32.vlgmr.msra.gmra.mrb[0].mxu1 %v56_v43 }
 0x141   :  { %v164_v45 = vpop.f32.mrb[0].mxu0  ;;  %v169_v46 = vpop.f32.mrb[0].mxu1 }
 0x142   :  { %v165_v47 = vadd.f32 %v194_v44, %v164_v45  ;;  %v170_v48 = vadd.f32 %v194_v44, %v169_v46  ;;  %v166_v49 = vpop.f32.mrb[1].mxu0  ;;  %v171_v50 = vpop.f32.mrb[1].mxu1 }
 0x144   :  { %174 = vst.msk [vmem:[#allocation8] sm:$0xff] %vm173_vm1, %v165_v47  ;;  %175 = vst.msk [vmem:[#allocation8 + $0x8] sm:$0xff] %vm173_vm1, %v170_v48 }
 0x145   :  { %348 = shalt.err (!%p345_p0)
}
 0x146   :  { %s349_s30 = scalar_lea.hbm %s477_s3, 256 }
 0x147   :  { %p350_p1 = scmp.ne.s32.totalorder %s477_s3, %s349_s30  ;;  %p353_p2 = scmp.lt.u32.totalorder %s349_s30, %s477_s3 }
 0x149   :  { %p355_p3 = pnand %p353_p2, %p350_p1 }
 0x14b   :  { %358 = shalt.err (!%p355_p3)
}
 0x14c   :  { %187 = dma.vmem_to_hbm [thread:$0]  %s182_s26, 256, %s477_s3, [#allocation4], %s366_s22, %s366_s22, %s367_s23  }
 0x14d   :  { %363 = dma.done.wait [#allocation4], 256  }
 0x14e   :  { %364 = vsyncadd [#allocation4], 4294967040 }
 0x14f   :  { %191 = vsyncpa [#allocation3], 1 }
 0x150   :  { %192 = vsyncpa [#allocation6], 1 }
 0x151   :  { %193 = vsyncpa [#allocation4], 1 }

// kernel: ipa_forward.6
= control target key start
LH: loop header
LB: loop body
LE: loop exit
PB: predicated region body
PF: predicated region fallthrough
CT: control target
= control target key end

     0   :  { %s4470_s0 = inlined_call_operand.hbm [shape: f32[4], index: 0, kind: input, shape index: {}]   ;;  %s4471_s1 = inlined_call_operand.hbm [shape: f32[2,8,192], index: 1, kind: input, shape index: {}]   ;;  %s4472_s2 = inlined_call_operand.hbm [shape: f32[2,8,48], index: 2, kind: input, shape index: {}]   ;;  %s4473_s3 = inlined_call_operand.hbm [shape: f32[2,8,48], index: 3, kind: input, shape index: {}]   ;;  %s4474_s4 = inlined_call_operand.hbm [shape: f32[2,8,96], index: 4, kind: input, shape index: {}]   ;;  %s4475_s5 = inlined_call_operand.hbm [shape: f32[2,8,8,8], index: 5, kind: input, shape index: {}]   ;;  %s4476_s6 = inlined_call_operand.hbm [shape: f32[2,8,8], index: 6, kind: input, shape index: {}]   ;;  %s4477_s7 = inlined_call_operand.hbm [shape: f32[2,8,176], index: 7, kind: output, shape index: {}]  }
   0x1   :  { %4493 = sst [smem:[#allocation27_spill]] %s4472_s2 }
   0x2   :  { %4494 = sst [smem:[#allocation28_spill]] %s4474_s4 }
   0x3   :  { %4495 = sst [smem:[#allocation29_spill]] %s4477_s7 }
   0x4   :  { %12 = vsyncpa [#allocation5], 0 }
   0x5   :  { %13 = vsyncpa [#allocation3], 0 }
   0x6   :  { %15 = vsyncpa [#allocation3 + $0x1], 0 }
   0x7   :  { %16 = vsyncpa [#allocation8], 0 }
   0x8   :  { %18 = vsyncpa [#allocation8 + $0x1], 0 }
   0x9   :  { %19 = vsyncpa [#allocation11], 0 }
   0xa   :  { %21 = vsyncpa [#allocation11 + $0x1], 0 }
   0xb   :  { %22 = vsyncpa [#allocation14], 0 }
   0xc   :  { %24 = vsyncpa [#allocation14 + $0x1], 0 }
   0xd   :  { %25 = vsyncpa [#allocation4], 0 }
   0xe   :  { %27 = vsyncpa [#allocation4 + $0x1], 0  ;;  %s3597_s24 = smov 0   ;;  %s3599_s25 = smov 0  }
   0xf   :  { %s3601_s26 = smov 0   ;;  %s3603_s27 = smov 0  }
  0x10 LB: > { %4496 = sst [smem:[#allocation22_spill]] %s3507_s24  ;;  %s3618_s28 = sadd.s32 1, %s3519_s27   ;;  %s3519_s27 = sphi %s3603_s27, %s4527_s27   ;;  %s3515_s26 = sphi %s3601_s26, %s4529_s26   ;;  %s3511_s25 = sphi %s3599_s25, %s4531_s25   ;;  %s3507_s24 = sphi %s3597_s24, %s4530_s24  }
  0x11   : > { %4497 = sst [smem:[#allocation23_spill]] %s3515_s26  ;;  %s61_s29 = sadd.s32 1, %s3515_s26 }
  0x12   : > { %4498 = sst [smem:[#allocation24_spill]] %s3618_s28  ;;  %s58_s30 = ssub.s32 %s3519_s27, %s3618_s28 }
  0x13   : > { %p4478_p0 = scmp.ne.s32.totalorder %s3515_s26, %s3511_s25  ;;  %p59_p1 = scmp.eq.s32.totalorder %s58_s30, 0 }
  0x14   : > { %p69_p2 = scmp.eq.s32.totalorder %s3519_s27, 0  ;;  %p3147_p4 = scmp.lt.s32.totalorder %s3519_s27, 2 }
  0x15   : > { %s3629_s8 = scalar_select %p59_p1, %s3515_s26, %s61_s29  }
  0x16   : > { %p70_p5 = por %p69_p2, %p4478_p0  ;;  %s3635_s9 = sand.u32 1, %s3515_s26  }
  0x17   : > { %4499 = sst [smem:[#allocation25_spill]] %s3629_s8  ;;  %s282_s10 = sand.u32 1, %s3519_s27  }
  0x18   : > { %s3639_s11 = sshll.u32 %s3635_s9, 3  ;;  %p3641_p6 = pnand %p3147_p4, %p70_p5 }
  0x19   : > { %s3646_s13 = sshll.u32 %s3519_s27, 7  ;;  %s4501_s2 = sld [smem:[#allocation27_spill]] }
  0x1a   : > { %s4500_s12 = scalar_select %p3641_p6, 1, 0 }
  0x1b   : > { %s286_s17 = scalar_lea.vmem [#allocation7], %s3639_s11  ;;  %s3659_s19 = scalar_lea.sflag [#allocation8], %s282_s10 }
  0x1c   : > { %s293_s18 = sshll.u32 %s286_s17, 4  ;;  %p3665_p8 = pneg %p3641_p6  ;;  %s3655_s18 = int_to_ptr.vmem [resolvable:$true] %s293_s18 }
  0x1f   : > { %s3652_s16 = scalar_lea.hbm %s4501_s2, %s3646_s13  ;;  %s3249_s29 = scalar_lea.hbm %s4501_s2, 256 }
  0x20   : > { %s3244_s20 = scalar_lea.hbm %s3652_s16, 128  ;;  %p3250_p11 = scmp.lt.u32.totalorder %s3652_s16, %s4501_s2 }
  0x21   : > { %p3245_p7 = scmp.ne.s32.totalorder %s3652_s16, %s3244_s20  ;;  %p3251_p12 = scmp.lt.u32.totalorder %s3249_s29, %s3244_s20 }
  0x22   : > { %p3253_p1 = scmp.lt.u32.totalorder %s3244_s20, %s3652_s16 }
  0x23   : > { %p3247_p9 = pnand %p3665_p8, %p3245_p7  ;;  %p3252_p13 = por %p3251_p12, %p3250_p11 }
  0x25   : > { %p3248_p10 = pneg %p3247_p9  ;;  %p3254_p2 = por %p3253_p1, %p3252_p13 }
  0x27   : > { %p3255_p4 = pnand %p3254_p2, %p3248_p10 }
  0x29   : > { %3258 = shalt.err (!%p3255_p4)
}
  0x2a   : > { %s3259_s15 = scalar_lea.vmem %s3655_s18, 128  ;;  %s3521_s17 = smov [#allocation7]  }
  0x2b   : > { %p3260_p5 = scmp.ne.s32.totalorder %s3655_s18, %s3259_s15  ;;  %s3264_s22 = sshll.u32 %s3521_s17, 4  ;;  %s3265_s22 = int_to_ptr.vmem [resolvable:$false] %s3264_s22 }
  0x2c   : > { %s3266_s23 = scalar_lea.vmem %s3265_s22, 256  ;;  %p3267_p3 = scmp.lt.s32.totalorder %s3655_s18, %s3265_s22 }
  0x2d   : > { %p3262_p7 = pnand %p3260_p5, %p3665_p8  ;;  %p3268_p0 = scmp.lt.s32.totalorder %s3266_s23, %s3259_s15 }
  0x2f   : > { %p3263_p9 = pneg %p3262_p7  ;;  %p3269_p11 = por %p3268_p0, %p3267_p3 }
  0x31   : > { %p3270_p12 = pnand %p3269_p11, %p3263_p9 }
  0x33   : > { %3273 = shalt.err (!%p3270_p12)
}
  0x34   : > { %3129 = dma.hbm_to_vmem [thread:$0]  (!%p3641_p6), %s3652_s16, 128, %s3655_s18, %s3659_s19  }
  0x35   : > { %s4503_s4 = sld [smem:[#allocation28_spill]]  ;;  %s322_s14 = scalar_lea.vmem [#allocation10], %s3639_s11 }
  0x36   : > { %s329_s15 = sshll.u32 %s322_s14, 4  ;;  %s3698_s17 = scalar_lea.sflag [#allocation11], %s282_s10  ;;  %s330_s15 = int_to_ptr.vmem [resolvable:$true] %s329_s15 }
  0x3b   : > { %s3693_s30 = scalar_lea.hbm %s4503_s4, %s3646_s13  ;;  %s3279_s23 = scalar_lea.hbm %s4503_s4, 256 }
  0x3c   : > { %s3274_s22 = scalar_lea.hbm %s3693_s30, 128  ;;  %p3280_p13 = scmp.lt.u32.totalorder %s3693_s30, %s4503_s4 }
  0x3d   : > { %p3275_p0 = scmp.ne.s32.totalorder %s3693_s30, %s3274_s22  ;;  %p3281_p1 = scmp.lt.u32.totalorder %s3279_s23, %s3274_s22 }
  0x3e   : > { %p3283_p4 = scmp.lt.u32.totalorder %s3274_s22, %s3693_s30 }
  0x3f   : > { %p3277_p3 = pnand %p3275_p0, %p3665_p8  ;;  %p3282_p2 = por %p3281_p1, %p3280_p13 }
  0x41   : > { %p3278_p10 = pneg %p3277_p3  ;;  %p3284_p5 = por %p3283_p4, %p3282_p2 }
  0x43   : > { %p3285_p7 = pnand %p3284_p5, %p3278_p10 }
  0x45   : > { %3288 = shalt.err (!%p3285_p7)
}
  0x46   : > { %s3289_s10 = scalar_lea.vmem %s330_s15, 128  ;;  %s3522_s14 = smov [#allocation10]  }
  0x47   : > { %p3290_p9 = scmp.ne.s32.totalorder %s330_s15, %s3289_s10  ;;  %s3294_s2 = sshll.u32 %s3522_s14, 4  ;;  %s3295_s2 = int_to_ptr.vmem [resolvable:$false] %s3294_s2 }
  0x48   : > { %s3296_s16 = scalar_lea.vmem %s3295_s2, 256  ;;  %p3297_p0 = scmp.lt.s32.totalorder %s330_s15, %s3295_s2 }
  0x49   : > { %p3292_p11 = pnand %p3290_p9, %p3665_p8  ;;  %p3298_p3 = scmp.lt.s32.totalorder %s3296_s16, %s3289_s10 }
  0x4b   : > { %p3293_p12 = pneg %p3292_p11  ;;  %p3299_p6 = por %p3298_p3, %p3297_p0 }
  0x4d   : > { %p3300_p1 = pnand %p3299_p6, %p3293_p12 }
  0x4f   : > { %3303 = shalt.err (!%p3300_p1)
}
  0x50   : > { %p4504_p13 = scmp.ne.s32.totalorder %s4500_s12, 0  ;;  %s3719_s2 = sadd.s32 4294967295, %s3519_s27  }
  0x51   : > { %s2931_s22 = sadd.s32 4294967294, %s3519_s27   ;;  %p74_p6 = scmp.ne.s32.totalorder %s3511_s25, %s3507_s24 }
  0x52   : > { %3135 = dma.hbm_to_vmem [thread:$0]  (!%p4504_p13), %s3693_s30, 128, %s330_s15, %s3698_s17  }
  0x53   : > { %p4486_p10 = scmp.eq.s32.totalorder %s3719_s2, 0  ;;  %p228_p2 = scmp.eq.s32.totalorder %s3719_s2, 1 }
  0x54   : > { %p234_p4 = scmp.eq.s32.totalorder %s2931_s22, 1  ;;  %p2932_p5 = scmp.ge.s32.totalorder %s3519_s27, 1 }
  0x55   : > { %p3729_p7 = por %p4486_p10, %p74_p6  ;;  %p4506_p9 = scmp.ne.s32.totalorder %s3515_s26, %s3511_s25 }
  0x56   : > { %p3740_p12 = por %p234_p4, %p74_p6  ;;  %p241_p0 = scmp.lt.s32.totalorder %s3519_s27, 3 }
  0x57   : > { %s4505_s18 = scalar_select %p3729_p7, 1, 0 }
  0x58   : > { %p3736_p11 = por %p228_p2, %p4506_p9  ;;  %p3745_p3 = pnand %p2932_p5, %p241_p0 }
  0x59   : > { %s4508_s15 = scalar_select %p3740_p12, 1, 0 }
  0x5a   : > { %s4507_s30 = scalar_select %p3736_p11, 1, 0 }
  0x5b   : > { %4509 = sst [smem:[#allocation26_spill]] %s4508_s15  ;;  %s2935_s20 = sshll.u32 %s3635_s9, 4 }
  0x5c   : > { %s4510_s23 = scalar_select %p3745_p3, 1, 0 }
  0x5d   : > { %s2986_s29 = sshll.u32 %s3519_s27, 8  ;;  %p3119_p1 = pneg %p3745_p3 }
  0x5e   : > { %s3756_s16 = scalar_lea.hbm %s4471_s1, %s2986_s29  ;;  %s267_s22 = scalar_lea.vmem [#allocation6], %s2935_s20 }
  0x5f   : > { %s275_s4 = sshll.u32 %s267_s22, 4  ;;  %p3760_p6 = pnand %p3119_p1, %p4486_p10  ;;  %s276_s4 = int_to_ptr.vmem [resolvable:$true] %s275_s4 }
  0x60   : > { %s264_s26 = scalar_lea.sflag [#allocation3], %s3635_s9  ;;  %s3304_s28 = scalar_lea.hbm %s3756_s16, 256 }
  0x61   : > { %s4511_s8 = scalar_select %p3760_p6, 1, 0 }
  0x62   : > { %p3305_p2 = scmp.ne.s32.totalorder %s3756_s16, %s3304_s28  ;;  %s3309_s14 = scalar_lea.hbm %s4471_s1, 512 }
  0x63   : > { %p3310_p9 = scmp.lt.u32.totalorder %s3756_s16, %s4471_s1  ;;  %p3311_p0 = scmp.lt.u32.totalorder %s3309_s14, %s3304_s28 }
  0x64   : > { %p3307_p4 = pnand %p3305_p2, %p3665_p8  ;;  %p3313_p10 = scmp.lt.u32.totalorder %s3304_s28, %s3756_s16 }
  0x65   : > { %p3312_p1 = por %p3311_p0, %p3310_p9 }
  0x66   : > { %p3308_p5 = pneg %p3307_p4 }
  0x67   : > { %p3314_p12 = por %p3313_p10, %p3312_p1 }
  0x69   : > { %p3315_p11 = pnand %p3314_p12, %p3308_p5 }
  0x6b   : > { %3318 = shalt.err (!%p3315_p11)
}
  0x6c   : > { %s3319_s20 = scalar_lea.vmem %s276_s4, 256  ;;  %s3523_s22 = smov [#allocation6]  }
  0x6d   : > { %p3320_p7 = scmp.ne.s32.totalorder %s276_s4, %s3319_s20  ;;  %s3324_s7 = sshll.u32 %s3523_s22, 4  ;;  %s3325_s7 = int_to_ptr.vmem [resolvable:$false] %s3324_s7 }
  0x6e   : > { %s3326_s29 = scalar_lea.vmem %s3325_s7, 512  ;;  %p3327_p3 = scmp.lt.s32.totalorder %s276_s4, %s3325_s7 }
  0x6f   : > { %p3322_p2 = pnand %p3320_p7, %p3665_p8  ;;  %p3328_p6 = scmp.lt.s32.totalorder %s3326_s29, %s3319_s20 }
  0x71   : > { %p3323_p4 = pneg %p3322_p2  ;;  %p3329_p13 = por %p3328_p6, %p3327_p3 }
  0x73   : > { %p3330_p0 = pnand %p3329_p13, %p3323_p4 }
  0x75   : > { %3333 = shalt.err (!%p3330_p0)
}
  0x76   : > { %p4512_p9 = scmp.ne.s32.totalorder %s4500_s12, 0  ;;  %s3334_s15 = scalar_lea.hbm %s4470_s0, 16 }
  0x77   : > { %p3335_p10 = scmp.ne.s32.totalorder %s4470_s0, %s3334_s15  ;;  %p4513_p7 = scmp.ne.s32.totalorder %s4511_s8, 0 }
  0x78   : > { %3126 = dma.hbm_to_vmem [thread:$0]  (!%p4512_p9), %s3756_s16, 256, %s276_s4, %s264_s26  }
  0x79   : > { %p3336_p11 = pneg %p4513_p7  ;;  %p3341_p13 = scmp.lt.u32.totalorder %s3334_s15, %s4470_s0 }
  0x7b   : > { %p3337_p12 = pnand %p3336_p11, %p3335_p10 }
  0x7d   : > { %p3338_p5 = pneg %p3337_p12 }
  0x7f   : > { %p3343_p3 = pnand %p3341_p13, %p3338_p5 }
  0x81   : > { %3346 = shalt.err (!%p3343_p3)
}
  0x82   : > { %s3524_s22 = smov [#allocation2]   ;;  %s3802_s24 = scalar_lea.hbm %s4473_s3, %s3646_s13 }
  0x83   : > { %3122 = dma.hbm_to_smem (!%p4513_p7), %s4470_s0, 16, %s3524_s22, [#allocation5]  }
  0x84   : > { %s304_s28 = scalar_lea.vmem [#allocation9], %s3639_s11  ;;  %s2944_s8 = sshll.u32 %s3635_s9, 6 }
  0x85   : > { %s311_s15 = sshll.u32 %s304_s28, 4  ;;  %s3347_s10 = scalar_lea.hbm %s3802_s24, 128  ;;  %s312_s15 = int_to_ptr.vmem [resolvable:$true] %s311_s15 }
  0x86   : > { %p3348_p6 = scmp.ne.s32.totalorder %s3802_s24, %s3347_s10  ;;  %s3352_s20 = scalar_lea.hbm %s4473_s3, 256 }
  0x87   : > { %p3353_p4 = scmp.lt.u32.totalorder %s3802_s24, %s4473_s3  ;;  %p3354_p0 = scmp.lt.u32.totalorder %s3352_s20, %s3347_s10 }
  0x88   : > { %p3350_p1 = pnand %p3348_p6, %p3665_p8  ;;  %p3356_p7 = scmp.lt.u32.totalorder %s3347_s10, %s3802_s24 }
  0x89   : > { %p3355_p10 = por %p3354_p0, %p3353_p4 }
  0x8a   : > { %p3351_p2 = pneg %p3350_p1 }
  0x8b   : > { %p3357_p11 = por %p3356_p7, %p3355_p10 }
  0x8d   : > { %p3358_p12 = pnand %p3357_p11, %p3351_p2 }
  0x8f   : > { %3361 = shalt.err (!%p3358_p12)
}
  0x90   : > { %s3362_s26 = scalar_lea.vmem %s312_s15, 128  ;;  %s3525_s16 = smov [#allocation9]  }
  0x91   : > { %p3363_p5 = scmp.ne.s32.totalorder %s312_s15, %s3362_s26  ;;  %s3367_s29 = sshll.u32 %s3525_s16, 4  ;;  %s3368_s29 = int_to_ptr.vmem [resolvable:$false] %s3367_s29 }
  0x92   : > { %s3369_s28 = scalar_lea.vmem %s3368_s29, 256  ;;  %p3370_p6 = scmp.lt.s32.totalorder %s312_s15, %s3368_s29 }
  0x93   : > { %p3365_p13 = pnand %p3363_p5, %p3665_p8  ;;  %p3371_p1 = scmp.lt.s32.totalorder %s3369_s28, %s3362_s26 }
  0x95   : > { %p3366_p3 = pneg %p3365_p13  ;;  %p3372_p9 = por %p3371_p1, %p3370_p6 }
  0x97   : > { %p3373_p0 = pnand %p3372_p9, %p3366_p3 }
  0x99   : > { %3376 = shalt.err (!%p3373_p0)
}
  0x9a   : > { %p4514_p4 = scmp.ne.s32.totalorder %s4500_s12, 0  ;;  %s2987_s10 = sshll.u32 %s3519_s27, 10 }
  0x9b   : > { %s3828_s20 = scalar_lea.hbm %s4475_s5, %s2987_s10  ;;  %s340_s22 = scalar_lea.vmem [#allocation12], %s2944_s8 }
  0x9c   : > { %3132 = dma.hbm_to_vmem [thread:$0]  (!%p4514_p4), %s3802_s24, 128, %s312_s15, %s3659_s19  }
  0x9d   : > { %s347_s4 = sshll.u32 %s340_s22, 4  ;;  %s3377_s26 = scalar_lea.hbm %s3828_s20, 1024  ;;  %s3832_s4 = int_to_ptr.vmem [resolvable:$true] %s347_s4 }
  0x9e   : > { %p3378_p9 = scmp.ne.s32.totalorder %s3828_s20, %s3377_s26  ;;  %s3382_s15 = scalar_lea.hbm %s4475_s5, 2048 }
  0x9f   : > { %p3383_p7 = scmp.lt.u32.totalorder %s3828_s20, %s4475_s5  ;;  %p3384_p11 = scmp.lt.u32.totalorder %s3382_s15, %s3377_s26 }
  0xa0   : > { %p3380_p2 = pnand %p3378_p9, %p3665_p8  ;;  %p3386_p5 = scmp.lt.u32.totalorder %s3377_s26, %s3828_s20 }
  0xa1   : > { %p3385_p12 = por %p3384_p11, %p3383_p7 }
  0xa2   : > { %p3381_p10 = pneg %p3380_p2 }
  0xa3   : > { %p3387_p13 = por %p3386_p5, %p3385_p12 }
  0xa5   : > { %p3388_p3 = pnand %p3387_p13, %p3381_p10 }
  0xa7   : > { %3391 = shalt.err (!%p3388_p3)
}
  0xa8   : > { %s3392_s8 = scalar_lea.vmem %s3832_s4, 1024  ;;  %s3526_s28 = smov [#allocation12]  }
  0xa9   : > { %p3393_p6 = scmp.ne.s32.totalorder %s3832_s4, %s3392_s8  ;;  %s3397_s10 = sshll.u32 %s3526_s28, 4  ;;  %s3398_s10 = int_to_ptr.vmem [resolvable:$false] %s3397_s10 }
  0xaa   : > { %s3399_s14 = scalar_lea.vmem %s3398_s10, 2048  ;;  %p3400_p9 = scmp.lt.s32.totalorder %s3832_s4, %s3398_s10 }
  0xab   : > { %p3395_p1 = pnand %p3393_p6, %p3665_p8  ;;  %p3401_p2 = scmp.lt.s32.totalorder %s3399_s14, %s3392_s8 }
  0xad   : > { %p3396_p0 = pneg %p3395_p1  ;;  %p3402_p7 = por %p3401_p2, %p3400_p9 }
  0xaf   : > { %p3403_p11 = pnand %p3402_p7, %p3396_p0 }
  0xb1   : > { %3406 = shalt.err (!%p3403_p11)
}
  0xb2   : > { %s3527_s7 = smov 128   ;;  %s3528_s22 = smov 8  }
  0xb3   : > { %3138 = dma.hbm_to_vmem [thread:$0]  (!%p4514_p4), %s3828_s20, 1024, %s3832_s4, %s3698_s17, %s3527_s7, %s3527_s7, %s3528_s22  }
  0xb4   : > { %s3860_s24 = scalar_lea.hbm %s4476_s6, %s3646_s13  ;;  %s361_s15 = scalar_lea.vmem [#allocation13], %s3639_s11 }
  0xb5   : > { %s368_s16 = sshll.u32 %s361_s15, 4  ;;  %s358_s29 = scalar_lea.sflag [#allocation14], %s3635_s9  ;;  %s369_s16 = int_to_ptr.vmem [resolvable:$true] %s368_s16 }
  0xb6   : > { %s3407_s8 = scalar_lea.hbm %s3860_s24, 128  ;;  %s3412_s20 = scalar_lea.hbm %s4476_s6, 256 }
  0xb7   : > { %p3408_p10 = scmp.ne.s32.totalorder %s3860_s24, %s3407_s8  ;;  %p3413_p13 = scmp.lt.u32.totalorder %s3860_s24, %s4476_s6 }
  0xb8   : > { %p3414_p3 = scmp.lt.u32.totalorder %s3412_s20, %s3407_s8  ;;  %p3416_p1 = scmp.lt.u32.totalorder %s3407_s8, %s3860_s24 }
  0xb9   : > { %p3410_p12 = pnand %p3408_p10, %p3665_p8 }
  0xba   : > { %p3415_p6 = por %p3414_p3, %p3413_p13 }
  0xbb   : > { %p3411_p5 = pneg %p3410_p12 }
  0xbc   : > { %p3417_p0 = por %p3416_p1, %p3415_p6 }
  0xbe   : > { %p3418_p9 = pnand %p3417_p0, %p3411_p5 }
  0xc0   : > { %3421 = shalt.err (!%p3418_p9)
}
  0xc1   : > { %s3422_s9 = scalar_lea.vmem %s369_s16, 128  ;;  %s3529_s11 = smov [#allocation13]  }
  0xc2   : > { %p3423_p2 = scmp.ne.s32.totalorder %s369_s16, %s3422_s9  ;;  %s3427_s10 = sshll.u32 %s3529_s11, 4  ;;  %s3428_s10 = int_to_ptr.vmem [resolvable:$false] %s3427_s10 }
  0xc3   : > { %s3429_s14 = scalar_lea.vmem %s3428_s10, 256  ;;  %p3430_p10 = scmp.lt.s32.totalorder %s369_s16, %s3428_s10 }
  0xc4   : > { %p3425_p7 = pnand %p3423_p2, %p3665_p8  ;;  %p3431_p12 = scmp.lt.s32.totalorder %s3429_s14, %s3422_s9 }
  0xc6   : > { %p3426_p11 = pneg %p3425_p7  ;;  %p3432_p4 = por %p3431_p12, %p3430_p10 }
  0xc8   : > { %p3433_p3 = pnand %p3432_p4, %p3426_p11 }
  0xca   : > { %3436 = shalt.err (!%p3433_p3)
}
  0xcb   : > { %p4515_p13 = scmp.ne.s32.totalorder %s4500_s12, 0  ;;  %p4516_p5 = scmp.ne.s32.totalorder %s4510_s23, 0 }
  0xcc   : > { %p4517_p6 = scmp.eq.s32.totalorder (!%p4516_p5), %s3719_s2, 0 }
  0xcd   : > { %3141 = dma.hbm_to_vmem [thread:$0]  (!%p4515_p13), %s3860_s24, 128, %s369_s16, %s358_s29  }
  0xce   : > { %377 = sbr.rel (%p4516_p5) target bundleno = 1928 (0x788), region = 48 }
  0xd5   : > { %3482 = dma.done.wait (%p4517_p6), [#allocation5], 16   ;;  %p4518_p8 = pmov %p4517_p6 }
  0xd6   : > { %s3888_s21 = sand.u32 1, %s3511_s25   ;;  %p4519_p4 = scmp.ne.s32.totalorder %s4505_s18, 0 }
  0xd7   : > { %3484 = vsyncadd (%p4518_p8), [#allocation5], 4294967280  ;;  %s2951_s7 = sshll.u32 %s3888_s21, 4  ;;  %s384_s12 = scalar_lea.sflag [#allocation3], %s3888_s21 }
  0xd8   : > { %s3894_s22 = scalar_lea.vmem [#allocation6], %s2951_s7 }
  0xd9   : > { %3486 = dma.done.wait (%p4519_p4), %s384_s12, 256  }
  0xda   : > { %3488 = vsyncadd (%p4519_p4), %s384_s12, 4294967040  ;;  %s392_s23 = sand.u32 1, %s3719_s2   ;;  %s3902_s26 = sshll.u32 %s3888_s21, 3 }
  0xdb   : > { %s393_s19 = scalar_lea.sflag [#allocation8], %s392_s23  ;;  %s396_s24 = scalar_lea.vmem [#allocation7], %s3902_s26 }
  0xdc   : > { %3490 = dma.done.wait (%p4519_p4), %s393_s19, 256  }
  0xdd   : > { %3492 = vsyncadd (%p4519_p4), %s393_s19, 4294967040  ;;  %s405_s15 = scalar_lea.vmem [#allocation9], %s3902_s26  ;;  %s411_s16 = scalar_lea.sflag [#allocation11], %s392_s23 }
  0xde   : > { %s414_s29 = scalar_lea.vmem [#allocation10], %s3902_s26 }
  0xdf   : > { %3494 = dma.done.wait (%p4519_p4), %s411_s16, 1152  }
  0xe0   : > { %3496 = vsyncadd (%p4519_p4), %s411_s16, 4294966144  ;;  %s2955_s8 = sshll.u32 %s3888_s21, 6  ;;  %s429_s17 = scalar_lea.sflag [#allocation14], %s3888_s21 }
  0xe1   : > { %s3916_s28 = scalar_lea.vmem [#allocation12], %s2955_s8  ;;  %s432_s20 = scalar_lea.vmem [#allocation13], %s3902_s26 }
  0xe2   : > { %3498 = dma.done.wait (%p4519_p4), %s429_s17, 128  }
  0xe3   : > { %3500 = vsyncadd (%p4519_p4), %s429_s17, 4294967168 }
  0xe4   : > { %437 = sfence }
  0xe5   : > { %v3925_v0 = vld [vmem:[%s3894_s22] sm:$0xff]  ;;  %s3530_s4 = smov 64   ;;  %s3928_s13 = sld [smem:[#allocation2]]  ;;  %v3531_v1 = vmov 0.0   ;;  %v3931_v2 = vld [vmem:[%s405_s15] sm:$0xff]  ;;  %vm3532_vm0 = vmmov 0   ;;  %v532_v30 = vlaneseq }
  0xe6   : > { %522 = vrot.lane.b32.xlu0 %v3925_v0, %s3530_s4  ;;  %3021 = vmatprep.subr.mxu0 %v3531_v1  ;;  %v3533_v3 = vmov 0   ;;  %s3534_s18 = smov 16   ;;  %v3942_v4 = vld [vmem:[%s396_s24] sm:$0xff]  ;;  %vm504_vm1 = vcmask 97280   ;;  %v3955_v9 = vmul.f32 %v3931_v2, %v3931_v2  ;;  %v3960_v11 = vld [vmem:[%s3916_s28] sm:$0xff]  ;;  %v3964_v12 = vld [vmem:[%s3916_s28 + $0x8] sm:$0xff] }
  0xe7   : > { %3026 = vmatprep.subr.mxu1 %v3531_v1  ;;  %3023 = vmatprep.mubr.msk.f32.mxu0 %vm3532_vm0, %v3531_v1  ;;  %v3949_v7 = vmul.f32 %v3942_v4, %v3942_v4  ;;  %v3968_v13 = vld [vmem:[%s3916_s28 + $0x10] sm:$0xff]  ;;  %v3972_v14 = vld [vmem:[%s3916_s28 + $0x18] sm:$0xff]  ;;  %v3976_v15 = vld [vmem:[%s3916_s28 + $0x20] sm:$0xff]  ;;  %vm519_vm2 = vcmask 130048   ;;  %vm555_vm3 = vcmask 228352   ;;  %s3535_s9 = smov 48  }
  0xe8   : > { %3212 = vset.pattern.permute.xlu1 %v3533_v3  ;;  %3211 = vset.pattern.permute.xlu0 %v3533_v3  ;;  %v509_v10 = vsel %vm504_vm1, %v3955_v9, 0.0  ;;  %v3980_v16 = vld [vmem:[%s3916_s28 + $0x28] sm:$0xff]  ;;  %v3984_v17 = vld [vmem:[%s3916_s28 + $0x30] sm:$0xff]  ;;  %v3988_v18 = vld [vmem:[%s3916_s28 + $0x38] sm:$0xff]  ;;  %v3994_v22 = vmul.f32 0.14433756, %v3925_v0 }
  0xe9   : > { %3028 = vmatprep.mubr.msk.f32.mxu1 %vm3532_vm0, %v3531_v1  ;;  %v505_v8 = vsel %vm504_vm1, %v3949_v7, 0.0  ;;  %s3536_s11 = smov 4   ;;  %s4006_s10 = sld [smem:[#allocation2 + $0x1]]  ;;  %v533_v33 = vand.u32 127, %v532_v30  ;;  %v4011_v34 = vshrl.u32 %v532_v30, 7  ;;  %vm538_vm4 = vcmask 1041409  }
  0xea   : > { %526 = vrot.lane.b32.xlu0 %v3931_v2, %s3534_s18  ;;  %vm539_vm5 = vcmask 1042434   ;;  %vm541_vm6 = vcmask 1043459   ;;  %vm543_vm7 = vcmask 1044484   ;;  %vm545_vm8 = vcmask 1045509   ;;  %v4035_v63 = vld [vmem:[%s432_s20] sm:$0xff]  ;;  %s3537_s12 = smov 32  }
  0xeb   : > { %v513_v5 = vstv %s3928_s13  ;;  %v4014_v35 = vsub.s32 %v533_v33, %v4011_v34  ;;  %s530_s14 = smul.f32 -0.5, %s3928_s13  ;;  %vm547_vm9 = vcmask 1046534   ;;  %vm549_vm10 = vcmask 1047559   ;;  %s3538_s23 = smov 112  }
  0xec   : > { %v514_v6 = vmul.f32 %v513_v5, %v3942_v4  ;;  %vm706_vm11 = vcmask 64512   ;;  %s4049_s19 = sld [smem:[#allocation2 + $0x2]]  ;;  %s3539_s24 = smov 120   ;;  %vm1962_vm12 = vcmask 1040384   ;;  %vm1971_vm13 = vcmask 1041408  }
  0xed   : > { %v553_v55 = vstv %s530_s14  ;;  %s3540_s26 = smov 108   ;;  %s4057_s15 = sld [smem:[#allocation2 + $0x3]]  ;;  %vm1980_vm14 = vcmask 1042432   ;;  %vm2677_vm15 = vcmask 31744  }
  0xee   : > { %516 = vrot.lane.b32.xlu1 %v514_v6, %s3534_s18  ;;  %s3541_s16 = smov 116   ;;  %s3543_s8 = smov 96  }
  0xef   : > { %v814_v25 = vstv %s4006_s10  ;;  %s3544_s28 = smov 80   ;;  %s3545_s17 = smov 104  }
  0xf0   : > { %v815_v26 = vmul.f32 %v814_v25, %v3942_v4  ;;  %s3549_s13 = smov 72   ;;  %s3554_s14 = smov 8  }
  0xf1   : > { %p4522_p0 = scmp.ne.s32.totalorder %s4507_s30, 0 }
  0xf2   : > { %s1109_s20 = smul.f32 -0.5, %s4049_s19 }
  0xf3   : > { %s1389_s4 = smul.f32 -0.5, %s4057_s15 }
 0x109   : > { %506 = vadd.xlane.f32.xlu0 %v505_v8  ;;  %v4041_v8 = vld [vmem:[%s414_s29] sm:$0xff]  ;;  %s3542_s29 = smov 92  }
 0x112   : > { %510 = vadd.xlane.f32.xlu1 %v509_v10  ;;  %v1095_v10 = vstv %s4049_s19 }
 0x11f   : > { %641 = vperm.xlu0 %3211, %v3960_v11  }
 0x123   : > { %644 = vperm.xlu1 %3212, %v3964_v12   ;;  %718 = vrot.lane.b32.xlu0 %v3925_v0, %s3535_s9 }
 0x127   : > { %647 = vperm.xlu1 %3212, %v3968_v13   ;;  %828 = vrot.lane.b32.xlu0 %v3931_v2, %s3536_s11 }
 0x12b   : > { %650 = vperm.xlu1 %3212, %v3972_v14   ;;  %821 = vrot.lane.b32.xlu0 %v815_v26, %s3536_s11 }
 0x12f   : > { %653 = vperm.xlu1 %3212, %v3976_v15  }
 0x133   : > { %656 = vperm.xlu1 %3212, %v3980_v16  }
 0x137   : > { %659 = vperm.xlu1 %3212, %v3984_v17  }
 0x13b   : > { %662 = vperm.xlu1 %3212, %v3988_v18  }
 0x158   : > { %v523_v19 = vpop.permute.xlu0 %522 }
 0x15c   : > { %v527_v20 = vpop.permute.xlu0 %526 }
 0x15d   : > { %v529_v21 = vsel %vm519_vm2, %v523_v19, %v527_v20  ;;  %v1096_v19 = vmul.f32 %v1095_v10, %v3942_v4  ;;  %v1372_v20 = vstv %s4057_s15 }
 0x15e   : > { %3022 = vmatpush3.xpose.msk.msra.mxu0 %vm555_vm3, %v529_v21  ;;  %v1373_v21 = vmul.f32 %v1372_v20, %v3942_v4 }
 0x15f   : > { %3036 = vmatprep.subr.mxu0 %v3531_v1 }
 0x160   : > { %v517_v23 = vpop.permute.xlu1 %516 }
 0x161   : > { %v520_v24 = vsel %vm519_vm2, %v3994_v22, %v517_v23 }
 0x162   : > { %3024 = vmatmul.mubr.msk.f32.vlgmr.msra.gmra.mrb[0].mxu0 %vm555_vm3, %v520_v24 }
 0x163   : > { %3038 = vmatprep.mubr.msk.f32.mxu0 %vm3532_vm0, %v3531_v1 }
 0x196   : > { %v507_v32 = vpop.xlane.xlu0 %506 }
 0x19e   : > { %v642_v37 = vpop.permute.xlu0 %641 }
 0x19f   : > { %v511_v27 = vpop.xlane.xlu1 %510  ;;  %v667_v39 = vrot.slane %v642_v37, %v4014_v35 }
 0x1a0   : > { %v537_v48 = vrot.slane %v511_v27, %v4014_v35 }
 0x1a2   : > { %v552_v51 = vadd.f32 %v537_v48, %v507_v32  ;;  %v719_v25 = vpop.permute.xlu0 %718 }
 0x1a3   : > { %v645_v28 = vpop.permute.xlu1 %644 }
 0x1a4   : > { %v671_v38 = vrot.slane %v645_v28, %v4014_v35  ;;  %v554_v58 = vmul.f32 %v553_v55, %v552_v51 }
 0x1a6   : > { %v696_v42 = vsel %vm538_vm4, %v671_v38, %v667_v39 }
 0x1a7   : > { %v648_v29 = vpop.permute.xlu1 %647 }
 0x1a8   : > { %v675_v40 = vrot.slane %v648_v29, %v4014_v35 }
 0x1aa   : > { %v697_v44 = vsel %vm539_vm5, %v675_v40, %v696_v42  ;;  %v3546_v40 = vmov 1  }
 0x1ab   : > { %v651_v31 = vpop.permute.xlu1 %650  ;;  %3213 = vset.pattern.permute.xlu1 %v3546_v40  ;;  %3214 = vset.pattern.permute.xlu0 %v3546_v40 }
 0x1ac   : > { %v679_v43 = vrot.slane %v651_v31, %v4014_v35 }
 0x1ae   : > { %v698_v47 = vsel %vm541_vm6, %v679_v43, %v697_v44 }
 0x1af   : > { %v654_v36 = vpop.permute.xlu1 %653 }
 0x1b0   : > { %v683_v45 = vrot.slane %v654_v36, %v4014_v35  ;;  %v4071_v36 = vld [vmem:[%s3894_s22 + $0x8] sm:$0xff]  ;;  %s832_s22 = smul.f32 -0.5, %s4006_s10  ;;  %s3550_s10 = smov 124  }
 0x1b2   : > { %v699_v50 = vsel %vm543_vm7, %v683_v45, %v698_v47 }
 0x1b3   : > { %v657_v41 = vpop.permute.xlu1 %656 }
 0x1b4   : > { %v687_v49 = vrot.slane %v657_v41, %v4014_v35  ;;  %v829_v41 = vpop.permute.xlu0 %828 }
 0x1b6   : > { %v700_v54 = vsel %vm545_vm8, %v687_v49, %v699_v50 }
 0x1b7   : > { %v660_v46 = vpop.permute.xlu1 %659 }
 0x1b8   : > { %v691_v52 = vrot.slane %v660_v46, %v4014_v35  ;;  %v822_v42 = vpop.permute.xlu0 %821 }
 0x1ba   : > { %v701_v57 = vsel %vm547_vm9, %v691_v52, %v700_v54 }
 0x1bb   : > { %v663_v53 = vpop.permute.xlu1 %662 }
 0x1bc   : > { %v695_v56 = vrot.slane %v663_v53, %v4014_v35 }
 0x1be   : > { %v702_v62 = vsel %vm549_vm10, %v695_v56, %v701_v57 }
 0x235   : > { %v628_v59 = vpop.f32.mrb[0].mxu0 }
 0x236   : > { %v629_v60 = vadd.f32 %v628_v59, %v554_v58  ;;  %v3025_v61 = vpop.f32.mrb[1].mxu0 }
 0x238   : > { %v704_v3 = vadd.f32 %v702_v62, %v629_v60  ;;  %v3547_v62 = vmov 2  }
 0x23a   : > { %v705_v5 = vadd.f32 %v704_v3, %v4035_v63  ;;  %v3548_v3 = vmov 3  }
 0x23c   : > { %v707_v6 = vsel %vm706_vm11, %v705_v5, -inf }
 0x23d   : > { %708 = vmax.xlane.f32.xlu1 %v707_v6 }
 0x24e   : > { %722 = vrot.lane.b32.xlu1 %v4041_v8, %s3534_s18 }
 0x252   : > { %825 = vrot.lane.b32.xlu1 %v3925_v0, %s3537_s12 }
 0x256   : > { %817 = vrot.lane.b32.xlu1 %v3994_v22, %s3538_s23 }
 0x25a   : > { %1105 = vrot.lane.b32.xlu1 %v3931_v2, %s3539_s24 }
 0x25e   : > { %1101 = vrot.lane.b32.xlu1 %v1096_v19, %s3539_s24 }
 0x262   : > { %1385 = vrot.lane.b32.xlu1 %v3931_v2, %s3540_s26 }
 0x266   : > { %1378 = vrot.lane.b32.xlu1 %v1373_v21, %s3540_s26 }
 0x26a   : > { %801 = vrot.lane.b32.xlu1 %v3949_v7, %s3541_s16 }
 0x26e   : > { %1366 = vrot.lane.b32.xlu1 %v3955_v9, %s3542_s29 }
 0x272   : > { %1360 = vrot.lane.b32.xlu1 %v3949_v7, %s3542_s29 }
 0x2ca   : > { %v709_v23 = vpop.xlane.xlu1 %708 }
 0x2cb   : > { %v710_v24 = vsub.f32 %v705_v5, %v709_v23 }
 0x2cd   : > { %v711_v2 = vmul.f32 1.442695, %v710_v24 }
 0x2ce   : > { %v723_v26 = vpop.permute.xlu1 %722 }
 0x2cf   : > { %3228 = vpow2.f32 %v711_v2  ;;  %v725_v27 = vsel %vm519_vm2, %v719_v25, %v723_v26 }
 0x2d0   : > { %3027 = vmatpush3.msra.mxu1 %v725_v27 }
 0x2d1   : > { %3031 = vmatprep.subr.mxu1 %v3531_v1 }
 0x2d2   : > { %v826_v29 = vpop.permute.xlu1 %825 }
 0x2d3   : > { %v831_v48 = vsel %vm519_vm2, %v826_v29, %v829_v41 }
 0x2d6   : > { %v818_v30 = vpop.permute.xlu1 %817 }
 0x2d9   : > { %v3229_v4 = vpop.eup %3228 }
 0x2da   : > { %v713_v28 = vsel %vm706_vm11, %v3229_v4, 0.0  ;;  %v1106_v31 = vpop.permute.xlu1 %1105 }
 0x2db   : > { %714 = vadd.xlane.f32.xlu0 %v713_v28  ;;  %v1108_v50 = vsel %vm519_vm2, %v4071_v36, %v1106_v31 }
 0x2de   : > { %v1102_v32 = vpop.permute.xlu1 %1101 }
 0x2e2   : > { %v1386_v33 = vpop.permute.xlu1 %1385 }
 0x2e6   : > { %v1379_v37 = vpop.permute.xlu1 %1378 }
 0x2ea   : > { %v802_v38 = vpop.permute.xlu1 %801 }
 0x2eb   : > { %v804_v39 = vsel %vm504_vm1, %v802_v38, 0.0 }
 0x2ec   : > { %805 = vadd.xlane.f32.xlu1 %v804_v39 }
 0x2ee   : > { %v1367_v51 = vpop.permute.xlu1 %1366 }
 0x2ef   : > { %v1369_v57 = vsel %vm504_vm1, %v1367_v51, 0.0 }
 0x2f1   : > { %1097 = vrot.lane.b32.xlu0 %v3994_v22, %s3543_s8 }
 0x2f2   : > { %v1361_v60 = vpop.permute.xlu1 %1360 }
 0x2f3   : > { %v1363_v61 = vsel %vm504_vm1, %v1361_v60, 0.0 }
 0x2f5   : > { %1382 = vrot.lane.b32.xlu0 %v4071_v36, %s3543_s8 }
 0x2f9   : > { %1374 = vrot.lane.b32.xlu0 %v3994_v22, %s3544_s28 }
 0x2fd   : > { %808 = vrot.lane.b32.xlu0 %v3955_v9, %s3541_s16  ;;  %s3556_s16 = smov [#allocation15]  }
 0x2fe   : > { %s3441_s29 = sshll.u32 %s3556_s16, 4  ;;  %s3442_s29 = int_to_ptr.vmem [resolvable:$false] %s3441_s29 }
 0x301   : > { %1089 = vrot.lane.b32.xlu0 %v3955_v9, %s3545_s17  ;;  %v824_v9 = vsel %vm519_vm2, %v818_v30, %v822_v42 }
 0x305   : > { %1083 = vrot.lane.b32.xlu0 %v3949_v7, %s3545_s17 }
 0x368   : > { %v715_v22 = vpop.xlane.xlu0 %714 }
 0x369   : > { %3230 = vrcp.f32 %v715_v22 }
 0x36c   : > { %v1098_v43 = vpop.permute.xlu0 %1097 }
 0x36d   : > { %v1104_v53 = vsel %vm519_vm2, %v1098_v43, %v1102_v32 }
 0x370   : > { %v1383_v44 = vpop.permute.xlu0 %1382 }
 0x371   : > { %v1388_v55 = vsel %vm519_vm2, %v1383_v44, %v1386_v33 }
 0x373   : > { %v3231_v45 = vpop.eup %3230 }
 0x374   : > { %v1375_v46 = vpop.permute.xlu0 %1374  ;;  %v4084_v47 = vmul.f32 %v3231_v45, %v3229_v4 }
 0x375   : > { %v1381_v58 = vsel %vm519_vm2, %v1375_v46, %v1379_v37 }
 0x376   : > { %3029 = vmatmul.mubr.msk.f32.vlgmr.msra.gmra.mrb[0].mxu1 %vm706_vm11, %v4084_v47 }
 0x377   : > { %3032 = vmatpush3.xpose.msk.msra.mxu1 %vm555_vm3, %v831_v48  ;;  %3033 = vmatprep.mubr.msk.f32.mxu1 %vm3532_vm0, %v3531_v1 }
 0x378   : > { %v809_v7 = vpop.permute.xlu0 %808  ;;  %3041 = vmatprep.subr.mxu1 %v3531_v1 }
 0x379   : > { %v811_v49 = vsel %vm504_vm1, %v809_v7, 0.0  ;;  %v806_v5 = vpop.xlane.xlu1 %805 }
 0x37a   : > { %812 = vadd.xlane.f32.xlu0 %v811_v49  ;;  %3034 = vmatmul.mubr.msk.f32.vlgmr.msra.gmra.mrb[2].mxu1 %vm555_vm3, %v824_v9 }
 0x37b   : > { %3042 = vmatpush3.xpose.msk.msra.mxu1 %vm555_vm3, %v1108_v50  ;;  %3043 = vmatprep.mubr.msk.f32.mxu1 %vm3532_vm0, %v3531_v1 }
 0x37c   : > { %v1090_v52 = vpop.permute.xlu0 %1089  ;;  %3051 = vmatprep.subr.mxu1 %v3531_v1 }
 0x37d   : > { %v1092_v54 = vsel %vm504_vm1, %v1090_v52, 0.0 }
 0x37e   : > { %1093 = vadd.xlane.f32.xlu0 %v1092_v54  ;;  %3044 = vmatmul.mubr.msk.f32.vlgmr.msra.gmra.mrb[4].mxu1 %vm555_vm3, %v1104_v53 }
 0x37f   : > { %3052 = vmatpush3.xpose.msk.msra.mxu1 %vm555_vm3, %v1388_v55  ;;  %3053 = vmatprep.mubr.msk.f32.mxu1 %vm3532_vm0, %v3531_v1 }
 0x380   : > { %v1084_v56 = vpop.permute.xlu0 %1083  ;;  %3061 = vmatprep.subr.mxu1 %v3531_v1 }
 0x381   : > { %v1086_v59 = vsel %vm504_vm1, %v1084_v56, 0.0 }
 0x382   : > { %3054 = vmatmul.mubr.msk.f32.vlgmr.msra.gmra.mrb[6].mxu1 %vm555_vm3, %v1381_v58  ;;  %1087 = vadd.xlane.f32.xlu1 %v1086_v59  ;;  %vm2713_vm3 = vcmask 392192  }
 0x383   : > { %1370 = vadd.xlane.f32.xlu0 %v1369_v57  ;;  %3063 = vmatprep.mubr.msk.f32.mxu1 %vm3532_vm0, %v3531_v1 }
 0x387   : > { %1364 = vadd.xlane.f32.xlu0 %v1363_v61 }
 0x393   : > { %925 = vperm.xlu1 %3213, %v3960_v11  }
 0x397   : > { %931 = vperm.xlu1 %3213, %v3968_v13  }
 0x39b   : > { %934 = vperm.xlu1 %3213, %v3972_v14  }
 0x39d   : > { %928 = vperm.xlu0 %3214, %v3964_v12  }
 0x39f   : > { %3215 = vset.pattern.permute.xlu1 %v3547_v62 }
 0x3a0   : > { %1202 = vperm.xlu1 %3215, %v3960_v11  }
 0x3a1   : > { %3219 = vset.pattern.permute.xlu0 %v3548_v3 }
 0x3a2   : > { %1485 = vperm.xlu0 %3219, %v3964_v12  }
 0x3a4   : > { %1205 = vperm.xlu1 %3215, %v3964_v12  }
 0x3a6   : > { %1488 = vperm.xlu0 %3219, %v3968_v13  }
 0x3a8   : > { %3216 = vset.pattern.permute.xlu1 %v3546_v40 }
 0x3a9   : > { %937 = vperm.xlu1 %3216, %v3976_v15  }
 0x3aa   : > { %3223 = vset.pattern.permute.xlu0 %v3547_v62 }
 0x3ab   : > { %1214 = vperm.xlu0 %3223, %v3976_v15  }
 0x3ad   : > { %3217 = vset.pattern.permute.xlu1 %v3547_v62 }
 0x3ae   : > { %1208 = vperm.xlu1 %3217, %v3968_v13  }
 0x3af   : > { %1217 = vperm.xlu0 %3223, %v3980_v16  }
 0x3b2   : > { %3218 = vset.pattern.permute.xlu1 %v3548_v3 }
 0x3b3   : > { %1482 = vperm.xlu1 %3218, %v3960_v11   ;;  %1220 = vperm.xlu0 %3223, %v3984_v17  }
 0x3b7   : > { %3220 = vset.pattern.permute.xlu1 %v3546_v40  ;;  %1223 = vperm.xlu0 %3223, %v3988_v18  }
 0x3b8   : > { %940 = vperm.xlu1 %3220, %v3980_v16  }
 0x3bb   : > { %3227 = vset.pattern.permute.xlu0 %v3548_v3 }
 0x3bc   : > { %3221 = vset.pattern.permute.xlu1 %v3547_v62  ;;  %1503 = vperm.xlu0 %3227, %v3988_v18   ;;  %v846_v62 = vstv %s832_s22 }
 0x3bd   : > { %1211 = vperm.xlu1 %3221, %v3972_v14  }
 0x3c1   : > { %3222 = vset.pattern.permute.xlu1 %v3546_v40 }
 0x3c2   : > { %943 = vperm.xlu1 %3222, %v3984_v17  }
 0x3c6   : > { %3224 = vset.pattern.permute.xlu1 %v3548_v3 }
 0x3c7   : > { %1491 = vperm.xlu1 %3224, %v3972_v14  }
 0x3cb   : > { %3225 = vset.pattern.permute.xlu1 %v3546_v40 }
 0x3cc   : > { %946 = vperm.xlu1 %3225, %v3988_v18  }
 0x3d0   : > { %3226 = vset.pattern.permute.xlu1 %v3548_v3 }
 0x3d1   : > { %1494 = vperm.xlu1 %3226, %v3976_v15  }
 0x3d5   : > { %1497 = vperm.xlu1 %3226, %v3980_v16  }
 0x3d9   : > { %1500 = vperm.xlu1 %3226, %v3984_v17  }
 0x407   : > { %v813_v19 = vpop.xlane.xlu0 %812 }
 0x408   : > { %v837_v45 = vrot.slane %v813_v19, %v4014_v35 }
 0x40a   : > { %v845_v55 = vadd.f32 %v837_v45, %v806_v5 }
 0x40b   : > { %v1094_v21 = vpop.xlane.xlu0 %1093 }
 0x40c   : > { %v1114_v58 = vrot.slane %v1094_v21, %v4014_v35 }
 0x40f   : > { %v1088_v6 = vpop.xlane.xlu1 %1087 }
 0x410   : > { %v4145_v24 = vpop.xlane.xlu0 %1370 }
 0x413   : > { %v926_v10 = vpop.permute.xlu1 %925 }
 0x414   : > { %v4147_v26 = vpop.xlane.xlu0 %1364  ;;  %v951_v42 = vrot.slane %v926_v10, %v4014_v35 }
 0x417   : > { %v932_v20 = vpop.permute.xlu1 %931 }
 0x418   : > { %v959_v48 = vrot.slane %v932_v20, %v4014_v35  ;;  %v1122_v20 = vadd.f32 %v1114_v58, %v1088_v6 }
 0x41b   : > { %v935_v23 = vpop.permute.xlu1 %934 }
 0x41c   : > { %v929_v4 = vpop.permute.xlu0 %928  ;;  %v963_v56 = vrot.slane %v935_v23, %v4014_v35 }
 0x41d   : > { %v955_v38 = vrot.slane %v929_v4, %v4014_v35 }
 0x41f   : > { %v1203_v25 = vpop.permute.xlu1 %1202  ;;  %v980_v46 = vsel %vm538_vm4, %v955_v38, %v951_v42 }
 0x420   : > { %v1228_v43 = vrot.slane %v1203_v25, %v4014_v35  ;;  %v981_v52 = vsel %vm539_vm5, %v959_v48, %v980_v46  ;;  %v1123_v25 = vstv %s1109_s20  ;;  %v1394_v46 = vrot.slane %v4145_v24, %v4014_v35 }
 0x421   : > { %v4149_v29 = vpop.permute.xlu0 %1485  ;;  %v982_v3 = vsel %vm541_vm6, %v963_v56, %v981_v52 }
 0x422   : > { %v1512_v42 = vrot.slane %v4149_v29, %v4014_v35 }
 0x423   : > { %v1206_v2 = vpop.permute.xlu1 %1205 }
 0x424   : > { %v1232_v40 = vrot.slane %v1206_v2, %v4014_v35 }
 0x425   : > { %v4153_v31 = vpop.permute.xlu0 %1488 }
 0x426   : > { %v1257_v7 = vsel %vm538_vm4, %v1232_v40, %v1228_v43 }
 0x428   : > { %v938_v27 = vpop.permute.xlu1 %937 }
 0x429   : > { %v967_v53 = vrot.slane %v938_v27, %v4014_v35 }
 0x42a   : > { %v1215_v33 = vpop.permute.xlu0 %1214 }
 0x42b   : > { %v1244_v49 = vrot.slane %v1215_v33, %v4014_v35  ;;  %v983_v5 = vsel %vm543_vm7, %v967_v53, %v982_v3 }
 0x42d   : > { %v1209_v28 = vpop.permute.xlu1 %1208 }
 0x42e   : > { %v1218_v39 = vpop.permute.xlu0 %1217  ;;  %v1236_v22 = vrot.slane %v1209_v28, %v4014_v35  ;;  %v847_v28 = vmul.f32 %v846_v62, %v845_v55  ;;  %v1402_v55 = vadd.f32 %v1394_v46, %v4147_v26 }
 0x42f   : > { %v1248_v59 = vrot.slane %v1218_v39, %v4014_v35 }
 0x430   : > { %v1258_v9 = vsel %vm539_vm5, %v1236_v22, %v1257_v7 }
 0x432   : > { %v4151_v30 = vpop.permute.xlu1 %1482  ;;  %v1221_v50 = vpop.permute.xlu0 %1220 }
 0x433   : > { %v1252_v21 = vrot.slane %v1221_v50, %v4014_v35  ;;  %v1508_v22 = vrot.slane %v4151_v30, %v4014_v35  ;;  %v1516_v50 = vrot.slane %v4153_v31, %v4014_v35 }
 0x435   : > { %v1537_v30 = vsel %vm538_vm4, %v1512_v42, %v1508_v22  ;;  %vm2715_vm4 = vcmask 523264  }
 0x436   : > { %v1224_v27 = vpop.permute.xlu0 %1223  ;;  %v1538_v3 = vsel %vm539_vm5, %v1516_v50, %v1537_v30  ;;  %vm2719_vm5 = vcmask 916480  }
 0x437   : > { %v941_v32 = vpop.permute.xlu1 %940  ;;  %v1256_v40 = vrot.slane %v1224_v27, %v4014_v35 }
 0x438   : > { %v971_v57 = vrot.slane %v941_v32, %v4014_v35 }
 0x43a   : > { %v984_v2 = vsel %vm545_vm8, %v971_v57, %v983_v5 }
 0x43b   : > { %v1504_v58 = vpop.permute.xlu0 %1503 }
 0x43c   : > { %v1212_v37 = vpop.permute.xlu1 %1211 }
 0x43d   : > { %v1240_v44 = vrot.slane %v1212_v37, %v4014_v35 }
 0x43f   : > { %v1259_v54 = vsel %vm541_vm6, %v1240_v44, %v1258_v9 }
 0x440   : > { %v1260_v10 = vsel %vm543_vm7, %v1244_v49, %v1259_v54 }
 0x441   : > { %v944_v41 = vpop.permute.xlu1 %943  ;;  %v1261_v37 = vsel %vm545_vm8, %v1248_v59, %v1260_v10  ;;  %v1403_v59 = vstv %s1389_s4 }
 0x442   : > { %v975_v60 = vrot.slane %v944_v41, %v4014_v35  ;;  %v1124_v41 = vmul.f32 %v1123_v25, %v1122_v20  ;;  %v1262_v45 = vsel %vm547_vm9, %v1252_v21, %v1261_v37  ;;  %v1404_v5 = vmul.f32 %v1403_v59, %v1402_v55 }
 0x443   : > { %v1263_v29 = vsel %vm549_vm10, %v1256_v40, %v1262_v45  ;;  %v4269_v59 = vsub.s32 0, %v4011_v34 }
 0x444   : > { %v985_v32 = vsel %vm547_vm9, %v975_v60, %v984_v2 }
 0x446   : > { %v4168_v51 = vpop.permute.xlu1 %1491 }
 0x447   : > { %v1520_v52 = vrot.slane %v4168_v51, %v4014_v35 }
 0x449   : > { %v4179_v61 = vpop.f32.mrb[0].mxu1  ;;  %v1539_v51 = vsel %vm541_vm6, %v1520_v52, %v1538_v3 }
 0x44a   : > { %v3030_v19 = vpop.f32.mrb[1].mxu1 }
 0x44b   : > { %v947_v23 = vpop.permute.xlu1 %946  ;;  %v1536_v19 = vrot.slane %v1504_v58, %v4014_v35 }
 0x44c   : > { %v979_v4 = vrot.slane %v947_v23, %v4014_v35 }
 0x44d   : > { %v920_v33 = vpop.f32.mrb[2].mxu1 }
 0x44e   : > { %v921_v38 = vadd.f32 %v920_v33, %v847_v28  ;;  %v986_v6 = vsel %vm549_vm10, %v979_v4, %v985_v32  ;;  %v3035_v39 = vpop.f32.mrb[3].mxu1 }
 0x450   : > { %v988_v43 = vadd.f32 %v986_v6, %v921_v38  ;;  %v1495_v44 = vpop.permute.xlu1 %1494 }
 0x451   : > { %v1197_v48 = vpop.f32.mrb[4].mxu1  ;;  %v1524_v56 = vrot.slane %v1495_v44, %v4014_v35 }
 0x452   : > { %v1198_v7 = vadd.f32 %v1197_v48, %v1124_v41  ;;  %v3045_v9 = vpop.f32.mrb[5].mxu1  ;;  %v989_v49 = vadd.f32 %v988_v43, %v4035_v63 }
 0x453   : > { %v1540_v20 = vsel %vm543_vm7, %v1524_v56, %v1539_v51  ;;  %v3551_v9 = vmov 1966171168  }
 0x454   : > { %v1265_v53 = vadd.f32 %v1263_v29, %v1198_v7  ;;  %v1498_v54 = vpop.permute.xlu1 %1497  ;;  %v990_v24 = vsel %vm706_vm11, %v989_v49, -inf }
 0x455   : > { %v1477_v57 = vpop.f32.mrb[6].mxu1  ;;  %991 = vmax.xlane.f32.xlu1 %v990_v24  ;;  %v1528_v31 = vrot.slane %v1498_v54, %v4014_v35 }
 0x456   : > { %v3055_v60 = vpop.f32.mrb[7].mxu1  ;;  %v1266_v62 = vadd.f32 %v1265_v53, %v4035_v63  ;;  %v1478_v2 = vadd.f32 %v1477_v57, %v1404_v5 }
 0x457   : > { %v1541_v25 = vsel %vm545_vm8, %v1528_v31, %v1540_v20 }
 0x458   : > { %v1501_v10 = vpop.permute.xlu1 %1500  ;;  %v1267_v26 = vsel %vm706_vm11, %v1266_v62, -inf }
 0x459   : > { %v1532_v23 = vrot.slane %v1501_v10, %v4014_v35  ;;  %1268 = vmax.xlane.f32.xlu0 %v1267_v26 }
 0x45b   : > { %v1542_v21 = vsel %vm547_vm9, %v1532_v23, %v1541_v25 }
 0x45c   : > { %v1543_v27 = vsel %vm549_vm10, %v1536_v19, %v1542_v21 }
 0x45d   : > { %v1545_v4 = vadd.f32 %v1543_v27, %v1478_v2 }
 0x45f   : > { %v1546_v28 = vadd.f32 %v1545_v4, %v4035_v63 }
 0x461   : > { %v1547_v32 = vsel %vm706_vm11, %v1546_v28, -inf }
 0x462   : > { %1548 = vmax.xlane.f32.xlu1 %v1547_v32 }
 0x46f   : > { %1004 = vrot.lane.b32.xlu0 %v4041_v8, %s3539_s24 }
 0x473   : > { %1001 = vrot.lane.b32.xlu1 %v3925_v0, %s3534_s18 }
 0x477   : > { %1279 = vrot.lane.b32.xlu1 %v4071_v36, %s3538_s23  ;;  %s3555_s23 = smov 12  }
 0x47b   : > { %1282 = vrot.lane.b32.xlu1 %v4041_v8, %s3543_s8 }
 0x4e2   : > { %v992_v35 = vpop.xlane.xlu1 %991 }
 0x4e3   : > { %v993_v33 = vsub.f32 %v989_v49, %v992_v35 }
 0x4e5   : > { %v994_v37 = vmul.f32 1.442695, %v993_v33 }
 0x4e6   : > { %v1269_v38 = vpop.xlane.xlu0 %1268 }
 0x4e7   : > { %3232 = vpow2.f32 %v994_v37  ;;  %v1270_v63 = vsub.f32 %v1266_v62, %v1269_v38 }
 0x4e9   : > { %v1271_v6 = vmul.f32 1.442695, %v1270_v63 }
 0x4ea   : > { %v1005_v42 = vpop.permute.xlu0 %1004 }
 0x4eb   : > { %3234 = vpow2.f32 %v1271_v6 }
 0x4ef   : > { %v1549_v39 = vpop.xlane.xlu1 %1548 }
 0x4f0   : > { %v1550_v40 = vsub.f32 %v1546_v28, %v1549_v39 }
 0x4f1   : > { %v3233_v41 = vpop.eup %3232 }
 0x4f2   : > { %v1551_v22 = vmul.f32 1.442695, %v1550_v40  ;;  %v996_v0 = vsel %vm706_vm11, %v3233_v41, 0.0 }
 0x4f3   : > { %997 = vadd.xlane.f32.xlu0 %v996_v0  ;;  %v1002_v43 = vpop.permute.xlu1 %1001 }
 0x4f4   : > { %3236 = vpow2.f32 %v1551_v22  ;;  %v1007_v44 = vsel %vm519_vm2, %v1002_v43, %v1005_v42 }
 0x4f5   : > { %v3235_v45 = vpop.eup %3234  ;;  %3037 = vmatpush3.msra.mxu0 %v1007_v44 }
 0x4f6   : > { %v1273_v46 = vsel %vm706_vm11, %v3235_v45, 0.0  ;;  %3046 = vmatprep.subr.mxu0 %v3531_v1 }
 0x4f7   : > { %1274 = vadd.xlane.f32.xlu1 %v1273_v46 }
 0x4fe   : > { %v4234_v48 = vpop.eup %3236 }
 0x4ff   : > { %v1553_v7 = vsel %vm706_vm11, %v4234_v48, 0.0 }
 0x500   : > { %1554 = vadd.xlane.f32.xlu0 %v1553_v7 }
 0x508   : > { %1561 = vrot.lane.b32.xlu1 %v4041_v8, %s3549_s13  ;;  %v1280_v8 = vpop.permute.xlu1 %1279 }
 0x50c   : > { %2065 = vrot.lane.b32.xlu1 %v3964_v12, %s3550_s10  ;;  %v1640_v12 = vunpack.c.l.s4 %v3551_v9  ;;  %v1283_v49 = vpop.permute.xlu1 %1282 }
 0x50d   : > { %v1285_v29 = vsel %vm519_vm2, %v1280_v8, %v1283_v49 }
 0x510   : > { %2217 = vrot.lane.b32.xlu1 %v3972_v14, %s3550_s10 }
 0x514   : > { %2369 = vrot.lane.b32.xlu1 %v3980_v16, %s3550_s10  ;;  %v1641_v16 = vunpack.c.0.s8 %v1640_v12 }
 0x516   : > { %1558 = vrot.lane.b32.xlu0 %v4071_v36, %s3544_s28  ;;  %v4251_v36 = vsub.s32 %v1641_v16, %v4011_v34 }
 0x518   : > { %2521 = vrot.lane.b32.xlu1 %v3988_v18, %s3550_s10 }
 0x51a   : > { %1989 = vrot.lane.b32.xlu0 %v3960_v11, %s3550_s10  ;;  %v1638_v11 = vcombine.high %v4084_v47, %v4084_v47 }
 0x51c   : > { %v1652_v54 = vrot.slane %v1638_v11, %v4251_v36 }
 0x51e   : > { %2141 = vrot.lane.b32.xlu0 %v3968_v13, %s3550_s10  ;;  %v1645_v13 = vrot.slane %v4084_v47, %v4251_v36  ;;  %v1654_v10 = vcombine.high %v1652_v54, %v1652_v54  ;;  %v4281_v23 = vrot.slane %v1652_v54, %v4251_v36 }
 0x520   : > { %v1653_v24 = vcombine.high %v1645_v13, %v1645_v13  ;;  %v1661_v60 = vrot.slane %v1645_v13, %v4251_v36  ;;  %v4297_v40 = vrot.slane %v1654_v10, %v4251_v36 }
 0x522   : > { %2293 = vrot.lane.b32.xlu0 %v3976_v15, %s3550_s10  ;;  %v1675_v20 = vrot.slane %v1653_v24, %v4251_v36  ;;  %v1683_v33 = vcombine.high %v1661_v60, %v1661_v60 }
 0x524   : > { %v1685_v6 = vcombine.high %v1675_v20, %v1675_v20 }
 0x526   : > { %2445 = vrot.lane.b32.xlu0 %v3984_v17, %s3550_s10 }
 0x580   : > { %v998_v14 = vpop.xlane.xlu0 %997 }
 0x581   : > { %3238 = vrcp.f32 %v998_v14 }
 0x584   : > { %v1275_v50 = vpop.xlane.xlu1 %1274 }
 0x585   : > { %3240 = vrcp.f32 %v1275_v50 }
 0x588   : > { %v1562_v55 = vpop.permute.xlu1 %1561 }
 0x58b   : > { %v3239_v18 = vpop.eup %3238 }
 0x58c   : > { %v1000_v15 = vmul.f32 %v3239_v18, %v3233_v41  ;;  %v2066_v63 = vpop.permute.xlu1 %2065  ;;  %v1684_v41 = vcombine.high %v4281_v23, %v4281_v23 }
 0x58d   : > { %v1555_v17 = vpop.xlane.xlu0 %1554 }
 0x58e   : > { %v1695_v30 = vcombine.high %v1000_v15, %v1000_v15  ;;  %v1702_v52 = vrot.slane %v1000_v15, %v4251_v36  ;;  %3242 = vrcp.f32 %v1555_v17  ;;  %3039 = vmatmul.mubr.msk.f32.vlgmr.msra.gmra.mrb[2].mxu0 %vm706_vm11, %v1000_v15 }
 0x58f   : > { %v3241_v53 = vpop.eup %3240  ;;  %3047 = vmatpush3.msra.mxu0 %v1285_v29  ;;  %3048 = vmatprep.mubr.msk.f32.mxu0 %vm3532_vm0, %v3531_v1 }
 0x590   : > { %v4264_v47 = vrot.slane %v1695_v30, %v4251_v36  ;;  %v1710_v56 = vcombine.high %v1702_v52, %v1702_v52  ;;  %v1277_v57 = vmul.f32 %v3241_v53, %v3235_v45  ;;  %3056 = vmatprep.subr.mxu0 %v3531_v1  ;;  %v1718_v58 = vrot.slane %v1702_v52, %v4251_v36  ;;  %v2218_v15 = vpop.permute.xlu1 %2217 }
 0x591   : > { %v1559_v31 = vpop.permute.xlu0 %1558 }
 0x592   : > { %v1744_v62 = vcombine.high %v1277_v57, %v1277_v57  ;;  %v1751_v3 = vrot.slane %v1277_v57, %v4251_v36  ;;  %3049 = vmatmul.mubr.msk.f32.vlgmr.msra.gmra.mrb[4].mxu0 %vm706_vm11, %v1277_v57  ;;  %v1564_v51 = vsel %vm519_vm2, %v1559_v31, %v1562_v55  ;;  %v1732_v19 = vrot.slane %v1710_v56, %v4251_v36 }
 0x593   : > { %3057 = vmatpush3.msra.mxu0 %v1564_v51  ;;  %3058 = vmatprep.mubr.msk.f32.mxu0 %vm3532_vm0, %v3531_v1  ;;  %v1740_v26 = vcombine.high %v1718_v58, %v1718_v58  ;;  %v4285_v25 = vrot.slane %v4264_v47, %v4251_v36  ;;  %v1845_v27 = vrot.slane %v1718_v58, %v4269_v59 }
 0x594   : > { %3066 = vmatprep.subr.mxu0 %v3531_v1  ;;  %v1759_v5 = vcombine.high %v1751_v3, %v1751_v3  ;;  %v1767_v21 = vrot.slane %v1751_v3, %v4251_v36  ;;  %v1742_v28 = vcombine.high %v1732_v19, %v1732_v19  ;;  %v1758_v32 = vrot.slane %v1744_v62, %v4251_v36 }
 0x595   : > { %v1990_v2 = vpop.permute.xlu0 %1989  ;;  %v1849_v35 = vrot.slane %v1732_v19, %v4269_v59  ;;  %v1853_v37 = vrot.slane %v1740_v26, %v4269_v59  ;;  %v1861_v39 = vrot.slane %v4285_v25, %v4269_v59  ;;  %v1963_v0 = vsel %vm1962_vm12, %v1661_v60, %v1845_v27  ;;  %v2370_v27 = vpop.permute.xlu1 %2369 }
 0x596   : > { %3062 = vmatpush3.msra.mxu1 %v1990_v2  ;;  %v1781_v4 = vrot.slane %v1759_v5, %v4251_v36  ;;  %v1885_v22 = vrot.slane %v1767_v21, %v4269_v59  ;;  %v1789_v43 = vcombine.high %v1767_v21, %v1767_v21  ;;  %v1857_v45 = vrot.slane %v1742_v28, %v4269_v59 }
 0x597   : > { %3071 = vmatprep.subr.mxu1 %v3531_v1  ;;  %v4306_v46 = vrot.slane %v1758_v32, %v4251_v36  ;;  %v1964_v9 = vsel %vm1962_vm12, %v1675_v20, %v1849_v35  ;;  %v1967_v14 = vsel %vm1962_vm12, %v4281_v23, %v1861_v39  ;;  %v1711_v16 = vcombine.high %v4264_v47, %v4264_v47 }
 0x598   : > { %v3243_v38 = vpop.eup %3242  ;;  %v1791_v44 = vcombine.high %v1781_v4, %v1781_v4  ;;  %v1889_v49 = vrot.slane %v1781_v4, %v4269_v59  ;;  %v1972_v18 = vsel %vm1971_vm13, %v1963_v0, %v1885_v22  ;;  %v1893_v17 = vrot.slane %v1789_v43, %v4269_v59 }
 0x599   : > { %v1557_v42 = vmul.f32 %v3243_v38, %v4234_v48  ;;  %v1965_v48 = vsel %vm1962_vm12, %v1683_v33, %v1853_v37  ;;  %v2142_v12 = vpop.permute.xlu0 %2141  ;;  %v1966_v30 = vsel %vm1962_vm12, %v1685_v6, %v1857_v45  ;;  %v1760_v52 = vcombine.high %v1758_v32, %v1758_v32 }
 0x59a   : > { %v1897_v29 = vrot.slane %v1791_v44, %v4269_v59  ;;  %v1901_v55 = vrot.slane %v4306_v46, %v4269_v59  ;;  %v1973_v47 = vsel %vm1971_vm13, %v1964_v9, %v1889_v49  ;;  %v1739_v57 = vrot.slane %v1711_v16, %v4251_v36 }
 0x59b   : > { %v1793_v7 = vcombine.high %v1557_v42, %v1557_v42  ;;  %3059 = vmatmul.mubr.msk.f32.vlgmr.msra.gmra.mrb[6].mxu0 %vm706_vm11, %v1557_v42  ;;  %v1800_v8 = vrot.slane %v1557_v42, %v4251_v36  ;;  %v1974_v51 = vsel %vm1971_vm13, %v1965_v48, %v1893_v17  ;;  %v1788_v26 = vrot.slane %v1760_v52, %v4251_v36 }
 0x59c   : > { %3067 = vmatpush3.msra.mxu0 %v2066_v63  ;;  %3068 = vmatprep.mubr.msk.f32.mxu0 %vm3532_vm0, %v3531_v1  ;;  %v1975_v19 = vsel %vm1971_vm13, %v1966_v30, %v1897_v29  ;;  %v1741_v20 = vcombine.high %v4285_v25, %v4285_v25  ;;  %v1865_v4 = vrot.slane %v1739_v57, %v4269_v59  ;;  %v3552_v29 = vmov 1983009808  }
 0x59d   : > { %v1816_v50 = vrot.slane %v1800_v8, %v4251_v36  ;;  %3076 = vmatprep.subr.mxu0 %v3531_v1  ;;  %v1808_v11 = vcombine.high %v1800_v8, %v1800_v8  ;;  %v1807_v13 = vrot.slane %v1793_v7, %v4251_v36  ;;  %v2294_v10 = vpop.permute.xlu0 %2293  ;;  %v1790_v25 = vcombine.high %v4306_v46, %v4306_v46  ;;  %v2522_v7 = vpop.permute.xlu1 %2521 }
 0x59e   : > { %v1743_v28 = vcombine.high %v1739_v57, %v1739_v57  ;;  %v1905_v33 = vrot.slane %v1788_v26, %v4269_v59  ;;  %v1869_v37 = vrot.slane %v1741_v20, %v4269_v59  ;;  %v1792_v38 = vcombine.high %v1788_v26, %v1788_v26 }
 0x59f   : > { %v1925_v53 = vrot.slane %v1816_v50, %v4269_v59  ;;  %v1830_v54 = vrot.slane %v1808_v11, %v4251_v36  ;;  %v1838_v24 = vcombine.high %v1816_v50, %v1816_v50  ;;  %v1823_v56 = vrot.slane %v1807_v13, %v4251_v36 }
 0x5a0   : > { %v1809_v58 = vcombine.high %v1807_v13, %v1807_v13  ;;  %v1976_v42 = vsel %vm1971_vm13, %v1967_v14, %v1901_v55  ;;  %v1968_v0 = vsel %vm1962_vm12, %v4297_v40, %v1865_v4  ;;  %v1909_v43 = vrot.slane %v1790_v25, %v4269_v59 }
 0x5a1   : > { %v1981_v31 = vsel %vm1980_vm14, %v1972_v18, %v1925_v53  ;;  %v1929_v60 = vrot.slane %v1830_v54, %v4269_v59  ;;  %v1933_v62 = vrot.slane %v1838_v24, %v4269_v59  ;;  %v1840_v3 = vcombine.high %v1830_v54, %v1830_v54  ;;  %v2446_v22 = vpop.permute.xlu0 %2445 }
 0x5a2   : > { %3064 = vmatmul.mubr.msk.f32.vlgmr.msra.gmra.mrb[8].mxu1 %vm706_vm11, %v1981_v31  ;;  %v1837_v21 = vrot.slane %v1809_v58, %v4251_v36  ;;  %v1941_v35 = vrot.slane %v1823_v56, %v4269_v59  ;;  %v1839_v36 = vcombine.high %v1823_v56, %v1823_v56  ;;  %v1873_v46 = vrot.slane %v1743_v28, %v4269_v59 }
 0x5a3   : > { %v1982_v5 = vsel %vm1980_vm14, %v1973_v47, %v1929_v60  ;;  %3072 = vmatpush3.msra.mxu1 %v2142_v12  ;;  %3073 = vmatprep.mubr.msk.f32.mxu1 %vm3532_vm0, %v3531_v1  ;;  %v1937_v2 = vrot.slane %v1840_v3, %v4269_v59  ;;  %v1983_v32 = vsel %vm1980_vm14, %v1974_v51, %v1933_v62  ;;  %v2599_v30 = vunpack.c.l.s4 %v3552_v29 }
 0x5a4   : > { %3069 = vmatmul.mubr.msk.f32.vlgmr.msra.gmra.mrb[8].mxu0 %vm706_vm11, %v1982_v5  ;;  %3081 = vmatprep.subr.mxu1 %v3531_v1  ;;  %v1945_v6 = vrot.slane %v1837_v21, %v4269_v59  ;;  %v1841_v39 = vcombine.high %v1837_v21, %v1837_v21  ;;  %v1985_v44 = vsel %vm1980_vm14, %v1976_v42, %v1941_v35 }
 0x5a5   : > { %3077 = vmatpush3.msra.mxu0 %v2218_v15  ;;  %3078 = vmatprep.mubr.msk.f32.mxu0 %vm3532_vm0, %v3531_v1  ;;  %v1984_v63 = vsel %vm1980_vm14, %v1975_v19, %v1937_v2  ;;  %v1949_v45 = vrot.slane %v1839_v36, %v4269_v59  ;;  %v1977_v8 = vsel %vm1971_vm13, %v1968_v0, %v1905_v33  ;;  %v2600_v53 = vunpack.c.0.s8 %v2599_v30 }
 0x5a6   : > { %3074 = vmatmul.mubr.msk.f32.vlgmr.msra.gmra.mrb[10].mxu1 %vm706_vm11, %v1983_v32  ;;  %3086 = vmatprep.subr.mxu0 %v3531_v1  ;;  %v1686_v9 = vcombine.high %v4297_v40, %v4297_v40  ;;  %v1913_v48 = vrot.slane %v1792_v38, %v4269_v59  ;;  %v1986_v12 = vsel %vm1980_vm14, %v1977_v8, %v1945_v6 }
 0x5a7   : > { %3082 = vmatpush3.msra.mxu1 %v2294_v10  ;;  %3083 = vmatprep.mubr.msk.f32.mxu1 %vm3532_vm0, %v3531_v1  ;;  %v1969_v49 = vsel %vm1962_vm12, %v1684_v41, %v1869_v37  ;;  %v1953_v14 = vrot.slane %v1841_v39, %v4269_v59  ;;  %v2603_v56 = vsub.s32 %v2600_v53, %v4011_v34  ;;  %v3553_v10 = vmov 1934713408  }
 0x5a8   : > { %3079 = vmatmul.mubr.msk.f32.vlgmr.msra.gmra.mrb[10].mxu0 %vm706_vm11, %v1984_v63  ;;  %3091 = vmatprep.subr.mxu1 %v3531_v1  ;;  %v1978_v16 = vsel %vm1971_vm13, %v1969_v49, %v1909_v43  ;;  %v1970_v50 = vsel %vm1962_vm12, %v1686_v9, %v1873_v46  ;;  %v2632_v19 = vunpack.c.l.s4 %v3553_v10 }
 0x5a9   : > { %3087 = vmatpush3.msra.mxu0 %v2370_v27  ;;  %3088 = vmatprep.mubr.msk.f32.mxu0 %vm3532_vm0, %v3531_v1  ;;  %v1987_v40 = vsel %vm1980_vm14, %v1978_v16, %v1949_v45  ;;  %v1979_v23 = vsel %vm1971_vm13, %v1970_v50, %v1913_v48 }
 0x5aa   : > { %3084 = vmatmul.mubr.msk.f32.vlgmr.msra.gmra.mrb[12].mxu1 %vm706_vm11, %v1985_v44  ;;  %3096 = vmatprep.subr.mxu0 %v3531_v1  ;;  %v1988_v41 = vsel %vm1980_vm14, %v1979_v23, %v1953_v14  ;;  %v2633_v4 = vunpack.c.0.s8 %v2632_v19 }
 0x5ab   : > { %3092 = vmatpush3.msra.mxu1 %v2446_v22  ;;  %3093 = vmatprep.mubr.msk.f32.mxu1 %vm3532_vm0, %v3531_v1 }
 0x5ac   : > { %3089 = vmatmul.mubr.msk.f32.vlgmr.msra.gmra.mrb[12].mxu0 %vm706_vm11, %v1986_v12  ;;  %v2636_v33 = vsub.s32 %v2633_v4, %v4011_v34 }
 0x5ad   : > { %3097 = vmatpush3.msra.mxu0 %v2522_v7  ;;  %3098 = vmatprep.mubr.msk.f32.mxu0 %vm3532_vm0, %v3531_v1  ;;  %vm2711_vm0 = vcmask 261120  }
 0x5ae   : > { %3094 = vmatmul.mubr.msk.f32.vlgmr.msra.gmra.mrb[14].mxu1 %vm706_vm11, %v1987_v40 }
 0x5b0   : > { %3099 = vmatmul.mubr.msk.f32.vlgmr.msra.gmra.mrb[14].mxu0 %vm706_vm11, %v1988_v41 }
 0x661   : > { %v1077_v59 = vpop.f32.mrb[2].mxu0 }
 0x662   : > { %v3040_v18 = vpop.f32.mrb[3].mxu0 }
 0x665   : > { %v1355_v11 = vpop.f32.mrb[4].mxu0 }
 0x666   : > { %v3050_v13 = vpop.f32.mrb[5].mxu0 }
 0x66e   : > { %v1634_v15 = vpop.f32.mrb[6].mxu0 }
 0x66f   : > { %v3060_v17 = vpop.f32.mrb[7].mxu0 }
 0x675   : > { %v2061_v52 = vpop.f32.mrb[8].mxu1 }
 0x676   : > { %v3065_v1 = vpop.f32.mrb[9].mxu1 }
 0x677   : > { %v2137_v54 = vpop.f32.mrb[8].mxu0 }
 0x678   : > { %v3070_v24 = vpop.f32.mrb[9].mxu0 }
 0x679   : > { %v2213_v55 = vpop.f32.mrb[10].mxu1 }
 0x67a   : > { %v2597_v47 = vcombine.low %v2061_v52, %v2213_v55  ;;  %v3075_v57 = vpop.f32.mrb[11].mxu1 }
 0x67b   : > { %v2289_v58 = vpop.f32.mrb[10].mxu0 }
 0x67c   : > { %v2605_v31 = vcombine.low %v2137_v54, %v2289_v58  ;;  %v3080_v60 = vpop.f32.mrb[11].mxu0  ;;  %v2604_v3 = vrot.slane %v2597_v47, %v2603_v56 }
 0x67d   : > { %v2365_v62 = vpop.f32.mrb[12].mxu1 }
 0x67e   : > { %v2612_v51 = vrot.slane %v2605_v31, %v2603_v56  ;;  %v3085_v26 = vpop.f32.mrb[13].mxu1 }
 0x67f   : > { %v2441_v20 = vpop.f32.mrb[12].mxu0 }
 0x680   : > { %v2629_v5 = vcombine.low %v2604_v3, %v2612_v51  ;;  %v2630_v2 = vcombine.high %v2604_v3, %v2612_v51  ;;  %v3090_v21 = vpop.f32.mrb[13].mxu0 }
 0x681   : > { %v2517_v27 = vpop.f32.mrb[14].mxu1 }
 0x682   : > { %v2613_v25 = vcombine.low %v2365_v62, %v2517_v27  ;;  %v3095_v28 = vpop.f32.mrb[15].mxu1  ;;  %v2644_v39 = vrot.slane %v2630_v2, %v2636_v33  ;;  %v2637_v22 = vrot.slane %v2629_v5, %v2636_v33 }
 0x683   : > { %v2593_v32 = vpop.f32.mrb[14].mxu0 }
 0x684   : > { %v2621_v35 = vcombine.low %v2441_v20, %v2593_v32  ;;  %v3100_v36 = vpop.f32.mrb[15].mxu0  ;;  %v2620_v37 = vrot.slane %v2613_v25, %v2603_v56 }
 0x686   : > { %v2628_v38 = vrot.slane %v2621_v35, %v2603_v56 }
 0x688   : > { %v2645_v63 = vcombine.low %v2620_v37, %v2628_v38  ;;  %v2646_v6 = vcombine.high %v2620_v37, %v2628_v38 }
 0x68a   : > { %v2660_v42 = vrot.slane %v2646_v6, %v2636_v33  ;;  %v2653_v0 = vrot.slane %v2645_v63, %v2636_v33 }
 0x68c   : > { %v2663_v43 = vcombine.low %v2644_v39, %v2660_v42  ;;  %v2662_v44 = vcombine.high %v2637_v22, %v2653_v0  ;;  %v2664_v45 = vcombine.high %v2644_v39, %v2660_v42  ;;  %v2661_v46 = vcombine.low %v2637_v22, %v2653_v0 }
 0x68e   : > { %2670 = vrot.lane.b32.xlu1 %v2663_v43, %s3554_s14  ;;  %2666 = vrot.lane.b32.xlu0 %v2662_v44, %s3536_s11 }
 0x692   : > { %2682 = vrot.lane.b32.xlu1 %v1077_v59, %s3534_s18  ;;  %2674 = vrot.lane.b32.xlu0 %v2664_v45, %s3555_s23  ;;  %s488_s18 = scalar_lea.vmem [#allocation15], %s2951_s7  ;;  %s2726_s7 = scalar_lea.sflag [#allocation4], %s3888_s21 }
 0x693   : > { %s2740_s11 = sshll.u32 %s488_s18, 4  ;;  %s4426_s11 = int_to_ptr.vmem [resolvable:$true] %s2740_s11 }
 0x694   : > { %p3444_p7 = scmp.lt.s32.totalorder %s4426_s11, %s3442_s29 }
 0x696   : > { %2690 = vrot.lane.b32.xlu1 %v1634_v15, %s3535_s9  ;;  %2686 = vrot.lane.b32.xlu0 %v1355_v11, %s3537_s12 }
 0x69a   : > { %2697 = vrot.lane.b32.xlu1 %v1077_v59, %s3549_s13  ;;  %2694 = vrot.lane.b32.xlu0 %v4179_v61, %s3535_s9  ;;  %s2988_s9 = sshll.u32 %s3719_s2, 8  ;;  %s3437_s2 = scalar_lea.vmem %s4426_s11, 256 }
 0x69b   : > { %p3438_p1 = scmp.ne.s32.totalorder %s4426_s11, %s3437_s2 }
 0x69d   : > { %p3439_p9 = pnand %p3438_p1, %p4522_p0 }
 0x69e   : > { %2703 = vrot.lane.b32.xlu1 %v1634_v15, %s3539_s24  ;;  %2700 = vrot.lane.b32.xlu0 %v1355_v11, %s3543_s8  ;;  %s4520_s24 = sld [smem:[#allocation29_spill]]  ;;  %s3443_s8 = scalar_lea.vmem %s3442_s29, 512 }
 0x69f   : > { %p3440_p2 = pneg %p3439_p9  ;;  %p3445_p11 = scmp.lt.s32.totalorder %s3443_s8, %s3437_s2 }
 0x6a1   : > { %p3446_p10 = por %p3445_p11, %p3444_p7 }
 0x6a3   : > { %p3447_p12 = pnand %p3446_p10, %p3440_p2 }
 0x6a4   : > { %s4521_s15 = smov %s4520_s24  ;;  %s4424_s26 = scalar_lea.hbm %s4520_s24, %s2988_s9 }
 0x700   : > { %v2671_v34 = vpop.permute.xlu1 %2670  ;;  %v2667_v7 = vpop.permute.xlu0 %2666 }
 0x701   : > { %v2678_v8 = vsel %vm2677_vm15, %v2661_v46, %v2667_v7 }
 0x702   : > { %v2679_v12 = vsel %vm706_vm11, %v2678_v8, %v2671_v34 }
 0x704   : > { %v2683_v9 = vpop.permute.xlu1 %2682  ;;  %v2675_v48 = vpop.permute.xlu0 %2674 }
 0x705   : > { %v2680_v49 = vsel %vm504_vm1, %v2679_v12, %v2675_v48  ;;  %v2710_v14 = vsel %vm519_vm2, %v4179_v61, %v2683_v9  ;;  %vm2717_vm1 = vcmask 719872  }
 0x706   : > { %2707 = vrot.lane.b32.xlu0 %v2680_v49, %s3537_s12 }
 0x708   : > { %v2691_v16 = vpop.permute.xlu1 %2690  ;;  %v2687_v40 = vpop.permute.xlu0 %2686 }
 0x709   : > { %v2712_v50 = vsel %vm2711_vm0, %v2710_v14, %v2687_v40 }
 0x70a   : > { %v2714_v23 = vsel %vm2713_vm3, %v2712_v50, %v2691_v16 }
 0x70c   : > { %v2695_v41 = vpop.permute.xlu0 %2694  ;;  %v2698_v59 = vpop.permute.xlu1 %2697 }
 0x70d   : > { %v2716_v18 = vsel %vm2715_vm4, %v2714_v23, %v2695_v41 }
 0x70e   : > { %v2718_v11 = vsel %vm2717_vm1, %v2716_v18, %v2698_v59 }
 0x710   : > { %v2701_v13 = vpop.permute.xlu0 %2700  ;;  %v2704_v61 = vpop.permute.xlu1 %2703 }
 0x711   : > { %v2720_v15 = vsel %vm2719_vm5, %v2718_v11, %v2701_v13  ;;  %v2721_v17 = vsel %vm706_vm11, %v2701_v13, %v2704_v61 }
 0x712   : > { %2723 = vst [vmem:[%s488_s18] sm:$0xff] %v2720_v15 }
 0x778   : > { %v2708_v29 = vpop.permute.xlu0 %2707 }
 0x779   : > { %v2722_v30 = vsel %vm2711_vm0, %v2721_v17, %v2708_v29 }
 0x77a   : > { %2724 = vst.msk [vmem:[%s488_s18 + $0x8] sm:$0xff] %vm2713_vm3, %v2722_v30 }
 0x77b   : > { %3450 = shalt.err (!%p3447_p12)
}
 0x77c   : > { %s3451_s21 = scalar_lea.hbm %s4424_s26, 256  ;;  %s3455_s22 = scalar_lea.hbm %s4521_s15, 512 }
 0x77d   : > { %p3452_p3 = scmp.ne.s32.totalorder %s4424_s26, %s3451_s21  ;;  %p3456_p6 = scmp.lt.u32.totalorder %s4424_s26, %s4521_s15 }
 0x77e   : > { %p3457_p8 = scmp.lt.u32.totalorder %s3455_s22, %s3451_s21  ;;  %p3459_p1 = scmp.lt.u32.totalorder %s3451_s21, %s4424_s26 }
 0x77f   : > { %p3453_p13 = pnand %p3452_p3, %p4522_p0 }
 0x780   : > { %p3458_p4 = por %p3457_p8, %p3456_p6 }
 0x781   : > { %p3454_p5 = pneg %p3453_p13 }
 0x782   : > { %p3460_p9 = por %p3459_p1, %p3458_p4 }
 0x784   : > { %p3461_p2 = pnand %p3460_p9, %p3454_p5 }
 0x786   : > { %3464 = shalt.err (!%p3461_p2)
}
 0x787   : > { %3117 = dma.vmem_to_hbm [thread:$0]  (%p4522_p0), %s4426_s11, 256, %s4424_s26, %s2726_s7  }
 0x788 PF: > { %s4523_s13 = sld [smem:[#allocation22_spill]]  ;;  %s4524_s10 = sld [smem:[#allocation26_spill]] }
 0x789   : > { %p4526_p11 = scmp.ge.s32.totalorder %s3519_s27, 2 }
 0x78e   : > { %s2752_s14 = sand.u32 1, %s4523_s13   ;;  %p4525_p7 = scmp.ne.s32.totalorder %s4524_s10, 0 }
 0x78f   : > { %s2753_s23 = scalar_lea.sflag [#allocation4], %s2752_s14 }
 0x790   : > { %p3143_p10 = pnand %p4526_p11, %p4525_p7 }
 0x792   : > { %3502 = dma.done.wait (!%p3143_p10), %s2753_s23, 256  }
 0x793   : > { %3504 = vsyncadd (!%p3143_p10), %s2753_s23, 4294967040  ;;  %s4527_s27 = sld [smem:[#allocation24_spill]]  ;;  %s4528_s18 = sld [smem:[#allocation23_spill]] }
 0x794   : > { %s4529_s26 = sld [smem:[#allocation25_spill]]  ;;  %s4530_s24 = smov %s3511_s25 }
 0x799   : > { %p30_p12 = scmp.ge.s32.totalorder %s4527_s27, 4   ;;  %s4531_s25 = smov %s4528_s18 }
 0x79b   :  { %32 = sbr.rel (!%p30_p12) target bundleno = 16 (0x10), region = 159 }
 0x7a2   :  { %2758 = vsyncpa [#allocation3], 1 }
 0x7a3   :  { %2760 = vsyncpa [#allocation3 + $0x1], 1 }
 0x7a4   :  { %2761 = vsyncpa [#allocation8], 1 }
 0x7a5   :  { %2763 = vsyncpa [#allocation8 + $0x1], 1 }
 0x7a6   :  { %2764 = vsyncpa [#allocation11], 1 }
 0x7a7   :  { %2766 = vsyncpa [#allocation11 + $0x1], 1 }
 0x7a8   :  { %2767 = vsyncpa [#allocation14], 1 }
 0x7a9   :  { %2769 = vsyncpa [#allocation14 + $0x1], 1 }
 0x7aa   :  { %2770 = vsyncpa [#allocation4], 1 }
 0x7ab   :  { %2772 = vsyncpa [#allocation4 + $0x1], 1 }
 0x7ac   :  { %2773 = vsyncpa [#allocation5], 1 }
 0x7ad   :  { %2775 = vsyncpa [#allocation5 + $0x1], 1 }

</bundles_post_ra>
